<compile_context>
chip_gen: v5e
topology: v5e:2x2
jax: 0.10.0
libtpu: 0.0.40
codegen_flags: <defaults>
</compile_context>

<pallas_src>
import functools

import jax
import jax.numpy as jnp
from jax.experimental import pallas as pl
from jax.experimental.pallas import tpu as pltpu

N_EMBED = 384
HIDDEN = 4 * N_EMBED          # 1536
DROPOUT_P = 0.2

# Drop iff (random int32) < threshold, where the int32 is uniform over
# [-2^31, 2^31).  P(drop) = (threshold + 2^31) / 2^32 = DROPOUT_P.
DROP_THRESHOLD_I32 = int(round(DROPOUT_P * 2**32)) - 2**31   # = -1288490189


def _round_up(n, m):
    return ((n + m - 1) // m) * m


def _ffn_kernel(*refs, p_drop: float, training: bool):
    if training:
        x_ref, w1_ref, b1_ref, w2_ref, b2_ref, bits_ref, o_ref = refs
    else:
        x_ref, w1_ref, b1_ref, w2_ref, b2_ref, o_ref = refs

    # First linear (MXU, f32 accumulation) + bias + ReLU in f32.
    h = jnp.dot(x_ref[...], w1_ref[...], preferred_element_type=jnp.float32)
    h = jnp.maximum(h + b1_ref[...], 0.0)

    # Second linear.  h intermediate is (tile_m, 1536) f32 — fine up to
    # tile_m ~512 even on v7x's 64 MiB VMEM.
    y = jnp.dot(h.astype(w2_ref.dtype), w2_ref[...],
                preferred_element_type=jnp.float32)
    y = y + b2_ref[...]

    if training:
        # Inverted dropout, integer-domain decision: keep with prob (1-p),
        # scale kept values by 1/(1-p).  One compare + one select per element.
        keep = bits_ref[...] >= DROP_THRESHOLD_I32
        y = jnp.where(keep, y * (1.0 / (1.0 - p_drop)), 0.0)

    o_ref[...] = y.astype(o_ref.dtype)


def feed_forward(x, w1, b1, w2, b2, *, key=None, training=True,
                 tile_m=256, mxu_dtype=jnp.bfloat16):
    """x: (B, T, N_EMBED) -> (B, T, N_EMBED).

    Weights are (in_features, out_features) (transpose of nn.Linear.weight).
    """
    B, T, D = x.shape
    assert D == N_EMBED
    M = B * T

    # Tile sizing: multiple of 8 (sublane), capped so tiny inputs don't blow up.
    tile_m = max(8, min(tile_m, _round_up(M, 8)))
    M_pad = _round_up(M, tile_m)

    x2 = x.reshape(M, D).astype(mxu_dtype)
    if M_pad != M:
        x2 = jnp.pad(x2, ((0, M_pad - M), (0, 0)))

    w1_ = w1.astype(mxu_dtype)
    w2_ = w2.astype(mxu_dtype)
    b1_ = b1.reshape(1, HIDDEN).astype(jnp.float32)
    b2_ = b2.reshape(1, N_EMBED).astype(jnp.float32)

    # Grid-invariant operands: single-buffered (no point double-buffering them).
    resident = dict(pipeline_mode=pl.Buffered(1))
    in_specs = [
        pl.BlockSpec((tile_m, N_EMBED), lambda i: (i, 0)),
        pl.BlockSpec((N_EMBED, HIDDEN), lambda i: (0, 0), **resident),
        pl.BlockSpec((1, HIDDEN),       lambda i: (0, 0), **resident),
        pl.BlockSpec((HIDDEN, N_EMBED), lambda i: (0, 0), **resident),
        pl.BlockSpec((1, N_EMBED),      lambda i: (0, 0), **resident),
    ]
    operands = [x2, w1_, b1_, w2_, b2_]

    if training:
        if key is None:
            key = jax.random.PRNGKey(0)
        bits = jax.random.bits(key, (M_pad, N_EMBED), dtype=jnp.uint32)
        rbits = jax.lax.bitcast_convert_type(bits, jnp.int32)
        in_specs.append(pl.BlockSpec((tile_m, N_EMBED), lambda i: (i, 0)))
        operands.append(rbits)

    kernel = functools.partial(_ffn_kernel, p_drop=DROPOUT_P, training=training)

    out = pl.pallas_call(
        kernel,
        out_shape=jax.ShapeDtypeStruct((M_pad, N_EMBED), x.dtype),
        grid=(M_pad // tile_m,),
        in_specs=in_specs,
        out_specs=pl.BlockSpec((tile_m, N_EMBED), lambda i: (i, 0)),
        compiler_params=pltpu.CompilerParams(
            # Each M-tile writes an independent output block -> parallel
            # (lets v7x shard the grid across its 2 TensorCores).
            dimension_semantics=("parallel",),
            vmem_limit_bytes=32 * 1024 * 1024,
        ),
    )(*operands)

    return out[:M].reshape(B, T, N_EMBED)


def init_params(key):
    """Deterministic init matching nn.Linear's U(-1/sqrt(fan_in), 1/sqrt(fan_in))."""
    k1, k2, k3, k4 = jax.random.split(key, 4)
    lim1 = 1.0 / jnp.sqrt(jnp.float32(N_EMBED))
    lim2 = 1.0 / jnp.sqrt(jnp.float32(HIDDEN))
    # Stored as (in_features, out_features) so the kernel computes x @ W + b.
    w1 = jax.random.uniform(k1, (N_EMBED, HIDDEN), jnp.float32, -lim1, lim1)
    b1 = jax.random.uniform(k2, (HIDDEN,), jnp.float32, -lim1, lim1)
    w2 = jax.random.uniform(k3, (HIDDEN, N_EMBED), jnp.float32, -lim2, lim2)
    b2 = jax.random.uniform(k4, (N_EMBED,), jnp.float32, -lim2, lim2)
    return w1, b1, w2, b2


if __name__ == "__main__":
    key = jax.random.PRNGKey(0)
    kx, kp, kd = jax.random.split(key, 3)

    B, T = 2, 8
    x = jax.random.normal(kx, (B, T, N_EMBED), jnp.float32)
    w1, b1, w2, b2 = init_params(kp)

    # Freshly-constructed PyTorch module => training mode => dropout active.
    out = jax.block_until_ready(
        feed_forward(x, w1, b1, w2, b2, key=kd, training=True))
    assert out.shape == (B, T, N_EMBED)
    assert out.dtype == jnp.float32
    assert bool(jnp.all(jnp.isfinite(out)))

    # Roughly 20% of outputs should be dropped (zeroed).
    drop_frac = float(jnp.mean(out.reshape(-1) == 0.0))
    assert 0.1 < drop_frac < 0.3, drop_frac

    # Eval-mode correctness (dropout = identity) vs pure-JAX f32 reference.
    ref = jnp.maximum(x.reshape(-1, N_EMBED) @ w1 + b1, 0.0) @ w2 + b2
    ref = ref.reshape(B, T, N_EMBED)

    # f32 MXU path: tight tolerance.
    out_f32 = jax.block_until_ready(
        feed_forward(x, w1, b1, w2, b2, training=False, mxu_dtype=jnp.float32))
    assert jnp.allclose(out_f32, ref, atol=1e-4, rtol=1e-4)

    # bf16 fast path (default): looser tolerance for the bf16-input matmuls.
    out_bf16 = jax.block_until_ready(
        feed_forward(x, w1, b1, w2, b2, training=False))
    assert jnp.allclose(out_bf16, ref, atol=3e-2, rtol=3e-2)

    print("KERNEL_OK")
</pallas_src>

<mosaic_0001>
module attributes {stable_mosaic.version = 11 : i64} {
  func.func @_ffn_kernel(%arg0: i32, %arg1: memref<16x384xbf16, #tpu.memory_space<vmem>>, %arg2: memref<384x1536xbf16, #tpu.memory_space<vmem>>, %arg3: memref<1x1536xf32, #tpu.memory_space<vmem>>, %arg4: memref<1536x384xbf16, #tpu.memory_space<vmem>>, %arg5: memref<1x384xf32, #tpu.memory_space<vmem>>, %arg6: memref<16x384xi32, #tpu.memory_space<vmem>>, %arg7: memref<16x384xf32, #tpu.memory_space<vmem>>) attributes {dimension_semantics = [#tpu.dimension_semantics<parallel>], iteration_bounds = array<i64: 1>, scalar_prefetch = 0 : i64, scratch_operands = 0 : i64, tpu.core_type = #tpu.core_type<tc>, window_params = [{transform_indices = @transform_0, window_bounds = array<i64: 16, 384>}, {pipeline_mode = #tpu.pipeline_mode<synchronous>, transform_indices = @transform_1, window_bounds = array<i64: 384, 1536>}, {pipeline_mode = #tpu.pipeline_mode<synchronous>, transform_indices = @transform_2, window_bounds = array<i64: 1, 1536>}, {pipeline_mode = #tpu.pipeline_mode<synchronous>, transform_indices = @transform_3, window_bounds = array<i64: 1536, 384>}, {pipeline_mode = #tpu.pipeline_mode<synchronous>, transform_indices = @transform_4, window_bounds = array<i64: 1, 384>}, {transform_indices = @transform_5, window_bounds = array<i64: 16, 384>}, {transform_indices = @transform_6, window_bounds = array<i64: 16, 384>}]} {
    %c0 = arith.constant 0 : index
    %c0_0 = arith.constant 0 : index
    %0 = vector.load %arg1[%c0, %c0_0] : memref<16x384xbf16, #tpu.memory_space<vmem>>, vector<16x384xbf16>
    %c0_1 = arith.constant 0 : index
    %c0_2 = arith.constant 0 : index
    %1 = vector.load %arg2[%c0_1, %c0_2] : memref<384x1536xbf16, #tpu.memory_space<vmem>>, vector<384x1536xbf16>
    %cst = arith.constant dense<0.000000e+00> : vector<16x1536xf32>
    %2 = tpu.matmul %0, %1, %cst {dimension_numbers = #tpu.dot_dimension_numbers<[1], [0], [0], [1], [0, 0, 1, 1], [], []>} : vector<16x384xbf16>, vector<384x1536xbf16>, vector<16x1536xf32> -> vector<16x1536xf32>
    %c0_3 = arith.constant 0 : index
    %c0_4 = arith.constant 0 : index
    %3 = vector.load %arg3[%c0_3, %c0_4] : memref<1x1536xf32, #tpu.memory_space<vmem>>, vector<1x1536xf32>
    %4 = vector.broadcast %3 : vector<1x1536xf32> to vector<16x1536xf32>
    %5 = arith.addf %2, %4 : vector<16x1536xf32>
    %cst_5 = arith.constant 0.000000e+00 : f32
    %6 = vector.broadcast %cst_5 : f32 to vector<16x1536xf32>
    %7 = arith.maximumf %5, %6 : vector<16x1536xf32>
    %8 = arith.truncf %7 : vector<16x1536xf32> to vector<16x1536xbf16>
    %c0_6 = arith.constant 0 : index
    %c0_7 = arith.constant 0 : index
    %9 = vector.load %arg4[%c0_6, %c0_7] : memref<1536x384xbf16, #tpu.memory_space<vmem>>, vector<1536x384xbf16>
    %cst_8 = arith.constant dense<0.000000e+00> : vector<16x384xf32>
    %10 = tpu.matmul %8, %9, %cst_8 {dimension_numbers = #tpu.dot_dimension_numbers<[1], [0], [0], [1], [0, 0, 1, 1], [], []>} : vector<16x1536xbf16>, vector<1536x384xbf16>, vector<16x384xf32> -> vector<16x384xf32>
    %c0_9 = arith.constant 0 : index
    %c0_10 = arith.constant 0 : index
    %11 = vector.load %arg5[%c0_9, %c0_10] : memref<1x384xf32, #tpu.memory_space<vmem>>, vector<1x384xf32>
    %12 = vector.broadcast %11 : vector<1x384xf32> to vector<16x384xf32>
    %13 = arith.addf %10, %12 : vector<16x384xf32>
    %c0_11 = arith.constant 0 : index
    %c0_12 = arith.constant 0 : index
    %14 = vector.load %arg6[%c0_11, %c0_12] : memref<16x384xi32, #tpu.memory_space<vmem>>, vector<16x384xi32>
    %c-1288490189_i32 = arith.constant -1288490189 : i32
    %15 = vector.broadcast %c-1288490189_i32 : i32 to vector<16x384xi32>
    %16 = arith.cmpi sge, %14, %15 : vector<16x384xi32>
    %cst_13 = arith.constant 1.250000e+00 : f32
    %17 = vector.broadcast %cst_13 : f32 to vector<16x384xf32>
    %18 = arith.mulf %13, %17 : vector<16x384xf32>
    %cst_14 = arith.constant 0.000000e+00 : f32
    %19 = vector.broadcast %cst_14 : f32 to vector<16x384xf32>
    %20 = arith.select %16, %18, %19 : vector<16x384xi1>, vector<16x384xf32>
    %c0_15 = arith.constant 0 : index
    %c0_16 = arith.constant 0 : index
    %21 = vector.load %arg7[%c0_15, %c0_16] : memref<16x384xf32, #tpu.memory_space<vmem>>, vector<16x384xf32>
    tpu.vector_store %arg7[%c0_15, %c0_16], %20 {strides = array<i32>} : memref<16x384xf32, #tpu.memory_space<vmem>>, vector<16x384xf32>,
    return
  }
  func.func @transform_0(%arg0: i32) -> (i32, i32) {
    %c0_i32 = arith.constant 0 : i32
    %c0_i32_0 = arith.constant 0 : i32
    return %arg0, %c0_i32 : i32, i32
  }
  func.func @transform_1(%arg0: i32) -> (i32, i32) {
    %c0_i32 = arith.constant 0 : i32
    %c0_i32_0 = arith.constant 0 : i32
    %c0_i32_1 = arith.constant 0 : i32
    return %c0_i32, %c0_i32_0 : i32, i32
  }
  func.func @transform_2(%arg0: i32) -> (i32, i32) {
    %c0_i32 = arith.constant 0 : i32
    %c0_i32_0 = arith.constant 0 : i32
    %c0_i32_1 = arith.constant 0 : i32
    return %c0_i32, %c0_i32_0 : i32, i32
  }
  func.func @transform_3(%arg0: i32) -> (i32, i32) {
    %c0_i32 = arith.constant 0 : i32
    %c0_i32_0 = arith.constant 0 : i32
    %c0_i32_1 = arith.constant 0 : i32
    return %c0_i32, %c0_i32_0 : i32, i32
  }
  func.func @transform_4(%arg0: i32) -> (i32, i32) {
    %c0_i32 = arith.constant 0 : i32
    %c0_i32_0 = arith.constant 0 : i32
    %c0_i32_1 = arith.constant 0 : i32
    return %c0_i32, %c0_i32_0 : i32, i32
  }
  func.func @transform_5(%arg0: i32) -> (i32, i32) {
    %c0_i32 = arith.constant 0 : i32
    %c0_i32_0 = arith.constant 0 : i32
    return %arg0, %c0_i32 : i32, i32
  }
  func.func @transform_6(%arg0: i32) -> (i32, i32) {
    %c0_i32 = arith.constant 0 : i32
    %c0_i32_0 = arith.constant 0 : i32
    return %arg0, %c0_i32 : i32, i32
  }
}

</mosaic_0001>

<bundles_post_ra>
// kernel: tpu_custom_call.1
= control target key start
LH: loop header
LB: loop body
LE: loop exit
PB: predicated region body
PF: predicated region fallthrough
CT: control target
= control target key end

     0   :  { %11 = vsyncpa [#allocation3], 0  ;;  %s8366_s0 = inlined_call_operand.hbm [shape: bf16[16,384], index: 0, kind: input, shape index: {}]   ;;  %s8367_s1 = inlined_call_operand.hbm [shape: bf16[384,1536], index: 1, kind: input, shape index: {}]   ;;  %s8368_s2 = inlined_call_operand.hbm [shape: f32[1,1536], index: 2, kind: input, shape index: {}]   ;;  %s8369_s3 = inlined_call_operand.hbm [shape: bf16[1536,384], index: 3, kind: input, shape index: {}]   ;;  %s8370_s4 = inlined_call_operand.hbm [shape: f32[1,384], index: 4, kind: input, shape index: {}]   ;;  %s8371_s5 = inlined_call_operand.hbm [shape: s32[16,384], index: 5, kind: input, shape index: {}]   ;;  %s8372_s6 = inlined_call_operand.hbm [shape: f32[16,384], index: 6, kind: output, shape index: {}]  }
   0x1   :  { %12 = vsyncpa [#allocation6], 0 }
   0x2   :  { %13 = vsyncpa [#allocation9], 0 }
   0x3   :  { %14 = vsyncpa [#allocation12], 0  ;;  %s33_s23 = sshll.u32 %s8367_s1, 4  ;;  %s34_s23 = int_to_ptr.hbm [resolvable:$true] %s33_s23 }
   0x4   :  { %15 = vsyncpa [#allocation4], 0  ;;  %s8000_s24 = smov [#allocation5]   ;;  %s8001_s26 = smov 768  }
   0x5   :  { %s35_s25 = sshll.u32 %s8000_s24, 4  ;;  %s8002_s27 = smov 48   ;;  %s36_s25 = int_to_ptr.vmem [resolvable:$true] %s35_s25 }
   0x6   :  { %41 = dma.hbm_to_vmem [thread:$0]  %s34_s23, 36864, %s36_s25, [#allocation6], %s8001_s26, %s8001_s26, %s8002_s27  }
   0x7   :  { %s57_s30 = sshll.u32 %s8369_s3, 4  ;;  %s8003_s7 = smov [#allocation8]   ;;  %s58_s30 = int_to_ptr.hbm [resolvable:$true] %s57_s30 }
   0x8   :  { %s59_s8 = sshll.u32 %s8003_s7, 4  ;;  %s20_s11 = sshll.u32 %s8366_s0, 4  ;;  %s60_s8 = int_to_ptr.vmem [resolvable:$true] %s59_s8  ;;  %s21_s11 = int_to_ptr.hbm [resolvable:$true] %s20_s11 }
   0x9   :  { %s8004_s1 = smov 192   ;;  %s8005_s12 = smov 12  }
   0xa   :  { %65 = dma.hbm_to_vmem [thread:$0]  %s58_s30, 36864, %s60_s8, [#allocation9], %s8004_s1, %s8004_s1, %s8005_s12  }
   0xb   :  { %s47_s15 = sshll.u32 %s8368_s2, 4  ;;  %s8006_s16 = smov [#allocation2]   ;;  %s48_s15 = int_to_ptr.hbm [resolvable:$true] %s47_s15 }
   0xc   :  { %s22_s17 = sshll.u32 %s8006_s16, 4  ;;  %s8007_s3 = smov [#allocation7]   ;;  %s23_s17 = int_to_ptr.vmem [resolvable:$true] %s22_s17 }
   0xd   :  { %28 = dma.hbm_to_vmem [thread:$0]  %s21_s11, 384, %s23_s17, [#allocation3], %s8004_s1, %s8004_s1, %s8005_s12  }
   0xe   :  { %s49_s18 = sshll.u32 %s8007_s3, 4  ;;  %s71_s0 = sshll.u32 %s8370_s4, 4  ;;  %s50_s18 = int_to_ptr.vmem [resolvable:$true] %s49_s18  ;;  %s72_s0 = int_to_ptr.hbm [resolvable:$true] %s71_s0 }
   0xf   :  { %52 = dma.hbm_to_vmem [thread:$0]  %s48_s15, 192, %s50_s18, [#allocation6]  }
  0x10   :  { %s81_s23 = sshll.u32 %s8371_s5, 4  ;;  %s8008_s24 = smov [#allocation10]   ;;  %s82_s23 = int_to_ptr.hbm [resolvable:$true] %s81_s23 }
  0x11   :  { %s73_s2 = sshll.u32 %s8008_s24, 4  ;;  %s8009_s25 = smov [#allocation11]   ;;  %s74_s2 = int_to_ptr.vmem [resolvable:$true] %s73_s2 }
  0x12   :  { %76 = dma.hbm_to_vmem [thread:$0]  %s72_s0, 48, %s74_s2, [#allocation9]  }
  0x13   :  { %s83_s26 = sshll.u32 %s8009_s25, 4  ;;  %s8010_s27 = smov 384   ;;  %s84_s26 = int_to_ptr.vmem [resolvable:$true] %s83_s26 }
  0x14   :  { %s8011_s28 = smov 24  }
  0x15   :  { %89 = dma.hbm_to_vmem [thread:$0]  %s82_s23, 768, %s84_s26, [#allocation12], %s8010_s27, %s8010_s27, %s8011_s28  }
  0x16   :  { %7990 = dma.done.wait [#allocation3], 384  }
  0x17   :  { %7991 = vsyncadd [#allocation3], 4294966912 }
  0x18   :  { %7992 = dma.done.wait [#allocation6], 37056  }
  0x19   :  { %7993 = vsyncadd [#allocation6], 4294930240 }
  0x1a   :  { %7994 = dma.done.wait [#allocation9], 36912  }
  0x1b   :  { %7995 = vsyncadd [#allocation9], 4294930384 }
  0x1c   :  { %7996 = dma.done.wait [#allocation12], 768  }
  0x1d   :  { %7997 = vsyncadd [#allocation12], 4294966528  ;;  %v5264_v0 = vld [vmem:[#allocation5 + $0x2a0] sm:$0xf]  ;;  %v7323_v1 = vld [vmem:[#allocation5 + $0x2cc] sm:$0xf0] }
  0x1e   :  { %v5648_v2 = vld [vmem:[#allocation5 + $0x5a0] sm:$0xf]  ;;  %v5265_v3 = vor.u32 %v7323_v1, %v5264_v0  ;;  %v7419_v4 = vld [vmem:[#allocation5 + $0x5cc] sm:$0xf0]  ;;  %v7317_v9 = vld [vmem:[#allocation5 + $0x2a4] sm:$0xf] }
  0x1f   :  { %v6032_v5 = vld [vmem:[#allocation5 + $0x8a0] sm:$0xf]  ;;  %v7515_v6 = vld [vmem:[#allocation5 + $0x8cc] sm:$0xf0]  ;;  %v5649_v7 = vor.u32 %v7419_v4, %v5648_v2  ;;  %v5266_v10 = vld [vmem:[#allocation5 + $0x2d0] sm:$0xf0] }
  0x20   :  { %v6033_v8 = vor.u32 %v7515_v6, %v6032_v5  ;;  %v5216_v11 = vld [vmem:[#allocation5 + $0x240] sm:$0xf]  ;;  %1890 = vmatpush.bf16.msra.mxu0 %v5265_v3  ;;  %v5269_v12 = vor.u32 %v7317_v9, %v5266_v10  ;;  %v7311_v13 = vld [vmem:[#allocation5 + $0x26c] sm:$0xf0]  ;;  %v7305_v20 = vld [vmem:[#allocation5 + $0x244] sm:$0xf] }
  0x21   :  { %v5600_v14 = vld [vmem:[#allocation5 + $0x540] sm:$0xf]  ;;  %v7407_v15 = vld [vmem:[#allocation5 + $0x56c] sm:$0xf0]  ;;  %1904 = vmatpush.bf16.msra.mxu1 %v5649_v7  ;;  %v5217_v16 = vor.u32 %v7311_v13, %v5216_v11  ;;  %v5218_v22 = vld [vmem:[#allocation5 + $0x270] sm:$0xf0] }
  0x22   :  { %1918 = vmatpush.bf16.msra.mxu2 %v6033_v8  ;;  %v5601_v17 = vor.u32 %v7407_v15, %v5600_v14  ;;  %v5984_v18 = vld [vmem:[#allocation5 + $0x840] sm:$0xf]  ;;  %v7503_v19 = vld [vmem:[#allocation5 + $0x86c] sm:$0xf0]  ;;  %1932 = vmatpush.bf16.msra.mxu3 %v5269_v12  ;;  %v5221_v25 = vor.u32 %v7305_v20, %v5218_v22  ;;  %v7293_v31 = vld [vmem:[#allocation5 + $0x1e4] sm:$0xf] }
  0x23   :  { %v5985_v21 = vor.u32 %v7503_v19, %v5984_v18  ;;  %v5168_v23 = vld [vmem:[#allocation5 + $0x1e0] sm:$0xf]  ;;  %v7299_v24 = vld [vmem:[#allocation5 + $0x20c] sm:$0xf0]  ;;  %v5170_v32 = vld [vmem:[#allocation5 + $0x210] sm:$0xf0] }
  0x24   :  { %v5552_v26 = vld [vmem:[#allocation5 + $0x4e0] sm:$0xf]  ;;  %v7395_v27 = vld [vmem:[#allocation5 + $0x50c] sm:$0xf0]  ;;  %1891 = vmatpush.bf16.msra.mxu0 %v5217_v16  ;;  %v5169_v29 = vor.u32 %v7299_v24, %v5168_v23  ;;  %v5173_v38 = vor.u32 %v7293_v31, %v5170_v32  ;;  %v7281_v42 = vld [vmem:[#allocation5 + $0x184] sm:$0xf] }
  0x25   :  { %v5936_v28 = vld [vmem:[#allocation5 + $0x7e0] sm:$0xf]  ;;  %v7491_v30 = vld [vmem:[#allocation5 + $0x80c] sm:$0xf0]  ;;  %1905 = vmatpush.bf16.msra.mxu1 %v5601_v17  ;;  %v5553_v33 = vor.u32 %v7395_v27, %v5552_v26  ;;  %v5122_v43 = vld [vmem:[#allocation5 + $0x1b0] sm:$0xf0] }
  0x26   :  { %1919 = vmatpush.bf16.msra.mxu2 %v5985_v21  ;;  %v5937_v34 = vor.u32 %v7491_v30, %v5936_v28  ;;  %v5120_v35 = vld [vmem:[#allocation5 + $0x180] sm:$0xf]  ;;  %v7287_v36 = vld [vmem:[#allocation5 + $0x1ac] sm:$0xf0]  ;;  %1933 = vmatpush.bf16.msra.mxu3 %v5221_v25  ;;  %v5125_v50 = vor.u32 %v7281_v42, %v5122_v43  ;;  %v7269_v54 = vld [vmem:[#allocation5 + $0x124] sm:$0xf] }
  0x27   :  { %v5504_v37 = vld [vmem:[#allocation5 + $0x480] sm:$0xf]  ;;  %v7383_v39 = vld [vmem:[#allocation5 + $0x4ac] sm:$0xf0]  ;;  %v5121_v44 = vor.u32 %v7287_v36, %v5120_v35  ;;  %v5074_v55 = vld [vmem:[#allocation5 + $0x150] sm:$0xf0] }
  0x28   :  { %v5888_v40 = vld [vmem:[#allocation5 + $0x780] sm:$0xf]  ;;  %v7479_v41 = vld [vmem:[#allocation5 + $0x7ac] sm:$0xf0]  ;;  %1892 = vmatpush.bf16.msra.mxu0 %v5169_v29  ;;  %v5505_v45 = vor.u32 %v7383_v39, %v5504_v37  ;;  %v5077_v62 = vor.u32 %v7269_v54, %v5074_v55  ;;  %v7257_v2 = vld [vmem:[#allocation5 + $0xc4] sm:$0xf] }
  0x29   :  { %1906 = vmatpush.bf16.msra.mxu1 %v5553_v33  ;;  %v5889_v46 = vor.u32 %v7479_v41, %v5888_v40  ;;  %v5072_v47 = vld [vmem:[#allocation5 + $0x120] sm:$0xf]  ;;  %v7275_v48 = vld [vmem:[#allocation5 + $0x14c] sm:$0xf0]  ;;  %v5026_v3 = vld [vmem:[#allocation5 + $0xf0] sm:$0xf0] }
  0x2a   :  { %1920 = vmatpush.bf16.msra.mxu2 %v5937_v34  ;;  %v5456_v49 = vld [vmem:[#allocation5 + $0x420] sm:$0xf]  ;;  %1934 = vmatpush.bf16.msra.mxu3 %v5173_v38  ;;  %v7371_v51 = vld [vmem:[#allocation5 + $0x44c] sm:$0xf0]  ;;  %v5073_v56 = vor.u32 %v7275_v48, %v5072_v47  ;;  %v5029_v10 = vor.u32 %v7257_v2, %v5026_v3  ;;  %v7245_v14 = vld [vmem:[#allocation5 + $0x64] sm:$0xf] }
  0x2b   :  { %v5840_v52 = vld [vmem:[#allocation5 + $0x720] sm:$0xf]  ;;  %v7467_v53 = vld [vmem:[#allocation5 + $0x74c] sm:$0xf0]  ;;  %v5457_v57 = vor.u32 %v7371_v51, %v5456_v49  ;;  %v4978_v15 = vld [vmem:[#allocation5 + $0x90] sm:$0xf0] }
  0x2c   :  { %1893 = vmatpush.bf16.msra.mxu0 %v5121_v44  ;;  %v5841_v58 = vor.u32 %v7467_v53, %v5840_v52  ;;  %v5024_v59 = vld [vmem:[#allocation5 + $0xc0] sm:$0xf]  ;;  %v7263_v60 = vld [vmem:[#allocation5 + $0xec] sm:$0xf0]  ;;  %v4981_v24 = vor.u32 %v7245_v14, %v4978_v15  ;;  %v7233_v26 = vld [vmem:[#allocation5 + $0x4] sm:$0xf] }
  0x2d   :  { %1907 = vmatpush.bf16.msra.mxu1 %v5505_v45  ;;  %v5408_v61 = vld [vmem:[#allocation5 + $0x3c0] sm:$0xf]  ;;  %v7359_v63 = vld [vmem:[#allocation5 + $0x3ec] sm:$0xf0]  ;;  %v5025_v4 = vor.u32 %v7263_v60, %v5024_v59  ;;  %v4930_v27 = vld [vmem:[#allocation5 + $0x30] sm:$0xf0] }
  0x2e   :  { %1921 = vmatpush.bf16.msra.mxu2 %v5889_v46  ;;  %1935 = vmatpush.bf16.msra.mxu3 %v5125_v50  ;;  %v5792_v0 = vld [vmem:[#allocation5 + $0x6c0] sm:$0xf]  ;;  %v7455_v1 = vld [vmem:[#allocation5 + $0x6ec] sm:$0xf0]  ;;  %v5409_v5 = vor.u32 %v7359_v63, %v5408_v61  ;;  %v7413_v28 = vld [vmem:[#allocation5 + $0x5a4] sm:$0xf]  ;;  %v4933_v39 = vor.u32 %v7233_v26, %v4930_v27 }
  0x2f   :  { %v5793_v6 = vor.u32 %v7455_v1, %v5792_v0  ;;  %v4976_v7 = vld [vmem:[#allocation5 + $0x60] sm:$0xf]  ;;  %v7251_v8 = vld [vmem:[#allocation5 + $0x8c] sm:$0xf0]  ;;  %v5650_v29 = vld [vmem:[#allocation5 + $0x5d0] sm:$0xf0] }
  0x30   :  { %1894 = vmatpush.bf16.msra.mxu0 %v5073_v56  ;;  %v5360_v9 = vld [vmem:[#allocation5 + $0x360] sm:$0xf]  ;;  %v7347_v11 = vld [vmem:[#allocation5 + $0x38c] sm:$0xf0]  ;;  %v4977_v16 = vor.u32 %v7251_v8, %v4976_v7  ;;  %v7509_v30 = vld [vmem:[#allocation5 + $0x8a4] sm:$0xf]  ;;  %v5653_v40 = vor.u32 %v7413_v28, %v5650_v29 }
  0x31   :  { %1908 = vmatpush.bf16.msra.mxu1 %v5457_v57  ;;  %v5744_v12 = vld [vmem:[#allocation5 + $0x660] sm:$0xf]  ;;  %v7443_v13 = vld [vmem:[#allocation5 + $0x68c] sm:$0xf0]  ;;  %v5361_v19 = vor.u32 %v7347_v11, %v5360_v9  ;;  %v6034_v32 = vld [vmem:[#allocation5 + $0x8d0] sm:$0xf0] }
  0x32   :  { %1922 = vmatpush.bf16.msra.mxu2 %v5841_v58  ;;  %1936 = vmatpush.bf16.msra.mxu3 %v5077_v62  ;;  %v4928_v17 = vld [vmem:[#allocation5] sm:$0xf]  ;;  %v7239_v18 = vld [vmem:[#allocation5 + $0x2c] sm:$0xf0]  ;;  %v5745_v20 = vor.u32 %v7443_v13, %v5744_v12  ;;  %v5272_v33 = vld [vmem:[#allocation5 + $0x2a8] sm:$0xf]  ;;  %v6037_v42 = vor.u32 %v7509_v30, %v6034_v32 }
  0x33   :  { %v5312_v21 = vld [vmem:[#allocation5 + $0x300] sm:$0xf]  ;;  %v7335_v22 = vld [vmem:[#allocation5 + $0x32c] sm:$0xf0]  ;;  %v4929_v31 = vor.u32 %v7239_v18, %v4928_v17  ;;  %v7324_v34 = vld [vmem:[#allocation5 + $0x2d4] sm:$0xf0] }
  0x34   :  { %1895 = vmatpush.bf16.msra.mxu0 %v5025_v4  ;;  %v5696_v23 = vld [vmem:[#allocation5 + $0x600] sm:$0xf]  ;;  %v7431_v25 = vld [vmem:[#allocation5 + $0x62c] sm:$0xf0]  ;;  %v5313_v35 = vor.u32 %v7335_v22, %v5312_v21  ;;  %v5656_v37 = vld [vmem:[#allocation5 + $0x5a8] sm:$0xf]  ;;  %v5273_v43 = vor.u32 %v7324_v34, %v5272_v33 }
  0x35   :  { %1909 = vmatpush.bf16.msra.mxu1 %v5409_v5  ;;  %v5697_v36 = vor.u32 %v7431_v25, %v5696_v23  ;;  %v7420_v38 = vld [vmem:[#allocation5 + $0x5d4] sm:$0xf0]  ;;  %v7401_v41 = vld [vmem:[#allocation5 + $0x544] sm:$0xf]  ;;  %v5602_v44 = vld [vmem:[#allocation5 + $0x570] sm:$0xf0] }
  0x36   :  { %1923 = vmatpush.bf16.msra.mxu2 %v5793_v6  ;;  %1937 = vmatpush.bf16.msra.mxu3 %v5029_v10  ;;  %v7497_v45 = vld [vmem:[#allocation5 + $0x844] sm:$0xf]  ;;  %v5986_v46 = vld [vmem:[#allocation5 + $0x870] sm:$0xf0]  ;;  %v5657_v47 = vor.u32 %v7420_v38, %v5656_v37  ;;  %v5224_v48 = vld [vmem:[#allocation5 + $0x248] sm:$0xf]  ;;  %v5605_v54 = vor.u32 %v7401_v41, %v5602_v44 }
  0x37   :  { %v7312_v49 = vld [vmem:[#allocation5 + $0x274] sm:$0xf0]  ;;  %v5608_v50 = vld [vmem:[#allocation5 + $0x548] sm:$0xf]  ;;  %v7231_v53 = vld [vmem:[#allocation2 + $0x8] sm:$0xf0]  ;;  %v5989_v58 = vor.u32 %v7497_v45, %v5986_v46 }
  0x38   :  { %1896 = vmatpush.bf16.msra.mxu0 %v4977_v16  ;;  %v7408_v51 = vld [vmem:[#allocation5 + $0x574] sm:$0xf0]  ;;  %v4916_v52 = vld [vmem:[#allocation2] sm:$0xf]  ;;  %v7389_v55 = vld [vmem:[#allocation5 + $0x4e4] sm:$0xf]  ;;  %v5225_v59 = vor.u32 %v7312_v49, %v5224_v48 }
  0x39   :  { %1910 = vmatpush.bf16.msra.mxu1 %v5361_v19  ;;  %v5554_v56 = vld [vmem:[#allocation5 + $0x510] sm:$0xf0]  ;;  %v8069_v57 = vor.u32 %v7231_v53, %v4916_v52  ;;  %v7485_v60 = vld [vmem:[#allocation5 + $0x7e4] sm:$0xf]  ;;  %v5176_v62 = vld [vmem:[#allocation5 + $0x1e8] sm:$0xf]  ;;  %v5609_v63 = vor.u32 %v7408_v51, %v5608_v50 }
  0x3a   :  { %1924 = vmatpush.bf16.msra.mxu2 %v5745_v20  ;;  %1938 = vmatpush.bf16.msra.mxu3 %v4981_v24  ;;  %v5938_v61 = vld [vmem:[#allocation5 + $0x810] sm:$0xf0]  ;;  %v7300_v0 = vld [vmem:[#allocation5 + $0x214] sm:$0xf0]  ;;  %v7230_v1 = vld [vmem:[#allocation2 + $0x4] sm:$0xf]  ;;  %v5557_v6 = vor.u32 %v7389_v55, %v5554_v56 }
  0x3b   :  { %v4918_v2 = vld [vmem:[#allocation2 + $0xc] sm:$0xf0]  ;;  %v5560_v3 = vld [vmem:[#allocation5 + $0x4e8] sm:$0xf]  ;;  %v7377_v7 = vld [vmem:[#allocation5 + $0x484] sm:$0xf]  ;;  %v5941_v9 = vor.u32 %v7485_v60, %v5938_v61  ;;  %v5177_v10 = vor.u32 %v7300_v0, %v5176_v62 }
  0x3c   :  { %1897 = vmatpush.bf16.msra.mxu0 %v4929_v31  ;;  %v7396_v4 = vld [vmem:[#allocation5 + $0x514] sm:$0xf0]  ;;  %v8072_v5 = vor.u32 %v7230_v1, %v4918_v2  ;;  %v5506_v8 = vld [vmem:[#allocation5 + $0x4b0] sm:$0xf0]  ;;  %v7473_v11 = vld [vmem:[#allocation5 + $0x784] sm:$0xf] }
  0x3d   :  { %1911 = vmatpush.bf16.msra.mxu1 %v5313_v35  ;;  %v5890_v12 = vld [vmem:[#allocation5 + $0x7b0] sm:$0xf0]  ;;  %v4924_v13 = vld [vmem:[#allocation2 + $0x8] sm:$0xf]  ;;  %v5561_v14 = vor.u32 %v7396_v4, %v5560_v3  ;;  %v5128_v15 = vld [vmem:[#allocation5 + $0x188] sm:$0xf]  ;;  %v5509_v21 = vor.u32 %v7377_v7, %v5506_v8 }
  0x3e   :  { %1925 = vmatpush.bf16.msra.mxu2 %v5697_v36  ;;  %1939 = vmatpush.bf16.msra.mxu3 %v4933_v39  ;;  %v7288_v16 = vld [vmem:[#allocation5 + $0x1b4] sm:$0xf0]  ;;  %v7232_v17 = vld [vmem:[#allocation2 + $0x10] sm:$0xf0]  ;;  %v5512_v18 = vld [vmem:[#allocation5 + $0x488] sm:$0xf]  ;;  %v5893_v22 = vor.u32 %v7473_v11, %v5890_v12 }
  0x3f   :  { %1898 = vmatmul.bf16.vlgmr.msra.gmra.mxu0 %v8069_v57  ;;  %v7384_v19 = vld [vmem:[#allocation5 + $0x4b4] sm:$0xf0]  ;;  %v8076_v20 = vor.u32 %v7232_v17, %v4924_v13  ;;  %v5129_v23 = vor.u32 %v7288_v16, %v5128_v15  ;;  %v7365_v24 = vld [vmem:[#allocation5 + $0x424] sm:$0xf]  ;;  %v5458_v25 = vld [vmem:[#allocation5 + $0x450] sm:$0xf0] }
  0x40   :  { %1946 = vmatpush.bf16.msrb.mxu0 %v5653_v40  ;;  %1912 = vmatmul.bf16.vlgmr.msra.gmra.mxu1 %v8072_v5  ;;  %v7461_v26 = vld [vmem:[#allocation5 + $0x724] sm:$0xf]  ;;  %v5513_v27 = vor.u32 %v7384_v19, %v5512_v18  ;;  %v5842_v28 = vld [vmem:[#allocation5 + $0x750] sm:$0xf0]  ;;  %v5080_v29 = vld [vmem:[#allocation5 + $0x128] sm:$0xf]  ;;  %v5461_v33 = vor.u32 %v7365_v24, %v5458_v25 }
  0x41   :  { %1960 = vmatpush.bf16.msrb.mxu1 %v6037_v42  ;;  %1940 = vmatmul.bf16.vlgmr.msra.gmra.mxu3 %v8069_v57  ;;  %v7276_v30 = vld [vmem:[#allocation5 + $0x154] sm:$0xf0]  ;;  %v5464_v31 = vld [vmem:[#allocation5 + $0x428] sm:$0xf]  ;;  %v5845_v34 = vor.u32 %v7461_v26, %v5842_v28  ;;  %v7353_v36 = vld [vmem:[#allocation5 + $0x3c4] sm:$0xf] }
  0x42   :  { %1974 = vmatpush.bf16.msrb.mxu2 %v5273_v43  ;;  %1988 = vmatpush.bf16.msrb.mxu3 %v5657_v47  ;;  %v7372_v32 = vld [vmem:[#allocation5 + $0x454] sm:$0xf0]  ;;  %v5081_v35 = vor.u32 %v7276_v30, %v5080_v29  ;;  %v5410_v37 = vld [vmem:[#allocation5 + $0x3f0] sm:$0xf0]  ;;  %v7449_v38 = vld [vmem:[#allocation5 + $0x6c4] sm:$0xf] }
  0x43   :  { %1926 = vmatmul.bf16.vlgmr.msra.gmra.mxu2 %v8076_v20  ;;  %v5465_v39 = vor.u32 %v7372_v32, %v5464_v31  ;;  %v5794_v40 = vld [vmem:[#allocation5 + $0x6f0] sm:$0xf0]  ;;  %v5032_v41 = vld [vmem:[#allocation5 + $0xc8] sm:$0xf]  ;;  %v7264_v42 = vld [vmem:[#allocation5 + $0xf4] sm:$0xf0]  ;;  %v5413_v45 = vor.u32 %v7353_v36, %v5410_v37 }
  0x44   :  { %1947 = vmatpush.bf16.msrb.mxu0 %v5605_v54  ;;  %v5416_v43 = vld [vmem:[#allocation5 + $0x3c8] sm:$0xf]  ;;  %v7360_v44 = vld [vmem:[#allocation5 + $0x3f4] sm:$0xf0]  ;;  %v5797_v46 = vor.u32 %v7449_v38, %v5794_v40  ;;  %v5033_v47 = vor.u32 %v7264_v42, %v5032_v41  ;;  %v7341_v48 = vld [vmem:[#allocation5 + $0x364] sm:$0xf] }
  0x45   :  { %1961 = vmatpush.bf16.msrb.mxu1 %v5989_v58  ;;  %v5362_v49 = vld [vmem:[#allocation5 + $0x390] sm:$0xf0]  ;;  %v7437_v50 = vld [vmem:[#allocation5 + $0x664] sm:$0xf]  ;;  %v5417_v51 = vor.u32 %v7360_v44, %v5416_v43  ;;  %v4984_v53 = vld [vmem:[#allocation5 + $0x68] sm:$0xf] }
  0x46   :  { %1975 = vmatpush.bf16.msrb.mxu2 %v5225_v59  ;;  %1989 = vmatpush.bf16.msrb.mxu3 %v5609_v63  ;;  %v5746_v52 = vld [vmem:[#allocation5 + $0x690] sm:$0xf0]  ;;  %v7252_v54 = vld [vmem:[#allocation5 + $0x94] sm:$0xf0]  ;;  %v5368_v55 = vld [vmem:[#allocation5 + $0x368] sm:$0xf]  ;;  %v5365_v58 = vor.u32 %v7341_v48, %v5362_v49 }
  0x47   :  { %v7348_v56 = vld [vmem:[#allocation5 + $0x394] sm:$0xf0]  ;;  %v7329_v59 = vld [vmem:[#allocation5 + $0x304] sm:$0xf]  ;;  %v5314_v60 = vld [vmem:[#allocation5 + $0x330] sm:$0xf0]  ;;  %v5749_v61 = vor.u32 %v7437_v50, %v5746_v52  ;;  %v4985_v62 = vor.u32 %v7252_v54, %v4984_v53 }
  0x48   :  { %1948 = vmatpush.bf16.msrb.mxu0 %v5557_v6  ;;  %v7425_v63 = vld [vmem:[#allocation5 + $0x604] sm:$0xf]  ;;  %v5698_v0 = vld [vmem:[#allocation5 + $0x630] sm:$0xf0]  ;;  %v4936_v1 = vld [vmem:[#allocation5 + $0x8] sm:$0xf]  ;;  %v5369_v2 = vor.u32 %v7348_v56, %v5368_v55 }
  0x49   :  { %1962 = vmatpush.bf16.msrb.mxu1 %v5941_v9  ;;  %v7240_v3 = vld [vmem:[#allocation5 + $0x34] sm:$0xf0]  ;;  %v5320_v4 = vld [vmem:[#allocation5 + $0x308] sm:$0xf]  ;;  %v7318_v9 = vld [vmem:[#allocation5 + $0x2ac] sm:$0xf] }
  0x4a   :  { %1976 = vmatpush.bf16.msrb.mxu2 %v5177_v10  ;;  %1990 = vmatpush.bf16.msrb.mxu3 %v5561_v14  ;;  %v7336_v6 = vld [vmem:[#allocation5 + $0x334] sm:$0xf0]  ;;  %v6040_v7 = vld [vmem:[#allocation5 + $0x8a8] sm:$0xf]  ;;  %v5317_v10 = vor.u32 %v7329_v59, %v5314_v60  ;;  %v5274_v11 = vld [vmem:[#allocation5 + $0x2d8] sm:$0xf0]  ;;  %v5701_v14 = vor.u32 %v7425_v63, %v5698_v0  ;;  %v4937_v15 = vor.u32 %v7240_v3, %v4936_v1 }
  0x4b   :  { %v7516_v8 = vld [vmem:[#allocation5 + $0x8d4] sm:$0xf0]  ;;  %v7414_v12 = vld [vmem:[#allocation5 + $0x5ac] sm:$0xf]  ;;  %v5658_v13 = vld [vmem:[#allocation5 + $0x5d8] sm:$0xf0]  ;;  %v5321_v18 = vor.u32 %v7336_v6, %v5320_v4 }
  0x4c   :  { %1949 = vmatpush.bf16.msrb.mxu0 %v5509_v21  ;;  %v7510_v16 = vld [vmem:[#allocation5 + $0x8ac] sm:$0xf]  ;;  %v6042_v17 = vld [vmem:[#allocation5 + $0x8d8] sm:$0xf0]  ;;  %v6041_v19 = vor.u32 %v7516_v8, %v6040_v7  ;;  %v5277_v21 = vor.u32 %v7318_v9, %v5274_v11  ;;  %v7504_v24 = vld [vmem:[#allocation5 + $0x874] sm:$0xf0] }
  0x4d   :  { %1963 = vmatpush.bf16.msrb.mxu1 %v5893_v22  ;;  %v5661_v22 = vor.u32 %v7414_v12, %v5658_v13  ;;  %v7306_v25 = vld [vmem:[#allocation5 + $0x24c] sm:$0xf]  ;;  %v6045_v26 = vor.u32 %v7510_v16, %v6042_v17  ;;  %v5610_v29 = vld [vmem:[#allocation5 + $0x578] sm:$0xf0]  ;;  %v7492_v36 = vld [vmem:[#allocation5 + $0x814] sm:$0xf0] }
  0x4e   :  { %1977 = vmatpush.bf16.msrb.mxu2 %v5129_v23  ;;  %1991 = vmatpush.bf16.msrb.mxu3 %v5513_v27  ;;  %v5992_v23 = vld [vmem:[#allocation5 + $0x848] sm:$0xf]  ;;  %v5226_v27 = vld [vmem:[#allocation5 + $0x278] sm:$0xf0]  ;;  %v7402_v28 = vld [vmem:[#allocation5 + $0x54c] sm:$0xf] }
  0x4f   :  { %v7498_v30 = vld [vmem:[#allocation5 + $0x84c] sm:$0xf]  ;;  %v5994_v31 = vld [vmem:[#allocation5 + $0x878] sm:$0xf0]  ;;  %v5993_v32 = vor.u32 %v7504_v24, %v5992_v23  ;;  %v7480_v48 = vld [vmem:[#allocation5 + $0x7b4] sm:$0xf0] }
  0x50   :  { %1950 = vmatpush.bf16.msrb.mxu0 %v5461_v33  ;;  %v5229_v33 = vor.u32 %v7306_v25, %v5226_v27  ;;  %v7294_v37 = vld [vmem:[#allocation5 + $0x1ec] sm:$0xf]  ;;  %v5997_v38 = vor.u32 %v7498_v30, %v5994_v31  ;;  %v5562_v41 = vld [vmem:[#allocation5 + $0x518] sm:$0xf0]  ;;  %v5848_v60 = vld [vmem:[#allocation5 + $0x728] sm:$0xf] }
  0x51   :  { %1964 = vmatpush.bf16.msrb.mxu1 %v5845_v34  ;;  %v5613_v34 = vor.u32 %v7402_v28, %v5610_v29  ;;  %v7390_v40 = vld [vmem:[#allocation5 + $0x4ec] sm:$0xf]  ;;  %v5946_v43 = vld [vmem:[#allocation5 + $0x818] sm:$0xf0]  ;;  %v5800_v9 = vld [vmem:[#allocation5 + $0x6c8] sm:$0xf] }
  0x52   :  { %1978 = vmatpush.bf16.msrb.mxu2 %v5081_v35  ;;  %1992 = vmatpush.bf16.msrb.mxu3 %v5465_v39  ;;  %v5944_v35 = vld [vmem:[#allocation5 + $0x7e8] sm:$0xf]  ;;  %v5178_v39 = vld [vmem:[#allocation5 + $0x218] sm:$0xf0]  ;;  %v7486_v42 = vld [vmem:[#allocation5 + $0x7ec] sm:$0xf] }
  0x53   :  { %v5945_v44 = vor.u32 %v7492_v36, %v5944_v35  ;;  %v7282_v49 = vld [vmem:[#allocation5 + $0x18c] sm:$0xf]  ;;  %v5949_v50 = vor.u32 %v7486_v42, %v5946_v43  ;;  %v5514_v53 = vld [vmem:[#allocation5 + $0x4b8] sm:$0xf0]  ;;  %v7444_v23 = vld [vmem:[#allocation5 + $0x694] sm:$0xf0] }
  0x54   :  { %1951 = vmatpush.bf16.msrb.mxu0 %v5413_v45  ;;  %v5181_v45 = vor.u32 %v7294_v37, %v5178_v39  ;;  %v7378_v52 = vld [vmem:[#allocation5 + $0x48c] sm:$0xf]  ;;  %v5898_v55 = vld [vmem:[#allocation5 + $0x7b8] sm:$0xf0]  ;;  %v5280_v43 = vld [vmem:[#allocation5 + $0x2b0] sm:$0xf] }
  0x55   :  { %1965 = vmatpush.bf16.msrb.mxu1 %v5797_v46  ;;  %v5565_v46 = vor.u32 %v7390_v40, %v5562_v41  ;;  %v7474_v54 = vld [vmem:[#allocation5 + $0x78c] sm:$0xf]  ;;  %v5517_v59 = vor.u32 %v7378_v52, %v5514_v53  ;;  %v5082_v0 = vld [vmem:[#allocation5 + $0x158] sm:$0xf0]  ;;  %v7319_v52 = vld [vmem:[#allocation5 + $0x2b4] sm:$0xf] }
  0x56   :  { %1979 = vmatpush.bf16.msrb.mxu2 %v5033_v47  ;;  %1993 = vmatpush.bf16.msrb.mxu3 %v5417_v51  ;;  %v5896_v47 = vld [vmem:[#allocation5 + $0x788] sm:$0xf]  ;;  %v5130_v51 = vld [vmem:[#allocation5 + $0x1b8] sm:$0xf0]  ;;  %v5901_v63 = vor.u32 %v7474_v54, %v5898_v55  ;;  %v7366_v1 = vld [vmem:[#allocation5 + $0x42c] sm:$0xf] }
  0x57   :  { %v5897_v56 = vor.u32 %v7480_v48, %v5896_v47  ;;  %v7462_v3 = vld [vmem:[#allocation5 + $0x72c] sm:$0xf]  ;;  %v5850_v4 = vld [vmem:[#allocation5 + $0x758] sm:$0xf0]  ;;  %v7421_v47 = vld [vmem:[#allocation5 + $0x5dc] sm:$0xf0] }
  0x58   :  { %1952 = vmatpush.bf16.msrb.mxu0 %v5365_v58  ;;  %v5133_v58 = vor.u32 %v7282_v49, %v5130_v51  ;;  %v7258_v11 = vld [vmem:[#allocation5 + $0xcc] sm:$0xf]  ;;  %v5853_v12 = vor.u32 %v7462_v3, %v5850_v4  ;;  %v5034_v13 = vld [vmem:[#allocation5 + $0xf8] sm:$0xf0]  ;;  %v6048_v48 = vld [vmem:[#allocation5 + $0x8b0] sm:$0xf] }
  0x59   :  { %1966 = vmatpush.bf16.msrb.mxu1 %v5749_v61  ;;  %v7468_v61 = vld [vmem:[#allocation5 + $0x754] sm:$0xf0]  ;;  %v7450_v16 = vld [vmem:[#allocation5 + $0x6cc] sm:$0xf]  ;;  %v5802_v17 = vld [vmem:[#allocation5 + $0x6f8] sm:$0xf0] }
  0x5a   :  { %1980 = vmatpush.bf16.msrb.mxu2 %v4985_v62  ;;  %1994 = vmatpush.bf16.msrb.mxu3 %v5369_v2  ;;  %v7270_v62 = vld [vmem:[#allocation5 + $0x12c] sm:$0xf]  ;;  %v5466_v2 = vld [vmem:[#allocation5 + $0x458] sm:$0xf0]  ;;  %v5849_v6 = vor.u32 %v7468_v61, %v5848_v60  ;;  %v5805_v25 = vor.u32 %v7450_v16, %v5802_v17  ;;  %v7517_v49 = vld [vmem:[#allocation5 + $0x8dc] sm:$0xf0] }
  0x5b   :  { %v5085_v7 = vor.u32 %v7270_v62, %v5082_v0  ;;  %v5469_v8 = vor.u32 %v7366_v1, %v5466_v2  ;;  %v7246_v24 = vld [vmem:[#allocation5 + $0x6c] sm:$0xf]  ;;  %v5370_v28 = vld [vmem:[#allocation5 + $0x398] sm:$0xf0]  ;;  %v5282_v53 = vld [vmem:[#allocation5 + $0x2e0] sm:$0xf0] }
  0x5c   :  { %1953 = vmatpush.bf16.msrb.mxu0 %v5317_v10  ;;  %v7456_v10 = vld [vmem:[#allocation5 + $0x6f4] sm:$0xf0]  ;;  %v7342_v27 = vld [vmem:[#allocation5 + $0x36c] sm:$0xf]  ;;  %v5754_v30 = vld [vmem:[#allocation5 + $0x698] sm:$0xf0]  ;;  %v5285_v62 = vor.u32 %v7319_v52, %v5282_v53 }
  0x5d   :  { %1967 = vmatpush.bf16.msrb.mxu1 %v5701_v14  ;;  %v7354_v14 = vld [vmem:[#allocation5 + $0x3cc] sm:$0xf]  ;;  %v5373_v35 = vor.u32 %v7342_v27, %v5370_v28  ;;  %v4938_v37 = vld [vmem:[#allocation5 + $0x38] sm:$0xf0]  ;;  %v7313_v60 = vld [vmem:[#allocation5 + $0x27c] sm:$0xf0] }
  0x5e   :  { %1981 = vmatpush.bf16.msrb.mxu2 %v4937_v15  ;;  %1995 = vmatpush.bf16.msrb.mxu3 %v5321_v18  ;;  %v5418_v15 = vld [vmem:[#allocation5 + $0x3f8] sm:$0xf0]  ;;  %v5801_v18 = vor.u32 %v7456_v10, %v5800_v9  ;;  %v7438_v29 = vld [vmem:[#allocation5 + $0x66c] sm:$0xf]  ;;  %v5616_v61 = vld [vmem:[#allocation5 + $0x550] sm:$0xf] }
  0x5f   :  { %1954 = vmatmul.bf16.vlgmr.msrb.gmra.mxu0 %v8072_v5  ;;  %v7234_v36 = vld [vmem:[#allocation5 + $0xc] sm:$0xf]  ;;  %v5757_v39 = vor.u32 %v7438_v29, %v5754_v30  ;;  %v5322_v40 = vld [vmem:[#allocation5 + $0x338] sm:$0xf0]  ;;  %v6000_v0 = vld [vmem:[#allocation5 + $0x850] sm:$0xf] }
  0x60   :  { %2002 = vmatpush.bf16.msra.mxu0 %v6041_v19  ;;  %1968 = vmatmul.bf16.vlgmr.msrb.gmra.mxu1 %v8076_v20  ;;  %v5037_v19 = vor.u32 %v7258_v11, %v5034_v13  ;;  %v7426_v41 = vld [vmem:[#allocation5 + $0x60c] sm:$0xf]  ;;  %v5706_v42 = vld [vmem:[#allocation5 + $0x638] sm:$0xf0]  ;;  %v7505_v1 = vld [vmem:[#allocation5 + $0x87c] sm:$0xf0] }
  0x61   :  { %2016 = vmatpush.bf16.msra.mxu1 %v5277_v21  ;;  %1982 = vmatmul.bf16.vlgmr.msrb.gmra.mxu2 %v8069_v57  ;;  %v5421_v21 = vor.u32 %v7354_v14, %v5418_v15  ;;  %v5709_v54 = vor.u32 %v7426_v41, %v5706_v42  ;;  %v7307_v2 = vld [vmem:[#allocation5 + $0x254] sm:$0xf]  ;;  %v5234_v3 = vld [vmem:[#allocation5 + $0x280] sm:$0xf0]  ;;  %v7301_v9 = vld [vmem:[#allocation5 + $0x21c] sm:$0xf0] }
  0x62   :  { %2030 = vmatpush.bf16.msra.mxu2 %v5661_v22  ;;  %2044 = vmatpush.bf16.msra.mxu3 %v6045_v26  ;;  %v5752_v22 = vld [vmem:[#allocation5 + $0x668] sm:$0xf]  ;;  %v4986_v26 = vld [vmem:[#allocation5 + $0x98] sm:$0xf0]  ;;  %v5568_v10 = vld [vmem:[#allocation5 + $0x4f0] sm:$0xf]  ;;  %v5237_v11 = vor.u32 %v7307_v2, %v5234_v3 }
  0x63   :  { %1996 = vmatmul.bf16.vlgmr.msrb.gmra.mxu3 %v8072_v5  ;;  %v5753_v31 = vor.u32 %v7444_v23, %v5752_v22  ;;  %v5952_v13 = vld [vmem:[#allocation5 + $0x7f0] sm:$0xf]  ;;  %v7493_v14 = vld [vmem:[#allocation5 + $0x81c] sm:$0xf0]  ;;  %v7295_v15 = vld [vmem:[#allocation5 + $0x1f4] sm:$0xf] }
  0x64   :  { %2003 = vmatpush.bf16.msra.mxu0 %v5993_v32  ;;  %v5704_v32 = vld [vmem:[#allocation5 + $0x608] sm:$0xf]  ;;  %v5186_v16 = vld [vmem:[#allocation5 + $0x220] sm:$0xf0]  ;;  %v7289_v22 = vld [vmem:[#allocation5 + $0x1bc] sm:$0xf0] }
  0x65   :  { %2017 = vmatpush.bf16.msra.mxu1 %v5229_v33  ;;  %v7432_v33 = vld [vmem:[#allocation5 + $0x634] sm:$0xf0]  ;;  %v5520_v23 = vld [vmem:[#allocation5 + $0x490] sm:$0xf]  ;;  %v7481_v27 = vld [vmem:[#allocation5 + $0x7bc] sm:$0xf0] }
  0x66   :  { %2031 = vmatpush.bf16.msra.mxu2 %v5613_v34  ;;  %2045 = vmatpush.bf16.msra.mxu3 %v5997_v38  ;;  %v4989_v34 = vor.u32 %v7246_v24, %v4986_v26  ;;  %v7330_v38 = vld [vmem:[#allocation5 + $0x30c] sm:$0xf]  ;;  %v5189_v24 = vor.u32 %v7295_v15, %v5186_v16  ;;  %v5904_v26 = vld [vmem:[#allocation5 + $0x790] sm:$0xf]  ;;  %v7283_v28 = vld [vmem:[#allocation5 + $0x194] sm:$0xf] }
  0x67   :  { %v5325_v51 = vor.u32 %v7330_v38, %v5322_v40  ;;  %v5138_v29 = vld [vmem:[#allocation5 + $0x1c0] sm:$0xf0]  ;;  %v5856_v38 = vld [vmem:[#allocation5 + $0x730] sm:$0xf]  ;;  %v7271_v40 = vld [vmem:[#allocation5 + $0x134] sm:$0xf] }
  0x68   :  { %2004 = vmatpush.bf16.msra.mxu0 %v5945_v44  ;;  %v7325_v44 = vld [vmem:[#allocation5 + $0x2dc] sm:$0xf0]  ;;  %v5090_v41 = vld [vmem:[#allocation5 + $0x160] sm:$0xf0]  ;;  %v7259_v52 = vld [vmem:[#allocation5 + $0xd4] sm:$0xf] }
  0x69   :  { %2018 = vmatpush.bf16.msra.mxu1 %v5181_v45  ;;  %v5664_v45 = vld [vmem:[#allocation5 + $0x5b0] sm:$0xf]  ;;  %v5281_v55 = vor.u32 %v7325_v44, %v5280_v43  ;;  %v5042_v53 = vld [vmem:[#allocation5 + $0x100] sm:$0xf0]  ;;  %v7415_v16 = vld [vmem:[#allocation5 + $0x5b4] sm:$0xf] }
  0x6a   :  { %2032 = vmatpush.bf16.msra.mxu2 %v5565_v46  ;;  %2046 = vmatpush.bf16.msra.mxu3 %v5949_v50  ;;  %v5705_v46 = vor.u32 %v7432_v33, %v5704_v32  ;;  %v4941_v50 = vor.u32 %v7234_v36, %v4938_v37  ;;  %v5905_v32 = vor.u32 %v7481_v27, %v5904_v26  ;;  %v5088_v33 = vld [vmem:[#allocation5 + $0x130] sm:$0xf]  ;;  %v7373_v37 = vld [vmem:[#allocation5 + $0x45c] sm:$0xf0]  ;;  %v4994_v2 = vld [vmem:[#allocation5 + $0xa0] sm:$0xf0] }
  0x6b   :  { %v5141_v36 = vor.u32 %v7283_v28, %v5138_v29  ;;  %v4946_v15 = vld [vmem:[#allocation5 + $0x40] sm:$0xf0]  ;;  %v5672_v26 = vld [vmem:[#allocation5 + $0x5b8] sm:$0xf]  ;;  %v7422_v27 = vld [vmem:[#allocation5 + $0x5e4] sm:$0xf0] }
  0x6c   :  { %2005 = vmatpush.bf16.msra.mxu0 %v5897_v56  ;;  %v5665_v56 = vor.u32 %v7421_v47, %v5664_v45  ;;  %v5040_v45 = vld [vmem:[#allocation5 + $0xd0] sm:$0xf]  ;;  %s8012_s4 = smov [#allocation13]   ;;  %s4898_s7 = sshll.u32 %s8372_s6, 4  ;;  %s4899_s7 = int_to_ptr.hbm [resolvable:$true] %s4898_s7 }
  0x6d   :  { %2019 = vmatpush.bf16.msra.mxu1 %v5133_v58  ;;  %v6049_v58 = vor.u32 %v7517_v49, %v6048_v48  ;;  %v5424_v47 = vld [vmem:[#allocation5 + $0x3d0] sm:$0xf]  ;;  %v5093_v48 = vor.u32 %v7271_v40, %v5090_v41  ;;  %v7361_v49 = vld [vmem:[#allocation5 + $0x3fc] sm:$0xf0]  ;;  %v7410_v40 = vld [vmem:[#allocation5 + $0x584] sm:$0xf0] }
  0x6e   :  { %2033 = vmatpush.bf16.msra.mxu2 %v5517_v59  ;;  %2047 = vmatpush.bf16.msra.mxu3 %v5901_v63  ;;  %v5232_v59 = vld [vmem:[#allocation5 + $0x250] sm:$0xf]  ;;  %v7409_v63 = vld [vmem:[#allocation5 + $0x57c] sm:$0xf0]  ;;  %s4896_s5 = sshll.u32 %s8012_s4, 4  ;;  %s4897_s5 = int_to_ptr.vmem [resolvable:$true] %s4896_s5 }
  0x6f   :  { %v5233_v4 = vor.u32 %v7313_v60, %v5232_v59  ;;  %v7253_v59 = vld [vmem:[#allocation5 + $0x9c] sm:$0xf0]  ;;  %v5376_v60 = vld [vmem:[#allocation5 + $0x370] sm:$0xf] }
  0x70   :  { %2006 = vmatpush.bf16.msra.mxu0 %v5849_v6  ;;  %v5617_v6 = vor.u32 %v7409_v63, %v5616_v61  ;;  %v5045_v61 = vor.u32 %v7259_v52, %v5042_v53  ;;  %v5760_v63 = vld [vmem:[#allocation5 + $0x670] sm:$0xf]  ;;  %v7398_v52 = vld [vmem:[#allocation5 + $0x524] sm:$0xf0] }
  0x71   :  { %2020 = vmatpush.bf16.msra.mxu1 %v5085_v7  ;;  %v6001_v7 = vor.u32 %v7505_v1, %v6000_v0  ;;  %v7445_v0 = vld [vmem:[#allocation5 + $0x69c] sm:$0xf0]  ;;  %v7247_v1 = vld [vmem:[#allocation5 + $0x74] sm:$0xf] }
  0x72   :  { %2034 = vmatpush.bf16.msra.mxu2 %v5469_v8  ;;  %2048 = vmatpush.bf16.msra.mxu3 %v5853_v12  ;;  %v5184_v8 = vld [vmem:[#allocation5 + $0x1f0] sm:$0xf]  ;;  %v7397_v12 = vld [vmem:[#allocation5 + $0x51c] sm:$0xf0] }
  0x73   :  { %v5185_v17 = vor.u32 %v7301_v9, %v5184_v8  ;;  %v5761_v8 = vor.u32 %v7445_v0, %v5760_v63  ;;  %v5328_v9 = vld [vmem:[#allocation5 + $0x310] sm:$0xf]  ;;  %v7290_v63 = vld [vmem:[#allocation5 + $0x1c4] sm:$0xf0]  ;;  %v5528_v0 = vld [vmem:[#allocation5 + $0x498] sm:$0xf] }
  0x74   :  { %2007 = vmatpush.bf16.msra.mxu0 %v5801_v18  ;;  %v5569_v18 = vor.u32 %v7397_v12, %v5568_v10  ;;  %v7337_v10 = vld [vmem:[#allocation5 + $0x33c] sm:$0xf0]  ;;  %v4997_v12 = vor.u32 %v7247_v1, %v4994_v2  ;;  %v7386_v1 = vld [vmem:[#allocation5 + $0x4c4] sm:$0xf0] }
  0x75   :  { %2021 = vmatpush.bf16.msra.mxu1 %v5037_v19  ;;  %v5953_v19 = vor.u32 %v7493_v14, %v5952_v13  ;;  %v7433_v13 = vld [vmem:[#allocation5 + $0x63c] sm:$0xf0]  ;;  %v7235_v14 = vld [vmem:[#allocation5 + $0x14] sm:$0xf] }
  0x76   :  { %2035 = vmatpush.bf16.msra.mxu2 %v5421_v21  ;;  %2049 = vmatpush.bf16.msra.mxu3 %v5805_v25  ;;  %v5136_v21 = vld [vmem:[#allocation5 + $0x190] sm:$0xf]  ;;  %v7385_v25 = vld [vmem:[#allocation5 + $0x4bc] sm:$0xf0]  ;;  %v4949_v28 = vor.u32 %v7235_v14, %v4946_v15  ;;  %v7374_v14 = vld [vmem:[#allocation5 + $0x464] sm:$0xf0] }
  0x77   :  { %v5137_v30 = vor.u32 %v7289_v22, %v5136_v21  ;;  %v6050_v21 = vld [vmem:[#allocation5 + $0x8e0] sm:$0xf0]  ;;  %v5288_v22 = vld [vmem:[#allocation5 + $0x2b8] sm:$0xf] }
  0x78   :  { %2008 = vmatpush.bf16.msra.mxu0 %v5753_v31  ;;  %v5521_v31 = vor.u32 %v7385_v25, %v5520_v23  ;;  %v7326_v23 = vld [vmem:[#allocation5 + $0x2e4] sm:$0xf0] }
  0x79   :  { %2022 = vmatpush.bf16.msra.mxu1 %v4989_v34  ;;  %v7277_v34 = vld [vmem:[#allocation5 + $0x15c] sm:$0xf0] }
  0x7a   :  { %2036 = vmatpush.bf16.msra.mxu2 %v5373_v35  ;;  %2050 = vmatpush.bf16.msra.mxu3 %v5757_v39  ;;  %v5472_v35 = vld [vmem:[#allocation5 + $0x430] sm:$0xf]  ;;  %v7469_v39 = vld [vmem:[#allocation5 + $0x75c] sm:$0xf0]  ;;  %v5089_v42 = vor.u32 %v7277_v34, %v5088_v33  ;;  %v5618_v33 = vld [vmem:[#allocation5 + $0x580] sm:$0xf0] }
  0x7b   :  { %v5473_v43 = vor.u32 %v7373_v37, %v5472_v35  ;;  %v5857_v44 = vor.u32 %v7469_v39, %v5856_v38  ;;  %v7499_v34 = vld [vmem:[#allocation5 + $0x854] sm:$0xf]  ;;  %v5673_v35 = vor.u32 %v7422_v27, %v5672_v26  ;;  %v5240_v37 = vld [vmem:[#allocation5 + $0x258] sm:$0xf]  ;;  %v7314_v38 = vld [vmem:[#allocation5 + $0x284] sm:$0xf0] }
  0x7c   :  { %2009 = vmatpush.bf16.msra.mxu0 %v5705_v46  ;;  %v7265_v46 = vld [vmem:[#allocation5 + $0xfc] sm:$0xf0]  ;;  %v5624_v39 = vld [vmem:[#allocation5 + $0x558] sm:$0xf]  ;;  %v7362_v27 = vld [vmem:[#allocation5 + $0x404] sm:$0xf0] }
  0x7d   :  { %2023 = vmatpush.bf16.msra.mxu1 %v4941_v50  ;;  %v5808_v50 = vld [vmem:[#allocation5 + $0x6d0] sm:$0xf]  ;;  %v5432_v26 = vld [vmem:[#allocation5 + $0x3d8] sm:$0xf] }
  0x7e   :  { %2037 = vmatpush.bf16.msra.mxu2 %v5325_v51  ;;  %2051 = vmatpush.bf16.msra.mxu3 %v5709_v54  ;;  %v7457_v51 = vld [vmem:[#allocation5 + $0x6fc] sm:$0xf0]  ;;  %v5041_v54 = vor.u32 %v7265_v46, %v5040_v45  ;;  %v5570_v45 = vld [vmem:[#allocation5 + $0x520] sm:$0xf0]  ;;  %v7487_v46 = vld [vmem:[#allocation5 + $0x7f4] sm:$0xf] }
  0x7f   :  { %2010 = vmatmul.bf16.vlgmr.msra.gmra.mxu0 %v8076_v20 }
  0x80   :  { %2058 = vmatpush.bf16.msrb.mxu0 %v5281_v55  ;;  %2024 = vmatmul.bf16.vlgmr.msra.gmra.mxu1 %v8069_v57  ;;  %v5425_v55 = vor.u32 %v7361_v49, %v5424_v47  ;;  %v5625_v47 = vor.u32 %v7410_v40, %v5624_v39  ;;  %v5192_v49 = vld [vmem:[#allocation5 + $0x1f8] sm:$0xf]  ;;  %v7350_v39 = vld [vmem:[#allocation5 + $0x3a4] sm:$0xf0] }
  0x81   :  { %2072 = vmatpush.bf16.msrb.mxu1 %v5665_v56  ;;  %2038 = vmatmul.bf16.vlgmr.msra.gmra.mxu2 %v8072_v5  ;;  %v5809_v56 = vor.u32 %v7457_v51, %v5808_v50  ;;  %v7302_v50 = vld [vmem:[#allocation5 + $0x224] sm:$0xf0]  ;;  %v5576_v51 = vld [vmem:[#allocation5 + $0x4f8] sm:$0xf] }
  0x82   :  { %2086 = vmatpush.bf16.msrb.mxu2 %v6049_v58  ;;  %2100 = vmatpush.bf16.msrb.mxu3 %v5285_v62  ;;  %v4992_v58 = vld [vmem:[#allocation5 + $0x70] sm:$0xf]  ;;  %v7349_v62 = vld [vmem:[#allocation5 + $0x39c] sm:$0xf0] }
  0x83   :  { %2052 = vmatmul.bf16.vlgmr.msra.gmra.mxu3 %v8076_v20  ;;  %v4993_v3 = vor.u32 %v7253_v59, %v4992_v58  ;;  %v5522_v58 = vld [vmem:[#allocation5 + $0x4c0] sm:$0xf0]  ;;  %v7475_v59 = vld [vmem:[#allocation5 + $0x794] sm:$0xf] }
  0x84   :  { %2059 = vmatpush.bf16.msrb.mxu0 %v5233_v4  ;;  %v4944_v4 = vld [vmem:[#allocation5 + $0x10] sm:$0xf] }
  0x85   :  { %2073 = vmatpush.bf16.msrb.mxu1 %v5617_v6  ;;  %v7241_v6 = vld [vmem:[#allocation5 + $0x3c] sm:$0xf0] }
  0x86   :  { %2087 = vmatpush.bf16.msrb.mxu2 %v6001_v7  ;;  %2101 = vmatpush.bf16.msrb.mxu3 %v5237_v11  ;;  %v5377_v7 = vor.u32 %v7349_v62, %v5376_v60  ;;  %v5712_v11 = vld [vmem:[#allocation5 + $0x610] sm:$0xf]  ;;  %v5577_v60 = vor.u32 %v7398_v52, %v5576_v51  ;;  %v5144_v62 = vld [vmem:[#allocation5 + $0x198] sm:$0xf]  ;;  %v7338_v51 = vld [vmem:[#allocation5 + $0x344] sm:$0xf0] }
  0x87   :  { %v5713_v25 = vor.u32 %v7433_v13, %v5712_v11  ;;  %v5096_v11 = vld [vmem:[#allocation5 + $0x138] sm:$0xf] }
  0x88   :  { %2060 = vmatpush.bf16.msrb.mxu0 %v5185_v17  ;;  %v5666_v17 = vld [vmem:[#allocation5 + $0x5e0] sm:$0xf0]  ;;  %v5480_v13 = vld [vmem:[#allocation5 + $0x438] sm:$0xf] }
  0x89   :  { %2074 = vmatpush.bf16.msrb.mxu1 %v5569_v18  ;;  %v7511_v18 = vld [vmem:[#allocation5 + $0x8b4] sm:$0xf]  ;;  %v5669_v29 = vor.u32 %v7415_v16, %v5666_v17  ;;  %v6056_v52 = vld [vmem:[#allocation5 + $0x8b8] sm:$0xf] }
  0x8a   :  { %2088 = vmatpush.bf16.msrb.mxu2 %v5953_v19  ;;  %2102 = vmatpush.bf16.msrb.mxu3 %v5189_v24  ;;  %v4945_v19 = vor.u32 %v7241_v6, %v4944_v4  ;;  %v5329_v24 = vor.u32 %v7337_v10, %v5328_v9  ;;  %v5145_v4 = vor.u32 %v7290_v63, %v5144_v62  ;;  %v7367_v6 = vld [vmem:[#allocation5 + $0x434] sm:$0xf]  ;;  %v5858_v10 = vld [vmem:[#allocation5 + $0x760] sm:$0xf0]  ;;  %v7512_v62 = vld [vmem:[#allocation5 + $0x8bc] sm:$0xf] }
  0x8b   :  { %v5529_v9 = vor.u32 %v7386_v1, %v5528_v0  ;;  %v6058_v63 = vld [vmem:[#allocation5 + $0x8e8] sm:$0xf0] }
  0x8c   :  { %2061 = vmatpush.bf16.msrb.mxu0 %v5137_v30  ;;  %v6053_v30 = vor.u32 %v7511_v18, %v6050_v21  ;;  %v7355_v18 = vld [vmem:[#allocation5 + $0x3d4] sm:$0xf] }
  0x8d   :  { %2075 = vmatpush.bf16.msrb.mxu1 %v5521_v31  ;;  %v5289_v31 = vor.u32 %v7326_v23, %v5288_v22  ;;  %v7451_v21 = vld [vmem:[#allocation5 + $0x6d4] sm:$0xf]  ;;  %v5481_v22 = vor.u32 %v7374_v14, %v5480_v13  ;;  %v5810_v23 = vld [vmem:[#allocation5 + $0x700] sm:$0xf0]  ;;  %v6010_v13 = vld [vmem:[#allocation5 + $0x888] sm:$0xf0] }
  0x8e   :  { %2089 = vmatpush.bf16.msrb.mxu2 %v5905_v32  ;;  %2103 = vmatpush.bf16.msrb.mxu3 %v5141_v36  ;;  %v7403_v32 = vld [vmem:[#allocation5 + $0x554] sm:$0xf]  ;;  %v6002_v36 = vld [vmem:[#allocation5 + $0x880] sm:$0xf0] }
  0x8f   :  { %v5621_v41 = vor.u32 %v7403_v32, %v5618_v33  ;;  %v5378_v32 = vld [vmem:[#allocation5 + $0x3a0] sm:$0xf0]  ;;  %v7439_v33 = vld [vmem:[#allocation5 + $0x674] sm:$0xf] }
  0x90   :  { %2062 = vmatpush.bf16.msrb.mxu0 %v5089_v42  ;;  %v6005_v42 = vor.u32 %v7499_v34, %v6002_v36  ;;  %v5433_v34 = vor.u32 %v7362_v27, %v5432_v26  ;;  %v5000_v36 = vld [vmem:[#allocation5 + $0x78] sm:$0xf]  ;;  %v5962_v26 = vld [vmem:[#allocation5 + $0x828] sm:$0xf0] }
  0x91   :  { %2076 = vmatpush.bf16.msrb.mxu1 %v5473_v43  ;;  %v5241_v43 = vor.u32 %v7314_v38, %v5240_v37  ;;  %v7254_v37 = vld [vmem:[#allocation5 + $0xa4] sm:$0xf0]  ;;  %v5384_v38 = vld [vmem:[#allocation5 + $0x378] sm:$0xf] }
  0x92   :  { %2090 = vmatpush.bf16.msrb.mxu2 %v5857_v44  ;;  %2104 = vmatpush.bf16.msrb.mxu3 %v5093_v48  ;;  %v7391_v44 = vld [vmem:[#allocation5 + $0x4f4] sm:$0xf]  ;;  %v5954_v48 = vld [vmem:[#allocation5 + $0x820] sm:$0xf0] }
  0x93   :  { %v5573_v53 = vor.u32 %v7391_v44, %v5570_v45  ;;  %v5001_v44 = vor.u32 %v7254_v37, %v5000_v36  ;;  %v7427_v45 = vld [vmem:[#allocation5 + $0x614] sm:$0xf]  ;;  %v5530_v36 = vld [vmem:[#allocation5 + $0x4c8] sm:$0xf0]  ;;  %v7476_v37 = vld [vmem:[#allocation5 + $0x79c] sm:$0xf] }
  0x94   :  { %2063 = vmatpush.bf16.msrb.mxu0 %v5041_v54  ;;  %v5957_v54 = vor.u32 %v7487_v46, %v5954_v48  ;;  %v5714_v46 = vld [vmem:[#allocation5 + $0x640] sm:$0xf0]  ;;  %v5385_v48 = vor.u32 %v7350_v39, %v5384_v38  ;;  %v5914_v38 = vld [vmem:[#allocation5 + $0x7c8] sm:$0xf0] }
  0x95   :  { %2077 = vmatpush.bf16.msrb.mxu1 %v5425_v55  ;;  %v5193_v55 = vor.u32 %v7302_v50, %v5192_v49  ;;  %v7242_v49 = vld [vmem:[#allocation5 + $0x44] sm:$0xf0]  ;;  %v5336_v50 = vld [vmem:[#allocation5 + $0x318] sm:$0xf] }
  0x96   :  { %2091 = vmatpush.bf16.msrb.mxu2 %v5809_v56  ;;  %2105 = vmatpush.bf16.msrb.mxu3 %v5045_v61  ;;  %v7379_v56 = vld [vmem:[#allocation5 + $0x494] sm:$0xf]  ;;  %v5906_v61 = vld [vmem:[#allocation5 + $0x7c0] sm:$0xf0]  ;;  %v5337_v0 = vor.u32 %v7338_v51, %v5336_v50  ;;  %v5866_v50 = vld [vmem:[#allocation5 + $0x768] sm:$0xf0] }
  0x97   :  { %v5525_v2 = vor.u32 %v7379_v56, %v5522_v58  ;;  %v5290_v56 = vld [vmem:[#allocation5 + $0x2e8] sm:$0xf0]  ;;  %v7416_v58 = vld [vmem:[#allocation5 + $0x5bc] sm:$0xf] }
  0x98   :  { %2064 = vmatpush.bf16.msrb.mxu0 %v4993_v3  ;;  %v5909_v3 = vor.u32 %v7475_v59, %v5906_v61  ;;  %v5674_v59 = vld [vmem:[#allocation5 + $0x5e8] sm:$0xf0] }
  0x99   :  { %2078 = vmatpush.bf16.msrb.mxu1 %v5377_v7  ;;  %v5474_v7 = vld [vmem:[#allocation5 + $0x460] sm:$0xf0] }
  0x9a   :  { %2092 = vmatpush.bf16.msrb.mxu2 %v5761_v8  ;;  %2106 = vmatpush.bf16.msrb.mxu3 %v4997_v12  ;;  %v7463_v8 = vld [vmem:[#allocation5 + $0x734] sm:$0xf]  ;;  %v7278_v12 = vld [vmem:[#allocation5 + $0x164] sm:$0xf0]  ;;  %v5477_v15 = vor.u32 %v7367_v6, %v5474_v7  ;;  %v7308_v7 = vld [vmem:[#allocation5 + $0x25c] sm:$0xf] }
  0x9b   :  { %v5861_v16 = vor.u32 %v7463_v8, %v5858_v10  ;;  %v5097_v17 = vor.u32 %v7278_v12, %v5096_v11  ;;  %v7506_v6 = vld [vmem:[#allocation5 + $0x884] sm:$0xf0]  ;;  %v6061_v8 = vor.u32 %v7512_v62, %v6058_v63  ;;  %v7404_v10 = vld [vmem:[#allocation5 + $0x55c] sm:$0xf]  ;;  %v5626_v11 = vld [vmem:[#allocation5 + $0x588] sm:$0xf0] }
  0x9c   :  { %2065 = vmatpush.bf16.msrb.mxu0 %v4945_v19  ;;  %v5426_v19 = vld [vmem:[#allocation5 + $0x400] sm:$0xf0]  ;;  %v7500_v12 = vld [vmem:[#allocation5 + $0x85c] sm:$0xf]  ;;  %v5818_v63 = vld [vmem:[#allocation5 + $0x708] sm:$0xf0] }
  0x9d   :  { %2079 = vmatpush.bf16.msrb.mxu1 %v5329_v24  ;;  %v5048_v24 = vld [vmem:[#allocation5 + $0xd8] sm:$0xf]  ;;  %v7452_v62 = vld [vmem:[#allocation5 + $0x6dc] sm:$0xf] }
  0x9e   :  { %2093 = vmatpush.bf16.msrb.mxu2 %v5713_v25  ;;  %2107 = vmatpush.bf16.msrb.mxu3 %v4949_v28  ;;  %v7266_v25 = vld [vmem:[#allocation5 + $0x104] sm:$0xf0]  ;;  %v5429_v28 = vor.u32 %v7355_v18, %v5426_v19  ;;  %v7296_v19 = vld [vmem:[#allocation5 + $0x1fc] sm:$0xf] }
  0x9f   :  { %2066 = vmatmul.bf16.vlgmr.msrb.gmra.mxu0 %v8069_v57  ;;  %v7494_v18 = vld [vmem:[#allocation5 + $0x824] sm:$0xf0] }
  0xa0   :  { %2114 = vmatpush.bf16.msra.mxu0 %v5669_v29  ;;  %2080 = vmatmul.bf16.vlgmr.msrb.gmra.mxu1 %v8072_v5  ;;  %v5813_v29 = vor.u32 %v7451_v21, %v5810_v23  ;;  %v6013_v21 = vor.u32 %v7500_v12, %v6010_v13  ;;  %v7392_v23 = vld [vmem:[#allocation5 + $0x4fc] sm:$0xf]  ;;  %v5770_v12 = vld [vmem:[#allocation5 + $0x6a8] sm:$0xf0] }
  0xa1   :  { %2128 = vmatpush.bf16.msra.mxu1 %v6053_v30  ;;  %2094 = vmatmul.bf16.vlgmr.msrb.gmra.mxu2 %v8076_v20  ;;  %v5049_v30 = vor.u32 %v7266_v25, %v5048_v24  ;;  %v5578_v24 = vld [vmem:[#allocation5 + $0x528] sm:$0xf0]  ;;  %v7488_v25 = vld [vmem:[#allocation5 + $0x7fc] sm:$0xf] }
  0xa2   :  { %2142 = vmatpush.bf16.msra.mxu2 %v5289_v31  ;;  %2156 = vmatpush.bf16.msra.mxu3 %v5673_v35  ;;  %v7343_v31 = vld [vmem:[#allocation5 + $0x374] sm:$0xf]  ;;  %v5762_v35 = vld [vmem:[#allocation5 + $0x6a0] sm:$0xf0] }
  0xa3   :  { %2108 = vmatmul.bf16.vlgmr.msrb.gmra.mxu3 %v8069_v57  ;;  %v5381_v40 = vor.u32 %v7343_v31, %v5378_v32  ;;  %v7482_v31 = vld [vmem:[#allocation5 + $0x7c4] sm:$0xf0]  ;;  %v7284_v32 = vld [vmem:[#allocation5 + $0x19c] sm:$0xf] }
  0xa4   :  { %2115 = vmatpush.bf16.msra.mxu0 %v5621_v41  ;;  %v7331_v41 = vld [vmem:[#allocation5 + $0x314] sm:$0xf] }
  0xa5   :  { %2129 = vmatpush.bf16.msra.mxu1 %v6005_v42  ;;  %v5330_v42 = vld [vmem:[#allocation5 + $0x340] sm:$0xf0] }
  0xa6   :  { %2143 = vmatpush.bf16.msra.mxu2 %v5241_v43  ;;  %2157 = vmatpush.bf16.msra.mxu3 %v5625_v47  ;;  %v5765_v43 = vor.u32 %v7439_v33, %v5762_v35  ;;  %v4952_v47 = vld [vmem:[#allocation5 + $0x18] sm:$0xf]  ;;  %v5965_v33 = vor.u32 %v7488_v25, %v5962_v26  ;;  %v7380_v35 = vld [vmem:[#allocation5 + $0x49c] sm:$0xf]  ;;  %v5722_v25 = vld [vmem:[#allocation5 + $0x648] sm:$0xf0] }
  0xa7   :  { %v4953_v61 = vor.u32 %v7242_v49, %v4952_v47  ;;  %v7368_v47 = vld [vmem:[#allocation5 + $0x43c] sm:$0xf]  ;;  %v5296_v26 = vld [vmem:[#allocation5 + $0x2c0] sm:$0xf] }
  0xa8   :  { %2116 = vmatpush.bf16.msra.mxu0 %v5573_v53  ;;  %v7518_v53 = vld [vmem:[#allocation5 + $0x8e4] sm:$0xf0]  ;;  %v7464_v49 = vld [vmem:[#allocation5 + $0x73c] sm:$0xf] }
  0xa9   :  { %2130 = vmatpush.bf16.msra.mxu1 %v5957_v54  ;;  %v7320_v54 = vld [vmem:[#allocation5 + $0x2bc] sm:$0xf]  ;;  %v6057_v1 = vor.u32 %v7518_v53, %v6056_v52 }
  0xaa   :  { %2144 = vmatpush.bf16.msra.mxu2 %v5193_v55  ;;  %2158 = vmatpush.bf16.msra.mxu3 %v5577_v60  ;;  %v5333_v55 = vor.u32 %v7331_v41, %v5330_v42  ;;  %v5717_v60 = vor.u32 %v7427_v45, %v5714_v46  ;;  %v5533_v41 = vor.u32 %v7380_v35, %v5530_v36  ;;  %v5864_v42 = vld [vmem:[#allocation5 + $0x738] sm:$0xf]  ;;  %v5098_v46 = vld [vmem:[#allocation5 + $0x168] sm:$0xf0]  ;;  %v7321_v35 = vld [vmem:[#allocation5 + $0x2c4] sm:$0xf] }
  0xab   :  { %v5917_v45 = vor.u32 %v7476_v37, %v5914_v38  ;;  %v5298_v36 = vld [vmem:[#allocation5 + $0x2f0] sm:$0xf0] }
  0xac   :  { %2117 = vmatpush.bf16.msra.mxu0 %v5525_v2  ;;  %v5293_v2 = vor.u32 %v7320_v54, %v5290_v56  ;;  %v5816_v54 = vld [vmem:[#allocation5 + $0x6d8] sm:$0xf]  ;;  %v7260_v56 = vld [vmem:[#allocation5 + $0xdc] sm:$0xf] }
  0xad   :  { %2131 = vmatpush.bf16.msra.mxu1 %v5909_v3  ;;  %v5677_v3 = vor.u32 %v7416_v58, %v5674_v59  ;;  %v5869_v58 = vor.u32 %v7464_v49, %v5866_v50  ;;  %v5050_v59 = vld [vmem:[#allocation5 + $0x108] sm:$0xf0]  ;;  %v5250_v49 = vld [vmem:[#allocation5 + $0x290] sm:$0xf0] }
  0xae   :  { %2145 = vmatpush.bf16.msra.mxu2 %v5145_v4  ;;  %2159 = vmatpush.bf16.msra.mxu3 %v5529_v9  ;;  %v6008_v4 = vld [vmem:[#allocation5 + $0x858] sm:$0xf]  ;;  %v5242_v9 = vld [vmem:[#allocation5 + $0x288] sm:$0xf0] }
  0xaf   :  { %v6009_v14 = vor.u32 %v7506_v6, %v6008_v4  ;;  %v7446_v4 = vld [vmem:[#allocation5 + $0x6a4] sm:$0xf0]  ;;  %v7248_v6 = vld [vmem:[#allocation5 + $0x7c] sm:$0xf] }
  0xb0   :  { %2118 = vmatpush.bf16.msra.mxu0 %v5477_v15  ;;  %v5245_v15 = vor.u32 %v7308_v7, %v5242_v9  ;;  %v5821_v7 = vor.u32 %v7452_v62, %v5818_v63  ;;  %v7344_v9 = vld [vmem:[#allocation5 + $0x37c] sm:$0xf]  ;;  %v5202_v62 = vld [vmem:[#allocation5 + $0x230] sm:$0xf0] }
  0xb1   :  { %2132 = vmatpush.bf16.msra.mxu1 %v5861_v16  ;;  %v5629_v16 = vor.u32 %v7404_v10, %v5626_v11  ;;  %v5386_v10 = vld [vmem:[#allocation5 + $0x3a8] sm:$0xf0]  ;;  %v7440_v11 = vld [vmem:[#allocation5 + $0x67c] sm:$0xf] }
  0xb2   :  { %2146 = vmatpush.bf16.msra.mxu2 %v5097_v17  ;;  %2160 = vmatpush.bf16.msra.mxu3 %v5481_v22  ;;  %v5960_v17 = vld [vmem:[#allocation5 + $0x7f8] sm:$0xf]  ;;  %v5194_v22 = vld [vmem:[#allocation5 + $0x228] sm:$0xf0] }
  0xb3   :  { %v5961_v27 = vor.u32 %v7494_v18, %v5960_v17  ;;  %v5389_v17 = vor.u32 %v7344_v9, %v5386_v10  ;;  %v7236_v18 = vld [vmem:[#allocation5 + $0x1c] sm:$0xf]  ;;  %v7483_v9 = vld [vmem:[#allocation5 + $0x7cc] sm:$0xf0]  ;;  %v7285_v10 = vld [vmem:[#allocation5 + $0x1a4] sm:$0xf] }
  0xb4   :  { %2119 = vmatpush.bf16.msra.mxu0 %v5429_v28  ;;  %v5197_v28 = vor.u32 %v7296_v19, %v5194_v22  ;;  %v4954_v19 = vld [vmem:[#allocation5 + $0x48] sm:$0xf0]  ;;  %v5773_v22 = vor.u32 %v7440_v11, %v5770_v12  ;;  %v5154_v11 = vld [vmem:[#allocation5 + $0x1d0] sm:$0xf0] }
  0xb5   :  { %2133 = vmatpush.bf16.msra.mxu1 %v5813_v29  ;;  %v5581_v29 = vor.u32 %v7392_v23, %v5578_v24  ;;  %v5338_v23 = vld [vmem:[#allocation5 + $0x348] sm:$0xf0]  ;;  %v7428_v24 = vld [vmem:[#allocation5 + $0x61c] sm:$0xf] }
  0xb6   :  { %2147 = vmatpush.bf16.msra.mxu2 %v5049_v30  ;;  %2161 = vmatpush.bf16.msra.mxu3 %v5433_v34  ;;  %v5912_v30 = vld [vmem:[#allocation5 + $0x798] sm:$0xf]  ;;  %v5146_v34 = vld [vmem:[#allocation5 + $0x1c8] sm:$0xf0]  ;;  %v5725_v37 = vor.u32 %v7428_v24, %v5722_v25  ;;  %v5106_v24 = vld [vmem:[#allocation5 + $0x170] sm:$0xf0] }
  0xb7   :  { %v5913_v39 = vor.u32 %v7482_v31, %v5912_v30  ;;  %v7423_v30 = vld [vmem:[#allocation5 + $0x5ec] sm:$0xf0]  ;;  %v6064_v31 = vld [vmem:[#allocation5 + $0x8c0] sm:$0xf] }
  0xb8   :  { %2120 = vmatpush.bf16.msra.mxu0 %v5381_v40  ;;  %v5149_v40 = vor.u32 %v7284_v32, %v5146_v34  ;;  %v7519_v32 = vld [vmem:[#allocation5 + $0x8ec] sm:$0xf0] }
  0xb9   :  { %2134 = vmatpush.bf16.msra.mxu1 %v5765_v43  ;;  %v7470_v43 = vld [vmem:[#allocation5 + $0x764] sm:$0xf0] }
  0xba   :  { %2148 = vmatpush.bf16.msra.mxu2 %v5001_v44  ;;  %2162 = vmatpush.bf16.msra.mxu3 %v5385_v48  ;;  %v7272_v44 = vld [vmem:[#allocation5 + $0x13c] sm:$0xf]  ;;  %v5482_v48 = vld [vmem:[#allocation5 + $0x468] sm:$0xf0]  ;;  %v5865_v51 = vor.u32 %v7470_v43, %v5864_v42  ;;  %v7315_v42 = vld [vmem:[#allocation5 + $0x28c] sm:$0xf0] }
  0xbb   :  { %v5101_v52 = vor.u32 %v7272_v44, %v5098_v46  ;;  %v5485_v53 = vor.u32 %v7368_v47, %v5482_v48  ;;  %v5632_v43 = vld [vmem:[#allocation5 + $0x560] sm:$0xf]  ;;  %v5301_v44 = vor.u32 %v7321_v35, %v5298_v36  ;;  %v7507_v47 = vld [vmem:[#allocation5 + $0x88c] sm:$0xf0]  ;;  %v7309_v48 = vld [vmem:[#allocation5 + $0x264] sm:$0xf] }
  0xbc   :  { %2121 = vmatpush.bf16.msra.mxu0 %v5333_v55  ;;  %v7458_v55 = vld [vmem:[#allocation5 + $0x704] sm:$0xf0]  ;;  %v6016_v46 = vld [vmem:[#allocation5 + $0x860] sm:$0xf]  ;;  %v7261_v35 = vld [vmem:[#allocation5 + $0xe4] sm:$0xf] }
  0xbd   :  { %2135 = vmatpush.bf16.msra.mxu1 %v5717_v60  ;;  %v7356_v60 = vld [vmem:[#allocation5 + $0x3dc] sm:$0xf]  ;;  %v5058_v36 = vld [vmem:[#allocation5 + $0x110] sm:$0xf0] }
  0xbe   :  { %2149 = vmatpush.bf16.msra.mxu2 %v4953_v61  ;;  %2163 = vmatpush.bf16.msra.mxu3 %v5337_v0  ;;  %v5434_v61 = vld [vmem:[#allocation5 + $0x408] sm:$0xf0]  ;;  %v5817_v0 = vor.u32 %v7458_v55, %v5816_v54  ;;  %v7303_v54 = vld [vmem:[#allocation5 + $0x22c] sm:$0xf0]  ;;  %v5584_v55 = vld [vmem:[#allocation5 + $0x500] sm:$0xf] }
  0xbf   :  { %2122 = vmatmul.bf16.vlgmr.msra.gmra.mxu0 %v8072_v5 }
  0xc0   :  { %2170 = vmatpush.bf16.msrb.mxu0 %v6057_v1  ;;  %2136 = vmatmul.bf16.vlgmr.msra.gmra.mxu1 %v8076_v20  ;;  %v5053_v1 = vor.u32 %v7260_v56, %v5050_v59  ;;  %v5253_v56 = vor.u32 %v7309_v48, %v5250_v49  ;;  %v5968_v59 = vld [vmem:[#allocation5 + $0x800] sm:$0xf]  ;;  %v5010_v48 = vld [vmem:[#allocation5 + $0xb0] sm:$0xf0] }
  0xc1   :  { %2184 = vmatpush.bf16.msrb.mxu1 %v5293_v2  ;;  %2150 = vmatmul.bf16.vlgmr.msra.gmra.mxu2 %v8069_v57  ;;  %v5437_v2 = vor.u32 %v7356_v60, %v5434_v61  ;;  %v7495_v60 = vld [vmem:[#allocation5 + $0x82c] sm:$0xf0]  ;;  %v7297_v61 = vld [vmem:[#allocation5 + $0x204] sm:$0xf] }
  0xc2   :  { %2198 = vmatpush.bf16.msrb.mxu2 %v5677_v3  ;;  %2212 = vmatpush.bf16.msrb.mxu3 %v6061_v8  ;;  %v5768_v3 = vld [vmem:[#allocation5 + $0x678] sm:$0xf]  ;;  %v5002_v8 = vld [vmem:[#allocation5 + $0xa8] sm:$0xf0] }
  0xc3   :  { %2164 = vmatmul.bf16.vlgmr.msra.gmra.mxu3 %v8072_v5  ;;  %v5769_v13 = vor.u32 %v7446_v4, %v5768_v3  ;;  %v7291_v3 = vld [vmem:[#allocation5 + $0x1cc] sm:$0xf0]  ;;  %v5536_v4 = vld [vmem:[#allocation5 + $0x4a0] sm:$0xf] }
  0xc4   :  { %2171 = vmatpush.bf16.msrb.mxu0 %v6009_v14  ;;  %v5720_v14 = vld [vmem:[#allocation5 + $0x618] sm:$0xf] }
  0xc5   :  { %2185 = vmatpush.bf16.msrb.mxu1 %v5245_v15  ;;  %v7434_v15 = vld [vmem:[#allocation5 + $0x644] sm:$0xf0] }
  0xc6   :  { %2199 = vmatpush.bf16.msrb.mxu2 %v5629_v16  ;;  %2213 = vmatpush.bf16.msrb.mxu3 %v6013_v21  ;;  %v5005_v16 = vor.u32 %v7248_v6, %v5002_v8  ;;  %v7332_v21 = vld [vmem:[#allocation5 + $0x31c] sm:$0xf]  ;;  %v5205_v6 = vor.u32 %v7297_v61, %v5202_v62  ;;  %v5920_v8 = vld [vmem:[#allocation5 + $0x7a0] sm:$0xf]  ;;  %v4962_v61 = vld [vmem:[#allocation5 + $0x50] sm:$0xf0] }
  0xc7   :  { %v5341_v34 = vor.u32 %v7332_v21, %v5338_v23  ;;  %v5872_v21 = vld [vmem:[#allocation5 + $0x740] sm:$0xf]  ;;  %v7273_v23 = vld [vmem:[#allocation5 + $0x144] sm:$0xf] }
  0xc8   :  { %2172 = vmatpush.bf16.msrb.mxu0 %v5961_v27  ;;  %v7327_v27 = vld [vmem:[#allocation5 + $0x2ec] sm:$0xf0]  ;;  %v7417_v62 = vld [vmem:[#allocation5 + $0x5c4] sm:$0xf] }
  0xc9   :  { %2186 = vmatpush.bf16.msrb.mxu1 %v5197_v28  ;;  %v5680_v28 = vld [vmem:[#allocation5 + $0x5c0] sm:$0xf]  ;;  %v5297_v38 = vor.u32 %v7327_v27, %v5296_v26 }
  0xca   :  { %2200 = vmatpush.bf16.msrb.mxu2 %v5581_v29  ;;  %2214 = vmatpush.bf16.msrb.mxu3 %v5965_v33  ;;  %v5721_v29 = vor.u32 %v7434_v15, %v5720_v14  ;;  %v4957_v33 = vor.u32 %v7236_v18, %v4954_v19  ;;  %v5921_v14 = vor.u32 %v7483_v9, %v5920_v8  ;;  %v5104_v15 = vld [vmem:[#allocation5 + $0x140] sm:$0xf]  ;;  %v7375_v19 = vld [vmem:[#allocation5 + $0x46c] sm:$0xf0]  ;;  %v5688_v8 = vld [vmem:[#allocation5 + $0x5c8] sm:$0xf] }
  0xcb   :  { %v5157_v18 = vor.u32 %v7285_v10, %v5154_v11  ;;  %v7424_v9 = vld [vmem:[#allocation5 + $0x5f4] sm:$0xf0] }
  0xcc   :  { %2173 = vmatpush.bf16.msrb.mxu0 %v5913_v39  ;;  %v5681_v39 = vor.u32 %v7423_v30, %v5680_v28  ;;  %v5056_v28 = vld [vmem:[#allocation5 + $0xe0] sm:$0xf] }
  0xcd   :  { %2187 = vmatpush.bf16.msrb.mxu1 %v5149_v40  ;;  %v6065_v40 = vor.u32 %v7519_v32, %v6064_v31  ;;  %v5440_v30 = vld [vmem:[#allocation5 + $0x3e0] sm:$0xf]  ;;  %v5109_v31 = vor.u32 %v7273_v23, %v5106_v24  ;;  %v7363_v32 = vld [vmem:[#allocation5 + $0x40c] sm:$0xf0]  ;;  %v7412_v23 = vld [vmem:[#allocation5 + $0x594] sm:$0xf0] }
  0xce   :  { %2201 = vmatpush.bf16.msrb.mxu2 %v5533_v41  ;;  %2215 = vmatpush.bf16.msrb.mxu3 %v5917_v45  ;;  %v5248_v41 = vld [vmem:[#allocation5 + $0x260] sm:$0xf]  ;;  %v7411_v45 = vld [vmem:[#allocation5 + $0x58c] sm:$0xf0] }
  0xcf   :  { %v5249_v50 = vor.u32 %v7315_v42, %v5248_v41  ;;  %v7255_v41 = vld [vmem:[#allocation5 + $0xac] sm:$0xf0]  ;;  %v5392_v42 = vld [vmem:[#allocation5 + $0x380] sm:$0xf] }
  0xd0   :  { %2174 = vmatpush.bf16.msrb.mxu0 %v5865_v51  ;;  %v5633_v51 = vor.u32 %v7411_v45, %v5632_v43  ;;  %v5061_v43 = vor.u32 %v7261_v35, %v5058_v36  ;;  %v5776_v45 = vld [vmem:[#allocation5 + $0x680] sm:$0xf]  ;;  %v7400_v35 = vld [vmem:[#allocation5 + $0x534] sm:$0xf0] }
  0xd1   :  { %2188 = vmatpush.bf16.msrb.mxu1 %v5101_v52  ;;  %v6017_v52 = vor.u32 %v7507_v47, %v6016_v46  ;;  %v7447_v46 = vld [vmem:[#allocation5 + $0x6ac] sm:$0xf0]  ;;  %v7249_v47 = vld [vmem:[#allocation5 + $0x84] sm:$0xf] }
  0xd2   :  { %2202 = vmatpush.bf16.msrb.mxu2 %v5485_v53  ;;  %2216 = vmatpush.bf16.msrb.mxu3 %v5869_v58  ;;  %v5200_v53 = vld [vmem:[#allocation5 + $0x200] sm:$0xf]  ;;  %v7399_v58 = vld [vmem:[#allocation5 + $0x52c] sm:$0xf0] }
  0xd3   :  { %v5201_v63 = vor.u32 %v7303_v54, %v5200_v53  ;;  %v5777_v53 = vor.u32 %v7447_v46, %v5776_v45  ;;  %v5344_v54 = vld [vmem:[#allocation5 + $0x320] sm:$0xf]  ;;  %v5922_v45 = vld [vmem:[#allocation5 + $0x7d0] sm:$0xf0]  ;;  %v5160_v46 = vld [vmem:[#allocation5 + $0x1a8] sm:$0xf] }
  0xd4   :  { %2175 = vmatpush.bf16.msrb.mxu0 %v5817_v0  ;;  %v5585_v0 = vor.u32 %v7399_v58, %v5584_v55  ;;  %v7339_v55 = vld [vmem:[#allocation5 + $0x34c] sm:$0xf0]  ;;  %v5013_v58 = vor.u32 %v7249_v47, %v5010_v48  ;;  %v7292_v47 = vld [vmem:[#allocation5 + $0x1d4] sm:$0xf0]  ;;  %v5544_v48 = vld [vmem:[#allocation5 + $0x4a8] sm:$0xf] }
  0xd5   :  { %2189 = vmatpush.bf16.msrb.mxu1 %v5053_v1  ;;  %v5969_v1 = vor.u32 %v7495_v60, %v5968_v59  ;;  %v7435_v59 = vld [vmem:[#allocation5 + $0x64c] sm:$0xf0]  ;;  %v7237_v60 = vld [vmem:[#allocation5 + $0x24] sm:$0xf] }
  0xd6   :  { %2203 = vmatpush.bf16.msrb.mxu2 %v5437_v2  ;;  %2217 = vmatpush.bf16.msrb.mxu3 %v5821_v7  ;;  %v5152_v2 = vld [vmem:[#allocation5 + $0x1a0] sm:$0xf]  ;;  %v7387_v7 = vld [vmem:[#allocation5 + $0x4cc] sm:$0xf0]  ;;  %v4965_v10 = vor.u32 %v7237_v60, %v4962_v61  ;;  %v7280_v60 = vld [vmem:[#allocation5 + $0x174] sm:$0xf0] }
  0xd7   :  { %v5153_v12 = vor.u32 %v7291_v3, %v5152_v2  ;;  %v6066_v2 = vld [vmem:[#allocation5 + $0x8f0] sm:$0xf0]  ;;  %v5304_v3 = vld [vmem:[#allocation5 + $0x2c8] sm:$0xf] }
  0xd8   :  { %2176 = vmatpush.bf16.msrb.mxu0 %v5769_v13  ;;  %v5537_v13 = vor.u32 %v7387_v7, %v5536_v4  ;;  %v7328_v4 = vld [vmem:[#allocation5 + $0x2f4] sm:$0xf0]  ;;  %v5496_v61 = vld [vmem:[#allocation5 + $0x448] sm:$0xf] }
  0xd9   :  { %2190 = vmatpush.bf16.msrb.mxu1 %v5005_v16  ;;  %v7279_v16 = vld [vmem:[#allocation5 + $0x16c] sm:$0xf0] }
  0xda   :  { %2204 = vmatpush.bf16.msrb.mxu2 %v5389_v17  ;;  %2218 = vmatpush.bf16.msrb.mxu3 %v5773_v22  ;;  %v5488_v17 = vld [vmem:[#allocation5 + $0x440] sm:$0xf]  ;;  %v7471_v22 = vld [vmem:[#allocation5 + $0x76c] sm:$0xf0]  ;;  %v5105_v25 = vor.u32 %v7279_v16, %v5104_v15  ;;  %v5634_v15 = vld [vmem:[#allocation5 + $0x590] sm:$0xf0] }
  0xdb   :  { %v5489_v26 = vor.u32 %v7375_v19, %v5488_v17  ;;  %v5873_v27 = vor.u32 %v7471_v22, %v5872_v21  ;;  %v7501_v16 = vld [vmem:[#allocation5 + $0x864] sm:$0xf]  ;;  %v5689_v17 = vor.u32 %v7424_v9, %v5688_v8  ;;  %v5256_v19 = vld [vmem:[#allocation5 + $0x268] sm:$0xf]  ;;  %v7316_v21 = vld [vmem:[#allocation5 + $0x294] sm:$0xf0] }
  0xdc   :  { %2177 = vmatpush.bf16.msrb.mxu0 %v5721_v29  ;;  %v7267_v29 = vld [vmem:[#allocation5 + $0x10c] sm:$0xf0]  ;;  %v5640_v22 = vld [vmem:[#allocation5 + $0x568] sm:$0xf]  ;;  %v5826_v9 = vld [vmem:[#allocation5 + $0x710] sm:$0xf0] }
  0xdd   :  { %2191 = vmatpush.bf16.msrb.mxu1 %v4957_v33  ;;  %v5824_v33 = vld [vmem:[#allocation5 + $0x6e0] sm:$0xf] }
  0xde   :  { %2205 = vmatpush.bf16.msrb.mxu2 %v5341_v34  ;;  %2219 = vmatpush.bf16.msrb.mxu3 %v5725_v37  ;;  %v7459_v34 = vld [vmem:[#allocation5 + $0x70c] sm:$0xf0]  ;;  %v5057_v37 = vor.u32 %v7267_v29, %v5056_v28  ;;  %v5586_v28 = vld [vmem:[#allocation5 + $0x530] sm:$0xf0]  ;;  %v7489_v29 = vld [vmem:[#allocation5 + $0x804] sm:$0xf] }
  0xdf   :  { %2178 = vmatmul.bf16.vlgmr.msrb.gmra.mxu0 %v8076_v20 }
  0xe0   :  { %2226 = vmatpush.bf16.msra.mxu0 %v5297_v38  ;;  %2192 = vmatmul.bf16.vlgmr.msrb.gmra.mxu1 %v8069_v57  ;;  %v5441_v38 = vor.u32 %v7363_v32, %v5440_v30  ;;  %v5641_v30 = vor.u32 %v7412_v23, %v5640_v22  ;;  %v5208_v32 = vld [vmem:[#allocation5 + $0x208] sm:$0xf]  ;;  %v7441_v22 = vld [vmem:[#allocation5 + $0x684] sm:$0xf] }
  0xe1   :  { %2240 = vmatpush.bf16.msra.mxu1 %v5681_v39  ;;  %2206 = vmatmul.bf16.vlgmr.msrb.gmra.mxu2 %v8072_v5  ;;  %v5825_v39 = vor.u32 %v7459_v34, %v5824_v33  ;;  %v7304_v33 = vld [vmem:[#allocation5 + $0x234] sm:$0xf0]  ;;  %v5592_v34 = vld [vmem:[#allocation5 + $0x508] sm:$0xf] }
  0xe2   :  { %2254 = vmatpush.bf16.msra.mxu2 %v6065_v40  ;;  %2268 = vmatpush.bf16.msra.mxu3 %v5301_v44  ;;  %v5008_v40 = vld [vmem:[#allocation5 + $0x80] sm:$0xf]  ;;  %v7351_v44 = vld [vmem:[#allocation5 + $0x3ac] sm:$0xf0] }
  0xe3   :  { %2220 = vmatmul.bf16.vlgmr.msrb.gmra.mxu3 %v8076_v20  ;;  %v5009_v49 = vor.u32 %v7255_v41, %v5008_v40  ;;  %v5209_v40 = vor.u32 %v7304_v33, %v5208_v32  ;;  %v7381_v41 = vld [vmem:[#allocation5 + $0x4a4] sm:$0xf] }
  0xe4   :  { %2227 = vmatpush.bf16.msra.mxu0 %v5249_v50  ;;  %v4960_v50 = vld [vmem:[#allocation5 + $0x20] sm:$0xf] }
  0xe5   :  { %2241 = vmatpush.bf16.msra.mxu1 %v5633_v51  ;;  %v7243_v51 = vld [vmem:[#allocation5 + $0x4c] sm:$0xf0] }
  0xe6   :  { %2255 = vmatpush.bf16.msra.mxu2 %v6017_v52  ;;  %2269 = vmatpush.bf16.msra.mxu3 %v5253_v56  ;;  %v5393_v52 = vor.u32 %v7351_v44, %v5392_v42  ;;  %v5728_v56 = vld [vmem:[#allocation5 + $0x620] sm:$0xf]  ;;  %v5538_v42 = vld [vmem:[#allocation5 + $0x4d0] sm:$0xf0]  ;;  %v5593_v44 = vor.u32 %v7400_v35, %v5592_v34  ;;  %v7429_v34 = vld [vmem:[#allocation5 + $0x624] sm:$0xf] }
  0xe7   :  { %v5729_v7 = vor.u32 %v7435_v59, %v5728_v56  ;;  %v5112_v59 = vld [vmem:[#allocation5 + $0x148] sm:$0xf]  ;;  %v5730_v35 = vld [vmem:[#allocation5 + $0x650] sm:$0xf0] }
  0xe8   :  { %2228 = vmatpush.bf16.msra.mxu0 %v5201_v63  ;;  %v5682_v63 = vld [vmem:[#allocation5 + $0x5f0] sm:$0xf0] }
  0xe9   :  { %2242 = vmatpush.bf16.msra.mxu1 %v5585_v0  ;;  %v7513_v0 = vld [vmem:[#allocation5 + $0x8c4] sm:$0xf]  ;;  %v5685_v11 = vor.u32 %v7417_v62, %v5682_v63  ;;  %v7376_v62 = vld [vmem:[#allocation5 + $0x474] sm:$0xf0]  ;;  %v8107_v63 = vpop.f32.mrf.mxu2 }
  0xea   :  { %2256 = vmatpush.bf16.msra.mxu2 %v5969_v1  ;;  %2270 = vmatpush.bf16.msra.mxu3 %v5205_v6  ;;  %v4961_v1 = vor.u32 %v7243_v51, %v4960_v50  ;;  %v5345_v6 = vor.u32 %v7339_v55, %v5344_v54  ;;  %v5541_v50 = vor.u32 %v7381_v41, %v5538_v42  ;;  %v5490_v54 = vld [vmem:[#allocation5 + $0x470] sm:$0xf0]  ;;  %v7465_v55 = vld [vmem:[#allocation5 + $0x744] sm:$0xf]  ;;  %v7244_v42 = vld [vmem:[#allocation5 + $0x54] sm:$0xf0] }
  0xeb   :  { %v5497_v8 = vor.u32 %v7376_v62, %v5496_v61 }
  0xec   :  { %2229 = vmatpush.bf16.msra.mxu0 %v5153_v12  ;;  %v6069_v12 = vor.u32 %v7513_v0, %v6066_v2  ;;  %v8109_v0 = vpop.f32.mrf.mxu3 }
  0xed   :  { %2243 = vmatpush.bf16.msra.mxu1 %v5537_v13  ;;  %v5305_v13 = vor.u32 %v7328_v4, %v5304_v3  ;;  %v5113_v3 = vor.u32 %v7280_v60, %v5112_v59  ;;  %v7357_v4 = vld [vmem:[#allocation5 + $0x3e4] sm:$0xf] }
  0xee   :  { %2257 = vmatpush.bf16.msra.mxu2 %v5921_v14  ;;  %2271 = vmatpush.bf16.msra.mxu3 %v5157_v18  ;;  %v7405_v14 = vld [vmem:[#allocation5 + $0x564] sm:$0xf]  ;;  %v6018_v18 = vld [vmem:[#allocation5 + $0x890] sm:$0xf0] }
  0xef   :  { %v5637_v24 = vor.u32 %v7405_v14, %v5634_v15  ;;  %v5448_v14 = vld [vmem:[#allocation5 + $0x3e8] sm:$0xf]  ;;  %v7364_v15 = vld [vmem:[#allocation5 + $0x414] sm:$0xf0] }
  0xf0   :  { %2230 = vmatpush.bf16.msra.mxu0 %v5105_v25  ;;  %v6021_v25 = vor.u32 %v7501_v16, %v6018_v18  ;;  %v5449_v23 = vor.u32 %v7364_v15, %v5448_v14 }
  0xf1   :  { %2244 = vmatpush.bf16.msra.mxu1 %v5489_v26  ;;  %v5257_v26 = vor.u32 %v7316_v21, %v5256_v19  ;;  %v7345_v19 = vld [vmem:[#allocation5 + $0x384] sm:$0xf]  ;;  %v5394_v21 = vld [vmem:[#allocation5 + $0x3b0] sm:$0xf0] }
  0xf2   :  { %2258 = vmatpush.bf16.msra.mxu2 %v5873_v27  ;;  %2272 = vmatpush.bf16.msra.mxu3 %v5109_v31  ;;  %v7393_v27 = vld [vmem:[#allocation5 + $0x504] sm:$0xf]  ;;  %v5970_v31 = vld [vmem:[#allocation5 + $0x830] sm:$0xf0] }
  0xf3   :  { %v5589_v36 = vor.u32 %v7393_v27, %v5586_v28  ;;  %v5400_v27 = vld [vmem:[#allocation5 + $0x388] sm:$0xf]  ;;  %v7352_v28 = vld [vmem:[#allocation5 + $0x3b4] sm:$0xf0] }
  0xf4   :  { %2231 = vmatpush.bf16.msra.mxu0 %v5057_v37  ;;  %v8103_v37 = vpop.f32.mrf.mxu0  ;;  %v5401_v41 = vor.u32 %v7352_v28, %v5400_v27  ;;  %v5978_v27 = vld [vmem:[#allocation5 + $0x838] sm:$0xf0] }
  0xf5   :  { %2245 = vmatpush.bf16.msra.mxu1 %v5441_v38  ;;  %v8105_v38 = vpop.f32.mrf.mxu1 }
  0xf6   :  { %2259 = vmatpush.bf16.msra.mxu2 %v5825_v39  ;;  %2273 = vmatpush.bf16.msra.mxu3 %v5061_v43  ;;  %v5973_v39 = vor.u32 %v7489_v29, %v5970_v31  ;;  %v7477_v43 = vld [vmem:[#allocation5 + $0x7a4] sm:$0xf]  ;;  %v5397_v29 = vor.u32 %v7345_v19, %v5394_v21  ;;  %v5346_v31 = vld [vmem:[#allocation5 + $0x350] sm:$0xf0]  ;;  %v7496_v19 = vld [vmem:[#allocation5 + $0x834] sm:$0xf0] }
  0xf7   :  { %v5925_v51 = vor.u32 %v7477_v43, %v5922_v45  ;;  %v5352_v43 = vld [vmem:[#allocation5 + $0x328] sm:$0xf]  ;;  %v7298_v21 = vld [vmem:[#allocation5 + $0x20c] sm:$0xf] }
  0xf8   :  { %2232 = vmatpush.bf16.msra.mxu0 %v5009_v49  ;;  %v7388_v49 = vld [vmem:[#allocation5 + $0x4d4] sm:$0xf0]  ;;  %v6072_v45 = vld [vmem:[#allocation5 + $0x8c8] sm:$0xf] }
  0xf9   :  { %2246 = vmatpush.bf16.msra.mxu1 %v5393_v52  ;;  %v5161_v52 = vor.u32 %v7292_v47, %v5160_v46  ;;  %v5545_v56 = vor.u32 %v7388_v49, %v5544_v48  ;;  %v7520_v46 = vld [vmem:[#allocation5 + $0x8f4] sm:$0xf0]  ;;  %v7322_v47 = vld [vmem:[#allocation5 + $0x2cc] sm:$0xf]  ;;  %v5306_v49 = vld [vmem:[#allocation5 + $0x2f8] sm:$0xf0] }
  0xfa   :  { %2260 = vmatpush.bf16.msra.mxu2 %v5777_v53  ;;  %2274 = vmatpush.bf16.msra.mxu3 %v5013_v58  ;;  %v7369_v53 = vld [vmem:[#allocation5 + $0x444] sm:$0xf]  ;;  %v5874_v58 = vld [vmem:[#allocation5 + $0x770] sm:$0xf0]  ;;  %v6073_v60 = vor.u32 %v7520_v46, %v6072_v45  ;;  %v5309_v61 = vor.u32 %v7322_v47, %v5306_v49  ;;  %v5930_v45 = vld [vmem:[#allocation5 + $0x7d8] sm:$0xf0] }
  0xfb   :  { %v5877_v2 = vor.u32 %v7465_v55, %v5874_v58  ;;  %v6074_v58 = vld [vmem:[#allocation5 + $0x8f8] sm:$0xf0]  ;;  %v5880_v49 = vld [vmem:[#allocation5 + $0x748] sm:$0xf] }
  0xfc   :  { %2233 = vmatpush.bf16.msra.mxu0 %v4961_v1  ;;  %v5493_v1 = vor.u32 %v7369_v53, %v5490_v54  ;;  %v5733_v54 = vor.u32 %v7429_v34, %v5730_v35  ;;  %v7484_v34 = vld [vmem:[#allocation5 + $0x7d4] sm:$0xf0]  ;;  %v7286_v35 = vld [vmem:[#allocation5 + $0x1ac] sm:$0xf] }
  0xfd   :  { %2247 = vmatpush.bf16.msra.mxu1 %v5345_v6  ;;  %v5442_v6 = vld [vmem:[#allocation5 + $0x410] sm:$0xf0] }
  0xfe   :  { %2261 = vmatpush.bf16.msra.mxu2 %v5729_v7  ;;  %2275 = vmatpush.bf16.msra.mxu3 %v4965_v10  ;;  %v7453_v7 = vld [vmem:[#allocation5 + $0x6e4] sm:$0xf]  ;;  %v5064_v10 = vld [vmem:[#allocation5 + $0xe8] sm:$0xf]  ;;  %v5445_v16 = vor.u32 %v7357_v4, %v5442_v6  ;;  %v5258_v6 = vld [vmem:[#allocation5 + $0x298] sm:$0xf0] }
  0xff   :  { %2234 = vmatmul.bf16.vlgmr.msra.gmra.mxu0 %v8069_v57 }
 0x100   :  { %2282 = vmatpush.bf16.msrb.mxu0 %v5685_v11  ;;  %2248 = vmatmul.bf16.vlgmr.msra.gmra.mxu1 %v8072_v5  ;;  %v7268_v11 = vld [vmem:[#allocation5 + $0x114] sm:$0xf0] }
 0x101   :  { %2296 = vmatpush.bf16.msrb.mxu1 %v6069_v12  ;;  %2262 = vmatmul.bf16.vlgmr.msra.gmra.mxu2 %v8076_v20  ;;  %v8111_v12 = vpop.f32.mrf.mxu0  ;;  %v5065_v18 = vor.u32 %v7268_v11, %v5064_v10  ;;  %v6026_v10 = vld [vmem:[#allocation5 + $0x898] sm:$0xf0] }
 0x102   :  { %2310 = vmatpush.bf16.msrb.mxu2 %v5305_v13  ;;  %2324 = vmatpush.bf16.msrb.mxu3 %v5689_v17  ;;  %v8113_v13 = vpop.f32.mrf.mxu1  ;;  %v5829_v17 = vor.u32 %v7453_v7, %v5826_v9  ;;  %v7406_v7 = vld [vmem:[#allocation5 + $0x56c] sm:$0xf] }
 0x103   :  { %2276 = vmatmul.bf16.vlgmr.msra.gmra.mxu3 %v8069_v57  ;;  %v7502_v9 = vld [vmem:[#allocation5 + $0x86c] sm:$0xf] }
 0x104   :  { %2283 = vmatpush.bf16.msrb.mxu0 %v5637_v24  ;;  %v5778_v24 = vld [vmem:[#allocation5 + $0x6b0] sm:$0xf0] }
 0x105   :  { %2297 = vmatpush.bf16.msrb.mxu1 %v6021_v25  ;;  %v5016_v25 = vld [vmem:[#allocation5 + $0x88] sm:$0xf]  ;;  %v5781_v32 = vor.u32 %v7441_v22, %v5778_v24  ;;  %v6029_v22 = vor.u32 %v7502_v9, %v6026_v10  ;;  %v7394_v24 = vld [vmem:[#allocation5 + $0x50c] sm:$0xf] }
 0x106   :  { %2311 = vmatpush.bf16.msrb.mxu2 %v5257_v26  ;;  %2325 = vmatpush.bf16.msrb.mxu3 %v5641_v30  ;;  %v7256_v26 = vld [vmem:[#allocation5 + $0xb4] sm:$0xf0]  ;;  %v7333_v30 = vld [vmem:[#allocation5 + $0x324] sm:$0xf]  ;;  %v7262_v9 = vld [vmem:[#allocation5 + $0xec] sm:$0xf] }
 0x107   :  { %v5017_v33 = vor.u32 %v7256_v26, %v5016_v25  ;;  %v5349_v48 = vor.u32 %v7333_v30, %v5346_v31  ;;  %v5594_v25 = vld [vmem:[#allocation5 + $0x538] sm:$0xf0]  ;;  %v7490_v26 = vld [vmem:[#allocation5 + $0x80c] sm:$0xf] }
 0x108   :  { %2284 = vmatpush.bf16.msrb.mxu0 %v5589_v36  ;;  %v4968_v36 = vld [vmem:[#allocation5 + $0x28] sm:$0xf] }
 0x109   :  { %2298 = vmatpush.bf16.msrb.mxu1 %v5973_v39  ;;  %v8115_v39 = vpop.f32.mrf.mxu2  ;;  %v4969_v55 = vor.u32 %v7244_v42, %v4968_v36  ;;  %v5981_v36 = vor.u32 %v7490_v26, %v5978_v27  ;;  %v7382_v42 = vld [vmem:[#allocation5 + $0x4ac] sm:$0xf] }
 0x10a   :  { %2312 = vmatpush.bf16.msrb.mxu2 %v5209_v40  ;;  %2326 = vmatpush.bf16.msrb.mxu3 %v5593_v44  ;;  %v8117_v40 = vpop.f32.mrf.mxu3  ;;  %v7340_v44 = vld [vmem:[#allocation5 + $0x354] sm:$0xf0]  ;;  %v8121_v53 = vpop.f32.mrf.mxu1  ;;  %v7250_v26 = vld [vmem:[#allocation5 + $0x8c] sm:$0xf] }
 0x10b   :  { %v5353_v59 = vor.u32 %v7340_v44, %v5352_v43  ;;  %v5546_v43 = vld [vmem:[#allocation5 + $0x4d8] sm:$0xf0]  ;;  %v7478_v44 = vld [vmem:[#allocation5 + $0x7ac] sm:$0xf] }
 0x10c   :  { %2285 = vmatpush.bf16.msrb.mxu0 %v5541_v50  ;;  %v7418_v50 = vld [vmem:[#allocation5 + $0x5cc] sm:$0xf] }
 0x10d   :  { %2299 = vmatpush.bf16.msrb.mxu1 %v5925_v51  ;;  %v5690_v51 = vld [vmem:[#allocation5 + $0x5f8] sm:$0xf0] }
 0x10e   :  { %2313 = vmatpush.bf16.msrb.mxu2 %v5161_v52  ;;  %2327 = vmatpush.bf16.msrb.mxu3 %v5545_v56  ;;  %v8119_v52 = vpop.f32.mrf.mxu0  ;;  %v7514_v56 = vld [vmem:[#allocation5 + $0x8cc] sm:$0xf]  ;;  %v5693_v62 = vor.u32 %v7418_v50, %v5690_v51  ;;  %v7472_v50 = vld [vmem:[#allocation5 + $0x774] sm:$0xf0] }
 0x10f   :  { %v6077_v4 = vor.u32 %v7514_v56, %v6074_v58  ;;  %v7274_v51 = vld [vmem:[#allocation5 + $0x14c] sm:$0xf]  ;;  %v5933_v56 = vor.u32 %v7478_v44, %v5930_v45  ;;  %v5114_v58 = vld [vmem:[#allocation5 + $0x178] sm:$0xf0] }
 0x110   :  { %2286 = vmatpush.bf16.msrb.mxu0 %v5493_v1  ;;  %v6024_v1 = vld [vmem:[#allocation5 + $0x868] sm:$0xf] }
 0x111   :  { %2300 = vmatpush.bf16.msrb.mxu1 %v5877_v2  ;;  %v7508_v2 = vld [vmem:[#allocation5 + $0x894] sm:$0xf0]  ;;  %v8123_v11 = vpop.f32.mrf.mxu2 }
 0x112   :  { %2314 = vmatpush.bf16.msrb.mxu2 %v5113_v3  ;;  %2328 = vmatpush.bf16.msrb.mxu3 %v5497_v8  ;;  %v7310_v3 = vld [vmem:[#allocation5 + $0x26c] sm:$0xf]  ;;  %v5642_v8 = vld [vmem:[#allocation5 + $0x598] sm:$0xf0]  ;;  %v8125_v14 = vpop.f32.mrf.mxu3  ;;  %v6025_v15 = vor.u32 %v7508_v2, %v6024_v1  ;;  %v8133_v30 = vpop.f32.mrf.mxu1  ;;  %v5881_v1 = vor.u32 %v7472_v50, %v5880_v49 }
 0x113   :  { %v5354_v50 = vld [vmem:[#allocation5 + $0x358] sm:$0xf0] }
 0x114   :  { %2287 = vmatpush.bf16.msrb.mxu0 %v5445_v16  ;;  %v5261_v16 = vor.u32 %v7310_v3, %v5258_v6 }
 0x115   :  { %2301 = vmatpush.bf16.msrb.mxu1 %v5829_v17  ;;  %v5645_v17 = vor.u32 %v7406_v7, %v5642_v8  ;;  %v5832_v7 = vld [vmem:[#allocation5 + $0x6e8] sm:$0xf]  ;;  %v7460_v8 = vld [vmem:[#allocation5 + $0x714] sm:$0xf0] }
 0x116   :  { %2315 = vmatpush.bf16.msrb.mxu2 %v5065_v18  ;;  %2329 = vmatpush.bf16.msrb.mxu3 %v5449_v23  ;;  %v5976_v18 = vld [vmem:[#allocation5 + $0x808] sm:$0xf]  ;;  %v5210_v23 = vld [vmem:[#allocation5 + $0x238] sm:$0xf0] }
 0x117   :  { %v5977_v28 = vor.u32 %v7496_v19, %v5976_v18  ;;  %v5213_v31 = vor.u32 %v7298_v21, %v5210_v23  ;;  %v7454_v18 = vld [vmem:[#allocation5 + $0x6ec] sm:$0xf]  ;;  %v5834_v19 = vld [vmem:[#allocation5 + $0x718] sm:$0xf0]  ;;  %v5833_v21 = vor.u32 %v7460_v8, %v5832_v7  ;;  %v7591_v7 = vld [vmem:[#allocation8 + $0x230] sm:$0xf0] }
 0x118   :  { %2288 = vmatpush.bf16.msrb.mxu0 %v5397_v29  ;;  %v8131_v29 = vpop.f32.mrf.mxu0 }
 0x119   :  { %2302 = vmatpush.bf16.msrb.mxu1 %v5781_v32  ;;  %v5597_v32 = vor.u32 %v7394_v24, %v5594_v25  ;;  %v5784_v24 = vld [vmem:[#allocation5 + $0x688] sm:$0xf]  ;;  %v7448_v25 = vld [vmem:[#allocation5 + $0x6b4] sm:$0xf0] }
 0x11a   :  { %2316 = vmatpush.bf16.msrb.mxu2 %v5017_v33  ;;  %2330 = vmatpush.bf16.msrb.mxu3 %v5401_v41  ;;  %v5928_v33 = vld [vmem:[#allocation5 + $0x7a8] sm:$0xf]  ;;  %v5162_v41 = vld [vmem:[#allocation5 + $0x1d8] sm:$0xf0]  ;;  %v8141_v3 = vpop.f32.mrf.mxu1 }
 0x11b   :  { %v5929_v46 = vor.u32 %v7484_v34, %v5928_v33  ;;  %v5165_v47 = vor.u32 %v7286_v35, %v5162_v41  ;;  %v7346_v33 = vld [vmem:[#allocation5 + $0x38c] sm:$0xf]  ;;  %v5402_v34 = vld [vmem:[#allocation5 + $0x3b8] sm:$0xf0]  ;;  %v5785_v41 = vor.u32 %v7448_v25, %v5784_v24 }
 0x11c   :  { %2289 = vmatpush.bf16.msrb.mxu0 %v5349_v48  ;;  %v5549_v48 = vor.u32 %v7382_v42, %v5546_v43  ;;  %v7442_v35 = vld [vmem:[#allocation5 + $0x68c] sm:$0xf]  ;;  %v5736_v42 = vld [vmem:[#allocation5 + $0x628] sm:$0xf]  ;;  %v7436_v43 = vld [vmem:[#allocation5 + $0x654] sm:$0xf0]  ;;  %v5405_v45 = vor.u32 %v7346_v33, %v5402_v34 }
 0x11d   :  { %2303 = vmatpush.bf16.msrb.mxu1 %v5733_v54  ;;  %v8135_v54 = vpop.f32.mrf.mxu2  ;;  %v7588_v33 = vld [vmem:[#allocation8 + $0x218] sm:$0xf0]  ;;  %v6440_v34 = vld [vmem:[#allocation8 + $0x2d0] sm:$0xf] }
 0x11e   :  { %2317 = vmatpush.bf16.msrb.mxu2 %v4969_v55  ;;  %2331 = vmatpush.bf16.msrb.mxu3 %v5353_v59  ;;  %v8137_v55 = vpop.f32.mrf.mxu3  ;;  %v7370_v59 = vld [vmem:[#allocation5 + $0x44c] sm:$0xf] }
 0x11f   :  { %2290 = vmatmul.bf16.vlgmr.msrb.gmra.mxu0 %v8072_v5 }
 0x120   :  { %2338 = vmatpush.bf16.msra.mxu0 %v6073_v60  ;;  %2304 = vmatmul.bf16.vlgmr.msrb.gmra.mxu1 %v8076_v20  ;;  %v5498_v60 = vld [vmem:[#allocation5 + $0x478] sm:$0xf0]  ;;  %v8139_v2 = vpop.f32.mrf.mxu0 }
 0x121   :  { %2352 = vmatpush.bf16.msra.mxu1 %v5309_v61  ;;  %2318 = vmatmul.bf16.vlgmr.msrb.gmra.mxu2 %v8069_v57  ;;  %v7466_v61 = vld [vmem:[#allocation5 + $0x74c] sm:$0xf]  ;;  %v5501_v6 = vor.u32 %v7370_v59, %v5498_v60  ;;  %v6164_v60 = vld [vmem:[#allocation8 + $0xa8] sm:$0xf] }
 0x122   :  { %2366 = vmatpush.bf16.msra.mxu2 %v5693_v62  ;;  %2380 = vmatpush.bf16.msra.mxu3 %v6077_v4  ;;  %v5882_v62 = vld [vmem:[#allocation5 + $0x778] sm:$0xf0]  ;;  %v5117_v4 = vor.u32 %v7274_v51, %v5114_v58  ;;  %v7430_v51 = vld [vmem:[#allocation5 + $0x62c] sm:$0xf]  ;;  %v8149_v59 = vpop.f32.mrf.mxu1 }
 0x123   :  { %2332 = vmatmul.bf16.vlgmr.msrb.gmra.mxu3 %v8072_v5  ;;  %v5885_v10 = vor.u32 %v7466_v61, %v5882_v62  ;;  %v7543_v61 = vld [vmem:[#allocation8 + $0xb0] sm:$0xf0]  ;;  %v6260_v62 = vld [vmem:[#allocation8 + $0x168] sm:$0xf] }
 0x124   :  { %2339 = vmatpush.bf16.msra.mxu0 %v6025_v15  ;;  %v5066_v15 = vld [vmem:[#allocation5 + $0x118] sm:$0xf0] }
 0x125   :  { %2353 = vmatpush.bf16.msra.mxu1 %v5261_v16  ;;  %v7358_v16 = vld [vmem:[#allocation5 + $0x3ec] sm:$0xf]  ;;  %v8143_v27 = vpop.f32.mrf.mxu2 }
 0x126   :  { %2367 = vmatpush.bf16.msra.mxu2 %v5645_v17  ;;  %2381 = vmatpush.bf16.msra.mxu3 %v6029_v22  ;;  %v5450_v17 = vld [vmem:[#allocation5 + $0x418] sm:$0xf0]  ;;  %v5069_v22 = vor.u32 %v7262_v9, %v5066_v15  ;;  %v7615_v15 = vld [vmem:[#allocation8 + $0x2f0] sm:$0xf0] }
 0x127   :  { %v5453_v23 = vor.u32 %v7358_v16, %v5450_v17  ;;  %v6165_v17 = vor.u32 %v7543_v61, %v6164_v60 }
 0x128   :  { %2340 = vmatpush.bf16.msra.mxu0 %v5977_v28  ;;  %v8145_v28 = vpop.f32.mrf.mxu3  ;;  %v8147_v58 = vpop.f32.mrf.mxu0 }
 0x129   :  { %2354 = vmatpush.bf16.msra.mxu1 %v5213_v31  ;;  %v5837_v31 = vor.u32 %v7454_v18, %v5834_v19 }
 0x12a   :  { %2368 = vmatpush.bf16.msra.mxu2 %v5597_v32  ;;  %2382 = vmatpush.bf16.msra.mxu3 %v5981_v36  ;;  %v5018_v32 = vld [vmem:[#allocation5 + $0xb8] sm:$0xf0] }
 0x12b   :  { %v5786_v36 = vld [vmem:[#allocation5 + $0x6b8] sm:$0xf0]  ;;  %v5021_v44 = vor.u32 %v7250_v26, %v5018_v32 }
 0x12c   :  { %2341 = vmatpush.bf16.msra.mxu0 %v5929_v46  ;;  %v7238_v46 = vld [vmem:[#allocation5 + $0x2c] sm:$0xf]  ;;  %v5789_v49 = vor.u32 %v7442_v35, %v5786_v36  ;;  %v6344_v32 = vld [vmem:[#allocation8 + $0x210] sm:$0xf]  ;;  %v7612_v35 = vld [vmem:[#allocation8 + $0x2d8] sm:$0xf0] }
 0x12d   :  { %2355 = vmatpush.bf16.msra.mxu1 %v5165_v47  ;;  %v4970_v47 = vld [vmem:[#allocation5 + $0x58] sm:$0xf0]  ;;  %v8151_v24 = vpop.f32.mrf.mxu2  ;;  %v8155_v36 = vld [vmem:[#allocation7] sm:$0xff] }
 0x12e   :  { %2369 = vmatpush.bf16.msra.mxu2 %v5549_v48  ;;  %2383 = vmatpush.bf16.msra.mxu3 %v5933_v56  ;;  %v7334_v48 = vld [vmem:[#allocation5 + $0x32c] sm:$0xf]  ;;  %v5738_v56 = vld [vmem:[#allocation5 + $0x658] sm:$0xf0]  ;;  %v4973_v8 = vor.u32 %v7238_v46, %v4970_v47  ;;  %v6140_v46 = vld [vmem:[#allocation8 + $0x78] sm:$0xf] }
 0x12f   :  { %v5357_v9 = vor.u32 %v7334_v48, %v5354_v50  ;;  %v5741_v16 = vor.u32 %v7430_v51, %v5738_v56  ;;  %v7537_v47 = vld [vmem:[#allocation8 + $0x80] sm:$0xf0]  ;;  %v6236_v48 = vld [vmem:[#allocation8 + $0x138] sm:$0xf]  ;;  %v410_v60 = vperm.slane %v8155_v36, 0  ;;  %v411_v61 = vperm.slane %v8155_v36, 1 }
 0x130   :  { %2342 = vmatpush.bf16.msra.mxu0 %v5881_v1  ;;  %v5737_v1 = vor.u32 %v7436_v43, %v5736_v42  ;;  %v8153_v25 = vpop.f32.mrf.mxu3  ;;  %v8157_v42 = vpop.f32.mrf.mxu0  ;;  %v7561_v50 = vld [vmem:[#allocation8 + $0x140] sm:$0xf0]  ;;  %v6332_v51 = vld [vmem:[#allocation8 + $0x1f8] sm:$0xf] }
 0x131   :  { %2356 = vmatpush.bf16.msra.mxu1 %v5117_v4  ;;  %v7567_v4 = vld [vmem:[#allocation8 + $0x170] sm:$0xf0]  ;;  %v8159_v43 = vpop.f32.mrf.mxu1  ;;  %v7585_v56 = vld [vmem:[#allocation8 + $0x200] sm:$0xf0] }
 0x132   :  { %2370 = vmatpush.bf16.msra.mxu2 %v5501_v6  ;;  %2384 = vmatpush.bf16.msra.mxu3 %v5885_v10  ;;  %v6356_v6 = vld [vmem:[#allocation8 + $0x228] sm:$0xf]  ;;  %v6261_v18 = vor.u32 %v7567_v4, %v6260_v62  ;;  %v6428_v62 = vld [vmem:[#allocation8 + $0x2b8] sm:$0xf]  ;;  %v6141_v4 = vor.u32 %v7537_v47, %v6140_v46  ;;  %v7579_v46 = vld [vmem:[#allocation8 + $0x1d0] sm:$0xf0] }
 0x133   :  { %v6452_v10 = vld [vmem:[#allocation8 + $0x2e8] sm:$0xf]  ;;  %v6357_v19 = vor.u32 %v7591_v7, %v6356_v6  ;;  %v6237_v6 = vor.u32 %v7561_v50, %v6236_v48  ;;  %v6333_v7 = vor.u32 %v7585_v56, %v6332_v51  ;;  %v7603_v51 = vld [vmem:[#allocation8 + $0x290] sm:$0xf0] }
 0x134   :  { %2343 = vmatpush.bf16.msra.mxu0 %v5833_v21  ;;  %v6152_v21 = vld [vmem:[#allocation8 + $0x90] sm:$0xf]  ;;  %v6453_v26 = vor.u32 %v7615_v15, %v6452_v10  ;;  %v6224_v10 = vld [vmem:[#allocation8 + $0x120] sm:$0xf]  ;;  %v6404_v50 = vld [vmem:[#allocation8 + $0x288] sm:$0xf] }
 0x135   :  { %2357 = vmatpush.bf16.msra.mxu1 %v5069_v22  ;;  %v7540_v22 = vld [vmem:[#allocation8 + $0x98] sm:$0xf0]  ;;  %v8167_v15 = vpop.f32.mrf.mxu2 }
 0x136   :  { %2371 = vmatpush.bf16.msra.mxu2 %v5453_v23  ;;  %2385 = vmatpush.bf16.msra.mxu3 %v5837_v31  ;;  %v6248_v23 = vld [vmem:[#allocation8 + $0x150] sm:$0xf]  ;;  %v7564_v31 = vld [vmem:[#allocation8 + $0x158] sm:$0xf0] }
 0x138   :  { %2344 = vmatpush.bf16.msra.mxu0 %v5785_v41  ;;  %v6153_v41 = vor.u32 %v7540_v22, %v6152_v21  ;;  %v1942_v21 = vadd.f32 %v8109_v0, %v411_v61  ;;  %v6416_v22 = vld [vmem:[#allocation8 + $0x2a0] sm:$0xf]  ;;  %v7555_v0 = vld [vmem:[#allocation8 + $0x110] sm:$0xf0]  ;;  %v8179_v48 = vpop.f32.mrf.mxu0 }
 0x139   :  { %2358 = vmatpush.bf16.msra.mxu1 %v5021_v44  ;;  %v6249_v44 = vor.u32 %v7564_v31, %v6248_v23  ;;  %v7606_v23 = vld [vmem:[#allocation8 + $0x2a8] sm:$0xf0]  ;;  %v412_v31 = vperm.slane %v8155_v36, 2 }
 0x13a   :  { %2372 = vmatpush.bf16.msra.mxu2 %v5405_v45  ;;  %2386 = vmatpush.bf16.msra.mxu3 %v5789_v49  ;;  %v6345_v45 = vor.u32 %v7588_v33, %v6344_v32  ;;  %v6441_v49 = vor.u32 %v7612_v35, %v6440_v34  ;;  %v413_v32 = vperm.slane %v8155_v36, 3  ;;  %v1956_v56 = vadd.f32 %v8119_v52, %v1942_v21 }
 0x13b   :  { %v6405_v52 = vor.u32 %v7603_v51, %v6404_v50 }
 0x13c   :  { %2345 = vmatpush.bf16.msra.mxu0 %v5737_v1  ;;  %v7609_v1 = vld [vmem:[#allocation8 + $0x2c0] sm:$0xf0] }
 0x13d   :  { %2359 = vmatpush.bf16.msra.mxu1 %v4973_v8  ;;  %v6128_v8 = vld [vmem:[#allocation8 + $0x60] sm:$0xf] }
 0x13e   :  { %2373 = vmatpush.bf16.msra.mxu2 %v5357_v9  ;;  %2387 = vmatpush.bf16.msra.mxu3 %v5741_v16  ;;  %v7534_v9 = vld [vmem:[#allocation8 + $0x68] sm:$0xf0]  ;;  %v6429_v16 = vor.u32 %v7609_v1, %v6428_v62  ;;  %v1986_v1 = vadd.f32 %v8135_v54, %v412_v31 }
 0x13f   :  { %2346 = vmatmul.bf16.vlgmr.msra.gmra.mxu0 %v8076_v20  ;;  %v6129_v33 = vor.u32 %v7534_v9, %v6128_v8  ;;  %v2026_v8 = vadd.f32 %v8141_v3, %v413_v32  ;;  %v2028_v9 = vadd.f32 %v8149_v59, %v413_v32  ;;  %v7549_v32 = vld [vmem:[#allocation8 + $0xe0] sm:$0xf0] }
 0x140   :  { %4358 = vmatpush.bf16.msrb.mxu0 %v6165_v17  ;;  %2360 = vmatmul.bf16.vlgmr.msra.gmra.mxu1 %v8069_v57  ;;  %v8169_v57 = vpop.f32.mrf.mxu3  ;;  %v6320_v17 = vld [vmem:[#allocation8 + $0x1e0] sm:$0xf]  ;;  %v2000_v21 = vadd.f32 %v8137_v55, %v1986_v1 }
 0x141   :  { %4372 = vmatpush.bf16.msrb.mxu1 %v6261_v18  ;;  %2374 = vmatmul.bf16.vlgmr.msra.gmra.mxu2 %v8072_v5  ;;  %v7558_v5 = vld [vmem:[#allocation8 + $0x128] sm:$0xf0] }
 0x142   :  { %4386 = vmatpush.bf16.msrb.mxu2 %v6357_v19  ;;  %4400 = vmatpush.bf16.msrb.mxu3 %v6453_v26  ;;  %v7582_v18 = vld [vmem:[#allocation8 + $0x1e8] sm:$0xf0]  ;;  %v1902_v19 = vadd.f32 %v8111_v12, %v410_v60  ;;  %v1944_v26 = vadd.f32 %v8117_v40, %v411_v61  ;;  %v6225_v34 = vor.u32 %v7558_v5, %v6224_v10  ;;  %v6296_v10 = vld [vmem:[#allocation8 + $0x1b0] sm:$0xf] }
 0x143   :  { %2388 = vmatmul.bf16.vlgmr.msra.gmra.mxu3 %v8076_v20  ;;  %v1900_v20 = vadd.f32 %v8103_v37, %v410_v60  ;;  %v6321_v35 = vor.u32 %v7582_v18, %v6320_v17  ;;  %v7531_v37 = vld [vmem:[#allocation8 + $0x50] sm:$0xf0]  ;;  %v6417_v12 = vor.u32 %v7606_v23, %v6416_v22  ;;  %v1984_v61 = vadd.f32 %v8123_v11, %v412_v31  ;;  %v7576_v11 = vld [vmem:[#allocation8 + $0x1b8] sm:$0xf0]  ;;  %v6392_v5 = vld [vmem:[#allocation8 + $0x270] sm:$0xf] }
 0x144   :  { %4359 = vmatpush.bf16.msrb.mxu0 %v6153_v41  ;;  %v6116_v41 = vld [vmem:[#allocation8 + $0x48] sm:$0xf]  ;;  %v1916_v47 = vadd.f32 %v8113_v13, %v1902_v19  ;;  %v1958_v60 = vadd.f32 %v8131_v29, %v1944_v26  ;;  %v7552_v29 = vld [vmem:[#allocation8 + $0xf8] sm:$0xf0]  ;;  %v8196_v18 = vadd.f32 %v8121_v53, %v1956_v56  ;;  %v6297_v22 = vor.u32 %v7576_v11, %v6296_v10  ;;  %v6092_v23 = vld [vmem:[#allocation8 + $0x18] sm:$0xf] }
 0x145   :  { %4373 = vmatpush.bf16.msrb.mxu1 %v6249_v44  ;;  %v6212_v44 = vld [vmem:[#allocation8 + $0x108] sm:$0xf]  ;;  %v1914_v40 = vadd.f32 %v8105_v38, %v1900_v20  ;;  %v6117_v62 = vor.u32 %v7531_v37, %v6116_v41  ;;  %v7600_v17 = vld [vmem:[#allocation8 + $0x278] sm:$0xf0]  ;;  %v1998_v59 = vadd.f32 %v8125_v14, %v1984_v61  ;;  %v8202_v20 = vpop.f32.mrf.mxu2  ;;  %v7525_v53 = vld [vmem:[#allocation8 + $0x20] sm:$0xf0]  ;;  %v2042_v31 = vadd.f32 %v8151_v24, %v2028_v9 }
 0x146   :  { %4387 = vmatpush.bf16.msrb.mxu2 %v6345_v45  ;;  %4401 = vmatpush.bf16.msrb.mxu3 %v6441_v49  ;;  %v6308_v45 = vld [vmem:[#allocation8 + $0x1c8] sm:$0xf]  ;;  %v8181_v49 = vpop.f32.mrf.mxu1  ;;  %v6213_v38 = vor.u32 %v7555_v0, %v6212_v44  ;;  %v8193_v54 = vadd.f32 %v8115_v39, %v1916_v47  ;;  %v8199_v3 = vadd.f32 %v8133_v30, %v1958_v60  ;;  %v6188_v26 = vld [vmem:[#allocation8 + $0xd8] sm:$0xf]  ;;  %v7597_v37 = vld [vmem:[#allocation8 + $0x260] sm:$0xf0] }
 0x147   :  { %v6309_v13 = vor.u32 %v7579_v46, %v6308_v45  ;;  %v2040_v30 = vadd.f32 %v8143_v27, %v2026_v8  ;;  %v6393_v14 = vor.u32 %v7600_v17, %v6392_v5  ;;  %v6380_v41 = vld [vmem:[#allocation8 + $0x258] sm:$0xf]  ;;  %v2395_v44 = vmax.f32 %v8196_v18, 0.0  ;;  %v6080_v24 = vld [vmem:[#allocation8] sm:$0xf] }
 0x148   :  { %4360 = vmatpush.bf16.msrb.mxu0 %v6141_v4  ;;  %v6104_v4 = vld [vmem:[#allocation8 + $0x30] sm:$0xf]  ;;  %v8204_v19 = vpop.f32.mrf.mxu3  ;;  %v2406_v55 = vmax.f32 %v8193_v54, 0.0  ;;  %v2012_v0 = vadd.f32 %v8139_v2, %v1998_v59  ;;  %v6093_v27 = vor.u32 %v7525_v53, %v6092_v23  ;;  %v7522_v45 = vld [vmem:[#allocation8 + $0x8] sm:$0xf0]  ;;  %v2014_v46 = vadd.f32 %v8147_v58, %v2000_v21 }
 0x149   :  { %4374 = vmatpush.bf16.msrb.mxu1 %v6237_v6  ;;  %v7528_v6 = vld [vmem:[#allocation8 + $0x38] sm:$0xf0]  ;;  %v6189_v50 = vor.u32 %v7549_v32, %v6188_v26  ;;  %v6176_v56 = vld [vmem:[#allocation8 + $0xc0] sm:$0xf]  ;;  %v7546_v60 = vld [vmem:[#allocation8 + $0xc8] sm:$0xf0]  ;;  %v2056_v2 = vadd.f32 %v8153_v25, %v2042_v31  ;;  %v6381_v1 = vor.u32 %v7597_v37, %v6380_v41  ;;  %v6081_v8 = vor.u32 %v7522_v45, %v6080_v24 }
 0x14a   :  { %4388 = vmatpush.bf16.msrb.mxu2 %v6333_v7  ;;  %4402 = vmatpush.bf16.msrb.mxu3 %v6429_v16  ;;  %v6200_v7 = vld [vmem:[#allocation8 + $0xf0] sm:$0xf]  ;;  %v8190_v16 = vadd.f32 %v8107_v63, %v1914_v40  ;;  %v6105_v63 = vor.u32 %v7528_v6, %v6104_v4  ;;  %v8215_v40 = vpop.f32.mrf.mxu0  ;;  %v6272_v61 = vld [vmem:[#allocation8 + $0x180] sm:$0xf]  ;;  %v7594_v58 = vld [vmem:[#allocation8 + $0x248] sm:$0xf0]  ;;  %v6177_v25 = vor.u32 %v7546_v60, %v6176_v56 }
 0x14b   :  { %v6201_v39 = vor.u32 %v7552_v29, %v6200_v7  ;;  %v6548_v4 = vld [vmem:[#allocation8 + $0x3a8] sm:$0xf]  ;;  %v7639_v6 = vld [vmem:[#allocation8 + $0x3b0] sm:$0xf0]  ;;  %v2409_v17 = vmax.f32 %v2056_v2, 0.0  ;;  %v414_v60 = vperm.slane %v8155_v36, 4 }
 0x14c   :  { %4361 = vmatpush.bf16.msrb.mxu0 %v6129_v33  ;;  %v6284_v33 = vld [vmem:[#allocation8 + $0x198] sm:$0xf]  ;;  %v6644_v7 = vld [vmem:[#allocation8 + $0x468] sm:$0xf]  ;;  %v7663_v9 = vld [vmem:[#allocation8 + $0x470] sm:$0xf0] }
 0x14d   :  { %4375 = vmatpush.bf16.msrb.mxu1 %v6225_v34  ;;  %v7573_v34 = vld [vmem:[#allocation8 + $0x1a0] sm:$0xf0]  ;;  %v7687_v29 = vld [vmem:[#allocation8 + $0x530] sm:$0xf0]  ;;  %v8221_v10 = vpop.f32.mrf.mxu2  ;;  %v6836_v59 = vld [vmem:[#allocation8 + $0x5e8] sm:$0xf]  ;;  %v6645_v21 = vor.u32 %v7663_v9, %v6644_v7 }
 0x14e   :  { %4389 = vmatpush.bf16.msrb.mxu2 %v6321_v35  ;;  %4403 = vmatpush.bf16.msrb.mxu3 %v6417_v12  ;;  %v2394_v35 = vmax.f32 %v8190_v16, 0.0  ;;  %v2407_v12 = vmax.f32 %v8199_v3, 0.0  ;;  %v8217_v47 = vpop.f32.mrf.mxu1  ;;  %v6285_v51 = vor.u32 %v7573_v34, %v6284_v33  ;;  %v2408_v16 = vmax.f32 %v2014_v46, 0.0  ;;  %v7636_v23 = vld [vmem:[#allocation8 + $0x398] sm:$0xf0] }
 0x14f   :  { %v6549_v3 = vor.u32 %v7639_v6, %v6548_v4  ;;  %v6632_v53 = vld [vmem:[#allocation8 + $0x450] sm:$0xf]  ;;  %v7660_v26 = vld [vmem:[#allocation8 + $0x458] sm:$0xf0]  ;;  %v6620_v46 = vld [vmem:[#allocation8 + $0x438] sm:$0xf] }
 0x150   :  { %4362 = vmatpush.bf16.msrb.mxu0 %v6117_v62  ;;  %v2054_v62 = vadd.f32 %v8145_v28, %v2040_v30  ;;  %v8223_v11 = vpop.f32.mrf.mxu3  ;;  %v2396_v28 = vmax.f32 %v2012_v0, 0.0  ;;  %v6728_v30 = vld [vmem:[#allocation8 + $0x510] sm:$0xf]  ;;  %v7684_v31 = vld [vmem:[#allocation8 + $0x518] sm:$0xf0]  ;;  %v8227_v32 = vpack.c.bf16 %v2407_v12, %v2395_v44 }
 0x151   :  { %4376 = vmatpush.bf16.msrb.mxu1 %v6213_v38  ;;  %v7570_v38 = vld [vmem:[#allocation8 + $0x188] sm:$0xf0]  ;;  %v6824_v37 = vld [vmem:[#allocation8 + $0x5d0] sm:$0xf]  ;;  %v7708_v0 = vld [vmem:[#allocation8 + $0x5d8] sm:$0xf0] }
 0x152   :  { %4390 = vmatpush.bf16.msrb.mxu2 %v6309_v13  ;;  %4404 = vmatpush.bf16.msrb.mxu3 %v6405_v52  ;;  %v6368_v13 = vld [vmem:[#allocation8 + $0x240] sm:$0xf]  ;;  %v6740_v52 = vld [vmem:[#allocation8 + $0x528] sm:$0xf]  ;;  %v6273_v54 = vor.u32 %v7570_v38, %v6272_v61  ;;  %v2397_v5 = vmax.f32 %v2054_v62, 0.0  ;;  %v8229_v33 = vpack.c.bf16 %v2408_v16, %v2396_v28  ;;  %v8233_v24 = vpop.f32.mrf.mxu0  ;;  %v6825_v61 = vor.u32 %v7708_v0, %v6824_v37 }
 0x153   :  { %v6369_v18 = vor.u32 %v7594_v58, %v6368_v13  ;;  %v6524_v44 = vld [vmem:[#allocation8 + $0x378] sm:$0xf]  ;;  %v7633_v12 = vld [vmem:[#allocation8 + $0x380] sm:$0xf0]  ;;  %v6512_v6 = vld [vmem:[#allocation8 + $0x360] sm:$0xf]  ;;  %v2068_v28 = vadd.f32 %v8157_v42, %v414_v60  ;;  %v2070_v16 = vadd.f32 %v8179_v48, %v414_v60 }
 0x154   :  { %4363 = vmatpush.bf16.msrb.mxu0 %v6105_v63  ;;  %v7711_v63 = vld [vmem:[#allocation8 + $0x5f0] sm:$0xf0]  ;;  %v7681_v56 = vld [vmem:[#allocation8 + $0x500] sm:$0xf0]  ;;  %v6525_v62 = vor.u32 %v7633_v12, %v6524_v44  ;;  %v6812_v38 = vld [vmem:[#allocation8 + $0x5b8] sm:$0xf] }
 0x155   :  { %4377 = vmatpush.bf16.msrb.mxu1 %v6201_v39  ;;  %v6741_v39 = vor.u32 %v7687_v29, %v6740_v52  ;;  %v6837_v34 = vor.u32 %v7711_v63, %v6836_v59  ;;  %v2153_v2 = vpop.f32.mrf.mxu2  ;;  %v7705_v13 = vld [vmem:[#allocation8 + $0x5c0] sm:$0xf0]  ;;  %v7630_v7 = vld [vmem:[#allocation8 + $0x368] sm:$0xf0]  ;;  %v6704_v52 = vld [vmem:[#allocation8 + $0x4e0] sm:$0xf] }
 0x156   :  { %4391 = vmatpush.bf16.msrb.mxu2 %v6297_v22  ;;  %4405 = vmatpush.bf16.msrb.mxu3 %v6393_v14  ;;  %v6536_v22 = vld [vmem:[#allocation8 + $0x390] sm:$0xf]  ;;  %v8225_v14 = vpack.c.bf16 %v2406_v55, %v2394_v35  ;;  %v8235_v45 = vpop.f32.mrf.mxu1  ;;  %v6633_v35 = vor.u32 %v7660_v26, %v6632_v53  ;;  %v6729_v55 = vor.u32 %v7684_v31, %v6728_v30  ;;  %v7654_v9 = vld [vmem:[#allocation8 + $0x428] sm:$0xf0]  ;;  %v6500_v42 = vld [vmem:[#allocation8 + $0x348] sm:$0xf] }
 0x157   :  { %v6537_v41 = vor.u32 %v7636_v23, %v6536_v22  ;;  %v7678_v29 = vld [vmem:[#allocation8 + $0x4e8] sm:$0xf0]  ;;  %v7627_v22 = vld [vmem:[#allocation8 + $0x350] sm:$0xf0]  ;;  %v6596_v48 = vld [vmem:[#allocation8 + $0x408] sm:$0xf]  ;;  %v2082_v30 = vadd.f32 %v8159_v43, %v2068_v28  ;;  %v2084_v31 = vadd.f32 %v8181_v49, %v2070_v16 }
 0x158   :  { %4364 = vmatpush.bf16.msrb.mxu0 %v6093_v27  ;;  %v8231_v27 = vpack.c.bf16 %v2409_v17, %v2397_v5  ;;  %v6813_v5 = vor.u32 %v7705_v13, %v6812_v38  ;;  %v6513_v17 = vor.u32 %v7630_v7, %v6512_v6  ;;  %v7651_v23 = vld [vmem:[#allocation8 + $0x410] sm:$0xf0]  ;;  %v6692_v53 = vld [vmem:[#allocation8 + $0x4c8] sm:$0xf]  ;;  %v6501_v0 = vor.u32 %v7627_v22, %v6500_v42  ;;  %v7624_v43 = vld [vmem:[#allocation8 + $0x338] sm:$0xf0] }
 0x159   :  { %4378 = vmatpush.bf16.msrb.mxu1 %v6189_v50  ;;  %v7657_v50 = vld [vmem:[#allocation8 + $0x440] sm:$0xf0]  ;;  %v7675_v26 = vld [vmem:[#allocation8 + $0x4d0] sm:$0xf0]  ;;  %v6597_v12 = vor.u32 %v7651_v23, %v6596_v48  ;;  %v8257_v38 = vadd.f32 %v8167_v15, %v2082_v30  ;;  %v8261_v13 = vadd.f32 %v8202_v20, %v2084_v31 }
 0x15a   :  { %4392 = vmatpush.bf16.msrb.mxu2 %v6285_v51  ;;  %4406 = vmatpush.bf16.msrb.mxu3 %v6381_v1  ;;  %v6716_v51 = vld [vmem:[#allocation8 + $0x4f8] sm:$0xf]  ;;  %v8242_v1 = vpop.f32.mrf.mxu3  ;;  %v6621_v58 = vor.u32 %v7657_v50, %v6620_v46  ;;  %v6693_v46 = vor.u32 %v7675_v26, %v6692_v53  ;;  %v6488_v50 = vld [vmem:[#allocation8 + $0x330] sm:$0xf]  ;;  %v7645_v16 = vld [vmem:[#allocation8 + $0x3e0] sm:$0xf0] }
 0x15b   :  { %v6717_v4 = vor.u32 %v7681_v56, %v6716_v51  ;;  %v6584_v51 = vld [vmem:[#allocation8 + $0x3f0] sm:$0xf]  ;;  %v6489_v6 = vor.u32 %v7624_v43, %v6488_v50  ;;  %v7693_v42 = vld [vmem:[#allocation8 + $0x560] sm:$0xf0]  ;;  %v6560_v53 = vld [vmem:[#allocation8 + $0x3c0] sm:$0xf] }
 0x15c   :  { %4365 = vmatpush.bf16.msrb.mxu0 %v6081_v8  ;;  %v6608_v8 = vld [vmem:[#allocation8 + $0x420] sm:$0xf]  ;;  %v8248_v59 = vpop.f32.mrf.mxu0  ;;  %v7642_v26 = vld [vmem:[#allocation8 + $0x3c8] sm:$0xf0] }
 0x15d   :  { %4379 = vmatpush.bf16.msrb.mxu1 %v6177_v25  ;;  %v415_v25 = vperm.slane %v8155_v36, 5  ;;  %v6609_v63 = vor.u32 %v7654_v9, %v6608_v8 }
 0x15e   :  { %4393 = vmatpush.bf16.msrb.mxu2 %v6273_v54  ;;  %4407 = vmatpush.bf16.msrb.mxu3 %v6369_v18  ;;  %v416_v54 = vperm.slane %v8155_v36, 6  ;;  %v6800_v18 = vld [vmem:[#allocation8 + $0x5a0] sm:$0xf] }
 0x15f   :  { %4366 = vmatmul.bf16.vlgmr.msrb.gmra.mxu0 %v8225_v14  ;;  %v2112_v44 = vadd.f32 %v8204_v19, %v415_v25 }
 0x160   :  { %4414 = vmatpush.bf16.msra.mxu0 %v6549_v3  ;;  %4380 = vmatmul.bf16.vlgmr.msrb.gmra.mxu1 %v8227_v32  ;;  %v7702_v3 = vld [vmem:[#allocation8 + $0x5a8] sm:$0xf0]  ;;  %v2152_v49 = vadd.f32 %v8221_v10, %v416_v54  ;;  %v6776_v10 = vld [vmem:[#allocation8 + $0x570] sm:$0xf] }
 0x161   :  { %4428 = vmatpush.bf16.msra.mxu1 %v6645_v21  ;;  %4394 = vmatmul.bf16.vlgmr.msrb.gmra.mxu2 %v8229_v33  ;;  %v6705_v21 = vor.u32 %v7678_v29, %v6704_v52  ;;  %v6801_v37 = vor.u32 %v7702_v3, %v6800_v18  ;;  %v2126_v7 = vadd.f32 %v8233_v24, %v2112_v44  ;;  %v6476_v52 = vld [vmem:[#allocation8 + $0x318] sm:$0xf]  ;;  %v7621_v29 = vld [vmem:[#allocation8 + $0x320] sm:$0xf0]  ;;  %v2410_v24 = vmax.f32 %v8261_v13, 0.0 }
 0x162   :  { %4442 = vmatpush.bf16.msra.mxu2 %v6741_v39  ;;  %4408 = vmatmul.bf16.vlgmr.msrb.gmra.mxu3 %v8231_v27  ;;  %v2193_v39 = vpop.f32.mrf.mxu1  ;;  %v2166_v20 = vadd.f32 %v8223_v11, %v2152_v49  ;;  %v6764_v11 = vld [vmem:[#allocation8 + $0x558] sm:$0xf]  ;;  %v7735_v44 = vld [vmem:[#allocation8 + $0x6b0] sm:$0xf0]  ;;  %v7124_v49 = vld [vmem:[#allocation8 + $0x828] sm:$0xf] }
 0x163   :  { %4456 = vmatpush.bf16.msra.mxu3 %v6837_v34  ;;  %v2110_v34 = vadd.f32 %v8169_v57, %v415_v25  ;;  %v2154_v57 = vadd.f32 %v2153_v2, %v416_v54  ;;  %v7696_v2 = vld [vmem:[#allocation8 + $0x578] sm:$0xf0]  ;;  %v6668_v25 = vld [vmem:[#allocation8 + $0x498] sm:$0xf]  ;;  %v7669_v54 = vld [vmem:[#allocation8 + $0x4a0] sm:$0xf0]  ;;  %v2140_v22 = vadd.f32 %v8235_v45, %v2126_v7  ;;  %v6765_v43 = vor.u32 %v7693_v42, %v6764_v11 }
 0x164   :  { %4415 = vmatpush.bf16.msra.mxu0 %v6537_v41  ;;  %v417_v41 = vperm.slane %v8155_v36, 7  ;;  %v2207_v56 = vpop.f32.mrf.mxu2  ;;  %v6680_v36 = vld [vmem:[#allocation8 + $0x4b0] sm:$0xf]  ;;  %v2181_v18 = vpop.f32.mrf.mxu0  ;;  %v6669_v23 = vor.u32 %v7669_v54, %v6668_v25  ;;  %v2180_v30 = vadd.f32 %v8248_v59, %v2166_v20  ;;  %v7756_v7 = vld [vmem:[#allocation8 + $0x758] sm:$0xf0] }
 0x165   :  { %4429 = vmatpush.bf16.msra.mxu1 %v6633_v35  ;;  %v6788_v35 = vld [vmem:[#allocation8 + $0x588] sm:$0xf]  ;;  %v2124_v19 = vadd.f32 %v8215_v40, %v2110_v34  ;;  %v6572_v40 = vld [vmem:[#allocation8 + $0x3d8] sm:$0xf]  ;;  %v2168_v28 = vadd.f32 %v8242_v1, %v2154_v57  ;;  %v6464_v1 = vld [vmem:[#allocation8 + $0x300] sm:$0xf] }
 0x166   :  { %4443 = vmatpush.bf16.msra.mxu2 %v6729_v55  ;;  %v7699_v55 = vld [vmem:[#allocation8 + $0x590] sm:$0xf0]  ;;  %v2221_v60 = vpop.f32.mrf.mxu3  ;;  %v6573_v48 = vor.u32 %v7645_v16, %v6572_v40  ;;  %v2411_v59 = vmax.f32 %v2140_v22, 0.0  ;;  %v7777_v11 = vld [vmem:[#allocation8 + $0x800] sm:$0xf0] }
 0x167   :  { %4457 = vmatpush.bf16.msra.mxu3 %v6825_v61  ;;  %v7648_v61 = vld [vmem:[#allocation8 + $0x3f8] sm:$0xf0]  ;;  %v2182_v31 = vadd.f32 %v2181_v18, %v2168_v28  ;;  %v7783_v57 = vld [vmem:[#allocation8 + $0x830] sm:$0xf0]  ;;  %v7729_v18 = vld [vmem:[#allocation8 + $0x680] sm:$0xf0] }
 0x168   :  { %4416 = vmatpush.bf16.msra.mxu0 %v6525_v62  ;;  %v7672_v62 = vld [vmem:[#allocation8 + $0x4b8] sm:$0xf0]  ;;  %v6585_v8 = vor.u32 %v7648_v61, %v6584_v51  ;;  %v6561_v61 = vor.u32 %v7642_v26, %v6560_v53  ;;  %v7208_v53 = vld [vmem:[#allocation8 + $0x8d0] sm:$0xf]  ;;  %v6992_v26 = vld [vmem:[#allocation8 + $0x720] sm:$0xf] }
 0x169   :  { %4430 = vmatpush.bf16.msra.mxu1 %v6621_v58  ;;  %v2194_v58 = vadd.f32 %v2193_v39, %v417_v41  ;;  %v6681_v9 = vor.u32 %v7672_v62, %v6680_v36  ;;  %v6477_v39 = vor.u32 %v7621_v29, %v6476_v52  ;;  %v6752_v62 = vld [vmem:[#allocation8 + $0x540] sm:$0xf]  ;;  %v2412_v13 = vmax.f32 %v2182_v31, 0.0  ;;  %v7112_v52 = vld [vmem:[#allocation8 + $0x810] sm:$0xf] }
 0x16a   :  { %4444 = vmatpush.bf16.msra.mxu2 %v6717_v4  ;;  %v6789_v4 = vor.u32 %v7699_v55, %v6788_v35  ;;  %v2195_v15 = vpop.f32.mrf.mxu1  ;;  %v6932_v35 = vld [vmem:[#allocation8 + $0x6a8] sm:$0xf]  ;;  %v7780_v29 = vld [vmem:[#allocation8 + $0x818] sm:$0xf0] }
 0x16b   :  { %4458 = vmatpush.bf16.msra.mxu3 %v6813_v5  ;;  %v2398_v5 = vmax.f32 %v8257_v38, 0.0  ;;  %v2196_v3 = vadd.f32 %v2195_v15, %v417_v41  ;;  %v7113_v38 = vor.u32 %v7780_v29, %v7112_v52  ;;  %v7768_v52 = vld [vmem:[#allocation8 + $0x7b8] sm:$0xf0] }
 0x16c   :  { %4417 = vmatpush.bf16.msra.mxu0 %v6513_v17  ;;  %v8268_v17 = vadd.f32 %v8217_v47, %v2124_v19  ;;  %v7618_v47 = vld [vmem:[#allocation8 + $0x308] sm:$0xf0]  ;;  %v2209_v34 = vpop.f32.mrf.mxu2  ;;  %v2400_v19 = vmax.f32 %v2180_v30, 0.0 }
 0x16d   :  { %4431 = vmatpush.bf16.msra.mxu1 %v6609_v63  ;;  %v2208_v63 = vadd.f32 %v2207_v56, %v2194_v58  ;;  %v2210_v55 = vadd.f32 %v2209_v34, %v2196_v3  ;;  %v6465_v51 = vor.u32 %v7618_v47, %v6464_v1  ;;  %v6933_v58 = vor.u32 %v7735_v44, %v6932_v35  ;;  %v7004_v3 = vld [vmem:[#allocation8 + $0x738] sm:$0xf]  ;;  %v8287_v1 = vld [vmem:[#allocation7 + $0x8] sm:$0xf]  ;;  %v7726_v47 = vld [vmem:[#allocation8 + $0x668] sm:$0xf0] }
 0x16e   :  { %4445 = vmatpush.bf16.msra.mxu2 %v6705_v21  ;;  %v6777_v21 = vor.u32 %v7696_v2, %v6776_v10  ;;  %v2223_v41 = vpop.f32.mrf.mxu3  ;;  %v2399_v45 = vmax.f32 %v8268_v17, 0.0  ;;  %v6920_v10 = vld [vmem:[#allocation8 + $0x690] sm:$0xf]  ;;  %v8276_v40 = vpack.c.bf16 %v2410_v24, %v2398_v5  ;;  %v8280_v16 = vpack.c.bf16 %v2412_v13, %v2400_v19  ;;  %v6908_v17 = vld [vmem:[#allocation8 + $0x678] sm:$0xf] }
 0x16f   :  { %4459 = vmatpush.bf16.msra.mxu3 %v6801_v37  ;;  %v6656_v37 = vld [vmem:[#allocation8 + $0x480] sm:$0xf]  ;;  %v2222_v50 = vadd.f32 %v2221_v60, %v2208_v63  ;;  %v2224_v56 = vadd.f32 %v2223_v41, %v2210_v55  ;;  %v7732_v60 = vld [vmem:[#allocation8 + $0x698] sm:$0xf0]  ;;  %v7016_v2 = vld [vmem:[#allocation8 + $0x750] sm:$0xf]  ;;  %v6909_v22 = vor.u32 %v7729_v18, %v6908_v17 }
 0x170   :  { %4418 = vmatpush.bf16.msra.mxu0 %v6501_v0  ;;  %v7666_v0 = vld [vmem:[#allocation8 + $0x488] sm:$0xf0]  ;;  %v8278_v20 = vpack.c.bf16 %v2411_v59, %v2399_v45  ;;  %v6921_v25 = vor.u32 %v7732_v60, %v6920_v10  ;;  %v7017_v54 = vor.u32 %v7756_v7, %v7016_v2  ;;  %v7753_v63 = vld [vmem:[#allocation8 + $0x740] sm:$0xf0]  ;;  %v7220_v5 = vld [vmem:[#allocation8 + $0x8e8] sm:$0xf] }
 0x171   :  { %4432 = vmatpush.bf16.msra.mxu1 %v6597_v12  ;;  %v7028_v12 = vld [vmem:[#allocation8 + $0x768] sm:$0xf]  ;;  %v6657_v36 = vor.u32 %v7666_v0, %v6656_v37  ;;  %v2413_v15 = vmax.f32 %v2224_v56, 0.0  ;;  %v7807_v24 = vld [vmem:[#allocation8 + $0x8f0] sm:$0xf0]  ;;  %v418_v41 = vperm.slane %v8287_v1, 0 }
 0x172   :  { %4446 = vmatpush.bf16.msra.mxu2 %v6693_v46  ;;  %v7759_v46 = vld [vmem:[#allocation8 + $0x770] sm:$0xf0]  ;;  %v7221_v42 = vor.u32 %v7807_v24, %v7220_v5  ;;  %v7750_v30 = vld [vmem:[#allocation8 + $0x728] sm:$0xf0]  ;;  %v7804_v34 = vld [vmem:[#allocation8 + $0x8d8] sm:$0xf0] }
 0x173   :  { %4460 = vmatpush.bf16.msra.mxu3 %v6789_v4  ;;  %v7029_v4 = vor.u32 %v7759_v46, %v7028_v12  ;;  %v7088_v37 = vld [vmem:[#allocation8 + $0x7e0] sm:$0xf]  ;;  %v7774_v0 = vld [vmem:[#allocation8 + $0x7e8] sm:$0xf0]  ;;  %v7209_v35 = vor.u32 %v7804_v34, %v7208_v53  ;;  %v6993_v44 = vor.u32 %v7750_v30, %v6992_v26  ;;  %v6884_v45 = vld [vmem:[#allocation8 + $0x648] sm:$0xf] }
 0x174   :  { %4419 = vmatpush.bf16.msra.mxu0 %v6489_v6  ;;  %v7690_v6 = vld [vmem:[#allocation8 + $0x548] sm:$0xf0]  ;;  %v7801_v59 = vld [vmem:[#allocation8 + $0x8c0] sm:$0xf0]  ;;  %v6968_v60 = vld [vmem:[#allocation8 + $0x6f0] sm:$0xf] }
 0x175   :  { %4433 = vmatpush.bf16.msra.mxu1 %v6585_v8  ;;  %v7125_v8 = vor.u32 %v7783_v57, %v7124_v49  ;;  %v6753_v28 = vor.u32 %v7690_v6, %v6752_v62  ;;  %v7747_v49 = vld [vmem:[#allocation8 + $0x710] sm:$0xf0]  ;;  %v7089_v57 = vor.u32 %v7774_v0, %v7088_v37  ;;  %v7184_v6 = vld [vmem:[#allocation8 + $0x8a0] sm:$0xf]  ;;  %v7744_v2 = vld [vmem:[#allocation8 + $0x6f8] sm:$0xf0] }
 0x176   :  { %4447 = vmatpush.bf16.msra.mxu2 %v6681_v9  ;;  %v2401_v9 = vmax.f32 %v2222_v50, 0.0  ;;  %v7723_v50 = vld [vmem:[#allocation8 + $0x650] sm:$0xf0]  ;;  %v6860_v18 = vld [vmem:[#allocation8 + $0x618] sm:$0xf] }
 0x177   :  { %4461 = vmatpush.bf16.msra.mxu3 %v6777_v21  ;;  %v6885_v19 = vor.u32 %v7723_v50, %v6884_v45  ;;  %v7741_v5 = vld [vmem:[#allocation8 + $0x6e0] sm:$0xf0]  ;;  %v6848_v53 = vld [vmem:[#allocation8 + $0x600] sm:$0xf]  ;;  %v7714_v26 = vld [vmem:[#allocation8 + $0x608] sm:$0xf0] }
 0x178   :  { %4420 = vmatpush.bf16.msra.mxu0 %v6477_v39  ;;  %v8283_v21 = vpack.c.bf16 %v2413_v15, %v2401_v9  ;;  %v7100_v39 = vld [vmem:[#allocation8 + $0x7f8] sm:$0xf]  ;;  %v7064_v15 = vld [vmem:[#allocation8 + $0x7b0] sm:$0xf]  ;;  %v6944_v30 = vld [vmem:[#allocation8 + $0x6c0] sm:$0xf] }
 0x179   :  { %4434 = vmatpush.bf16.msra.mxu1 %v6573_v48  ;;  %v7005_v48 = vor.u32 %v7753_v63, %v7004_v3  ;;  %v7101_v31 = vor.u32 %v7777_v11, %v7100_v39  ;;  %v7717_v3 = vld [vmem:[#allocation8 + $0x620] sm:$0xf0]  ;;  %v6956_v63 = vld [vmem:[#allocation8 + $0x6d8] sm:$0xf]  ;;  %v7065_v24 = vor.u32 %v7768_v52, %v7064_v15  ;;  %v7172_v39 = vld [vmem:[#allocation8 + $0x888] sm:$0xf] }
 0x17a   :  { %4448 = vmatpush.bf16.msra.mxu2 %v6669_v23  ;;  %v6896_v23 = vld [vmem:[#allocation8 + $0x660] sm:$0xf]  ;;  %v7795_v11 = vld [vmem:[#allocation8 + $0x890] sm:$0xf0]  ;;  %v6957_v34 = vor.u32 %v7741_v5, %v6956_v63  ;;  %v7738_v37 = vld [vmem:[#allocation8 + $0x6c8] sm:$0xf0] }
 0x17b   :  { %4462 = vmatpush.bf16.msra.mxu3 %v6765_v43  ;;  %v6897_v55 = vor.u32 %v7726_v47, %v6896_v23  ;;  %v7196_v43 = vld [vmem:[#allocation8 + $0x8b8] sm:$0xf]  ;;  %v7173_v23 = vor.u32 %v7795_v11, %v7172_v39  ;;  %v7587_v52 = vld [vmem:[#allocation8 + $0x214] sm:$0xf]  ;;  %v6142_v63 = vld [vmem:[#allocation8 + $0x84] sm:$0xf0] }
 0x17c   :  { %4421 = vmatpush.bf16.msra.mxu0 %v6465_v51  ;;  %v2235_v12 = vpop.f32.mrf.mxu0  ;;  %v6980_v51 = vld [vmem:[#allocation8 + $0x708] sm:$0xf]  ;;  %v7197_v62 = vor.u32 %v7801_v59, %v7196_v43  ;;  %v6166_v0 = vld [vmem:[#allocation8 + $0xb4] sm:$0xf0]  ;;  %v7590_v59 = vld [vmem:[#allocation8 + $0x22c] sm:$0xf] }
 0x17d   :  { %4435 = vmatpush.bf16.msra.mxu1 %v6561_v61  ;;  %v2249_v46 = vpop.f32.mrf.mxu1  ;;  %v2236_v56 = vadd.f32 %v2235_v12, %v418_v41  ;;  %v7076_v61 = vld [vmem:[#allocation8 + $0x7c8] sm:$0xf]  ;;  %v6981_v13 = vor.u32 %v7747_v49, %v6980_v51  ;;  %v7160_v12 = vld [vmem:[#allocation8 + $0x870] sm:$0xf]  ;;  %v6262_v43 = vld [vmem:[#allocation8 + $0x174] sm:$0xf0] }
 0x17e   :  { %4449 = vmatpush.bf16.msra.mxu2 %v6657_v36  ;;  %v7771_v36 = vld [vmem:[#allocation8 + $0x7d0] sm:$0xf0]  ;;  %v7040_v51 = vld [vmem:[#allocation8 + $0x780] sm:$0xf]  ;;  %v6238_v5 = vld [vmem:[#allocation8 + $0x144] sm:$0xf0] }
 0x17f   :  { %4422 = vmatmul.bf16.vlgmr.msra.gmra.mxu0 %v8276_v40  ;;  %4463 = vmatpush.bf16.msra.mxu3 %v6753_v28  ;;  %v7077_v7 = vor.u32 %v7771_v36, %v7076_v61  ;;  %v2250_v9 = vadd.f32 %v2249_v46, %v2236_v56  ;;  %v7792_v46 = vld [vmem:[#allocation8 + $0x878] sm:$0xf0]  ;;  %v6358_v56 = vld [vmem:[#allocation8 + $0x234] sm:$0xf0]  ;;  %v6849_v36 = vor.u32 %v7714_v26, %v6848_v53  ;;  %v7614_v39 = vld [vmem:[#allocation8 + $0x2ec] sm:$0xf] }
 0x180   :  { %4470 = vmatpush.bf16.msrb.mxu0 %v6933_v58  ;;  %4436 = vmatmul.bf16.vlgmr.msra.gmra.mxu1 %v8278_v20  ;;  %v6872_v58 = vld [vmem:[#allocation8 + $0x630] sm:$0xf]  ;;  %v7161_v49 = vor.u32 %v7792_v46, %v7160_v12  ;;  %v6361_v15 = vor.u32 %v7590_v59, %v6358_v56  ;;  %v7581_v12 = vld [vmem:[#allocation8 + $0x1e4] sm:$0xf]  ;;  %v6214_v56 = vld [vmem:[#allocation8 + $0x114] sm:$0xf0] }
 0x181   :  { %4484 = vmatpush.bf16.msrb.mxu1 %v7029_v4  ;;  %4450 = vmatmul.bf16.vlgmr.msra.gmra.mxu2 %v8280_v16  ;;  %v7720_v4 = vld [vmem:[#allocation8 + $0x638] sm:$0xf0]  ;;  %v6322_v46 = vld [vmem:[#allocation8 + $0x1ec] sm:$0xf0] }
 0x182   :  { %4498 = vmatpush.bf16.msrb.mxu2 %v7125_v8  ;;  %4464 = vmatmul.bf16.vlgmr.msra.gmra.mxu3 %v8283_v21  ;;  %v7798_v8 = vld [vmem:[#allocation8 + $0x8a8] sm:$0xf0]  ;;  %v6873_v28 = vor.u32 %v7720_v4, %v6872_v58 }
 0x183   :  { %4512 = vmatpush.bf16.msrb.mxu3 %v7221_v42  ;;  %v7185_v29 = vor.u32 %v7798_v8, %v7184_v6  ;;  %v7539_v6 = vld [vmem:[#allocation8 + $0x94] sm:$0xf] }
 0x184   :  { %4471 = vmatpush.bf16.msrb.mxu0 %v6921_v25  ;;  %v2263_v10 = vpop.f32.mrf.mxu2  ;;  %v6969_v25 = vor.u32 %v7744_v2, %v6968_v60  ;;  %v7563_v60 = vld [vmem:[#allocation8 + $0x154] sm:$0xf]  ;;  %v6250_v2 = vld [vmem:[#allocation8 + $0x15c] sm:$0xf0] }
 0x185   :  { %4485 = vmatpush.bf16.msrb.mxu1 %v7017_v54  ;;  %v2237_v54 = vpop.f32.mrf.mxu0  ;;  %v2251_v17 = vpop.f32.mrf.mxu1  ;;  %v2264_v42 = vadd.f32 %v2263_v10, %v2250_v9  ;;  %v6154_v10 = vld [vmem:[#allocation8 + $0x9c] sm:$0xf0] }
 0x186   :  { %4499 = vmatpush.bf16.msrb.mxu2 %v7113_v38  ;;  %v2238_v38 = vadd.f32 %v2237_v54, %v418_v41  ;;  %v7542_v41 = vld [vmem:[#allocation8 + $0xac] sm:$0xf]  ;;  %v6157_v54 = vor.u32 %v7539_v6, %v6154_v10  ;;  %v6310_v6 = vld [vmem:[#allocation8 + $0x1d4] sm:$0xf0] }
 0x187   :  { %4513 = vmatpush.bf16.msrb.mxu3 %v7209_v35  ;;  %v2402_v45 = vmax.f32 %v2264_v42, 0.0  ;;  %v6169_v58 = vor.u32 %v7542_v41, %v6166_v0  ;;  %v6454_v42 = vld [vmem:[#allocation8 + $0x2f4] sm:$0xf0]  ;;  %v6226_v41 = vld [vmem:[#allocation8 + $0x12c] sm:$0xf0] }
 0x188   :  { %4472 = vmatpush.bf16.msrb.mxu0 %v6909_v22  ;;  %v7052_v22 = vld [vmem:[#allocation8 + $0x798] sm:$0xf]  ;;  %v2252_v47 = vadd.f32 %v2251_v17, %v2238_v38  ;;  %v6253_v17 = vor.u32 %v7563_v60, %v6250_v2  ;;  %v7560_v38 = vld [vmem:[#allocation8 + $0x13c] sm:$0xf]  ;;  %v6442_v0 = vld [vmem:[#allocation8 + $0x2dc] sm:$0xf0] }
 0x189   :  { %4486 = vmatpush.bf16.msrb.mxu1 %v7005_v48  ;;  %v7765_v48 = vld [vmem:[#allocation8 + $0x7a0] sm:$0xf0]  ;;  %v6241_v26 = vor.u32 %v7560_v38, %v6238_v5  ;;  %v7527_v2 = vld [vmem:[#allocation8 + $0x34] sm:$0xf] }
 0x18a   :  { %4500 = vmatpush.bf16.msrb.mxu2 %v7101_v31  ;;  %v6861_v31 = vor.u32 %v7717_v3, %v6860_v18  ;;  %v2277_v18 = vpop.f32.mrf.mxu3  ;;  %v7536_v3 = vld [vmem:[#allocation8 + $0x7c] sm:$0xf] }
 0x18b   :  { %4514 = vmatpush.bf16.msrb.mxu3 %v7197_v62  ;;  %v6945_v62 = vor.u32 %v7738_v37, %v6944_v30  ;;  %v6145_v53 = vor.u32 %v7536_v3, %v6142_v63  ;;  %v7533_v30 = vld [vmem:[#allocation8 + $0x64] sm:$0xf]  ;;  %v6298_v3 = vld [vmem:[#allocation8 + $0x1bc] sm:$0xf0] }
 0x18c   :  { %4473 = vmatpush.bf16.msrb.mxu0 %v6897_v55  ;;  %v2265_v35 = vpop.f32.mrf.mxu2  ;;  %v7566_v55 = vld [vmem:[#allocation8 + $0x16c] sm:$0xf]  ;;  %v7557_v37 = vld [vmem:[#allocation8 + $0x124] sm:$0xf] }
 0x18d   :  { %4487 = vmatpush.bf16.msrb.mxu1 %v6993_v44  ;;  %v7053_v44 = vor.u32 %v7765_v48, %v7052_v22  ;;  %v2266_v50 = vadd.f32 %v2265_v35, %v2252_v47  ;;  %v6265_v4 = vor.u32 %v7566_v55, %v6262_v43  ;;  %v419_v22 = vperm.slane %v8287_v1, 1  ;;  %v7584_v48 = vld [vmem:[#allocation8 + $0x1fc] sm:$0xf] }
 0x18e   :  { %4501 = vmatpush.bf16.msrb.mxu2 %v7089_v57  ;;  %v7762_v57 = vld [vmem:[#allocation8 + $0x788] sm:$0xf0]  ;;  %v6457_v47 = vor.u32 %v7614_v39, %v6454_v42  ;;  %v6229_v43 = vor.u32 %v7557_v37, %v6226_v41  ;;  %v6094_v39 = vld [vmem:[#allocation8 + $0x24] sm:$0xf0]  ;;  %v6082_v37 = vld [vmem:[#allocation8 + $0xc] sm:$0xf0] }
 0x18f   :  { %4515 = vmatpush.bf16.msrb.mxu3 %v7185_v29  ;;  %v2414_v61 = vmax.f32 %v2266_v50, 0.0  ;;  %v6346_v29 = vld [vmem:[#allocation8 + $0x21c] sm:$0xf0]  ;;  %v7572_v41 = vld [vmem:[#allocation8 + $0x19c] sm:$0xf] }
 0x190   :  { %4474 = vmatpush.bf16.msrb.mxu0 %v6885_v19  ;;  %v7148_v19 = vld [vmem:[#allocation8 + $0x858] sm:$0xf]  ;;  %v6349_v11 = vor.u32 %v7587_v52, %v6346_v29  ;;  %v7551_v52 = vld [vmem:[#allocation8 + $0xf4] sm:$0xf]  ;;  %v6202_v29 = vld [vmem:[#allocation8 + $0xfc] sm:$0xf0] }
 0x191   :  { %4488 = vmatpush.bf16.msrb.mxu1 %v6981_v13  ;;  %v7789_v13 = vld [vmem:[#allocation8 + $0x860] sm:$0xf0]  ;;  %v8291_v9 = vpack.c.bf16 %v2414_v61, %v2402_v45  ;;  %v7608_v61 = vld [vmem:[#allocation8 + $0x2bc] sm:$0xf]  ;;  %v6205_v5 = vor.u32 %v7551_v52, %v6202_v29 }
 0x192   :  { %4502 = vmatpush.bf16.msrb.mxu2 %v7077_v7  ;;  %v7041_v7 = vor.u32 %v7762_v57, %v7040_v51  ;;  %v7149_v8 = vor.u32 %v7789_v13, %v7148_v19  ;;  %v7530_v51 = vld [vmem:[#allocation8 + $0x4c] sm:$0xf]  ;;  %v6325_v19 = vor.u32 %v7581_v12, %v6322_v46  ;;  %v6178_v12 = vld [vmem:[#allocation8 + $0xcc] sm:$0xf0] }
 0x193   :  { %4516 = vmatpush.bf16.msrb.mxu3 %v7173_v23  ;;  %v6334_v23 = vld [vmem:[#allocation8 + $0x204] sm:$0xf0]  ;;  %v7554_v57 = vld [vmem:[#allocation8 + $0x10c] sm:$0xf] }
 0x194   :  { %4475 = vmatpush.bf16.msrb.mxu0 %v6873_v28  ;;  %v7136_v28 = vld [vmem:[#allocation8 + $0x840] sm:$0xf]  ;;  %v6337_v35 = vor.u32 %v7584_v48, %v6334_v23  ;;  %v6217_v60 = vor.u32 %v7554_v57, %v6214_v56  ;;  %v6190_v48 = vld [vmem:[#allocation8 + $0xe4] sm:$0xf0]  ;;  %v7602_v23 = vld [vmem:[#allocation8 + $0x28c] sm:$0xf] }
 0x195   :  { %4489 = vmatpush.bf16.msrb.mxu1 %v6969_v25  ;;  %v7786_v25 = vld [vmem:[#allocation8 + $0x848] sm:$0xf0]  ;;  %v6646_v57 = vld [vmem:[#allocation8 + $0x474] sm:$0xf0] }
 0x196   :  { %4503 = vmatpush.bf16.msrb.mxu2 %v7065_v24  ;;  %v7137_v24 = vor.u32 %v7786_v25, %v7136_v28  ;;  %v6418_v28 = vld [vmem:[#allocation8 + $0x2ac] sm:$0xf0]  ;;  %v7638_v46 = vld [vmem:[#allocation8 + $0x3ac] sm:$0xf] }
 0x197   :  { %4517 = vmatpush.bf16.msrb.mxu3 %v7161_v49  ;;  %v6118_v49 = vld [vmem:[#allocation8 + $0x54] sm:$0xf0] }
 0x198   :  { %4476 = vmatpush.bf16.msrb.mxu0 %v6861_v31  ;;  %v6130_v31 = vld [vmem:[#allocation8 + $0x6c] sm:$0xf0]  ;;  %v6121_v10 = vor.u32 %v7530_v51, %v6118_v49  ;;  %v6550_v51 = vld [vmem:[#allocation8 + $0x3b4] sm:$0xf0]  ;;  %v7662_v49 = vld [vmem:[#allocation8 + $0x46c] sm:$0xf] }
 0x199   :  { %4490 = vmatpush.bf16.msrb.mxu1 %v6957_v34  ;;  %v7611_v34 = vld [vmem:[#allocation8 + $0x2d4] sm:$0xf]  ;;  %v6133_v50 = vor.u32 %v7533_v30, %v6130_v31 }
 0x19a   :  { %4504 = vmatpush.bf16.msrb.mxu2 %v7053_v44  ;;  %v6445_v55 = vor.u32 %v7611_v34, %v6442_v0  ;;  %v2278_v44 = vadd.f32 %v2277_v18, %v419_v22  ;;  %v7575_v18 = vld [vmem:[#allocation8 + $0x1b4] sm:$0xf]  ;;  %v7521_v34 = vld [vmem:[#allocation8 + $0x4] sm:$0xf]  ;;  %v6286_v0 = vld [vmem:[#allocation8 + $0x1a4] sm:$0xf0] }
 0x19b   :  { %4518 = vmatpush.bf16.msrb.mxu3 %v7149_v8  ;;  %v7605_v8 = vld [vmem:[#allocation8 + $0x2a4] sm:$0xf] }
 0x19c   :  { %4477 = vmatpush.bf16.msrb.mxu0 %v6849_v36  ;;  %v2291_v45 = vpop.f32.mrf.mxu0  ;;  %v6430_v36 = vld [vmem:[#allocation8 + $0x2c4] sm:$0xf0] }
 0x19d   :  { %4491 = vmatpush.bf16.msrb.mxu1 %v6945_v62  ;;  %v2305_v59 = vpop.f32.mrf.mxu1  ;;  %v2279_v62 = vpop.f32.mrf.mxu3  ;;  %v6433_v13 = vor.u32 %v7608_v61, %v6430_v36  ;;  %v7569_v36 = vld [vmem:[#allocation8 + $0x184] sm:$0xf] }
 0x19e   :  { %4505 = vmatpush.bf16.msrb.mxu2 %v7041_v7  ;;  %v6106_v7 = vld [vmem:[#allocation8 + $0x3c] sm:$0xf0] }
 0x19f   :  { %4478 = vmatmul.bf16.vlgmr.msrb.gmra.mxu0 %v8291_v9  ;;  %4519 = vmatpush.bf16.msrb.mxu3 %v7137_v24  ;;  %v6109_v38 = vor.u32 %v7527_v2, %v6106_v7  ;;  %v7524_v24 = vld [vmem:[#allocation8 + $0x1c] sm:$0xf]  ;;  %v6538_v2 = vld [vmem:[#allocation8 + $0x39c] sm:$0xf0]  ;;  %v7659_v7 = vld [vmem:[#allocation8 + $0x454] sm:$0xf] }
 0x1a0   :  { %4526 = vmatpush.bf16.msra.mxu0 %v6169_v58  ;;  %v2292_v58 = vadd.f32 %v2291_v45, %v2278_v44  ;;  %v7545_v44 = vld [vmem:[#allocation8 + $0xc4] sm:$0xf] }
 0x1a1   :  { %4540 = vmatpush.bf16.msra.mxu1 %v6265_v4  ;;  %v7578_v4 = vld [vmem:[#allocation8 + $0x1cc] sm:$0xf] }
 0x1a2   :  { %4554 = vmatpush.bf16.msra.mxu2 %v6361_v15  ;;  %v2280_v15 = vadd.f32 %v2279_v62, %v419_v22  ;;  %v6313_v25 = vor.u32 %v7578_v4, %v6310_v6  ;;  %v6274_v62 = vld [vmem:[#allocation8 + $0x18c] sm:$0xf0]  ;;  %v6382_v4 = vld [vmem:[#allocation8 + $0x264] sm:$0xf0]  ;;  %v6553_v6 = vor.u32 %v7638_v46, %v6550_v51  ;;  %v421_v51 = vperm.slane %v8287_v1, 3 }
 0x1a3   :  { %4568 = vmatpush.bf16.msra.mxu3 %v6457_v47  ;;  %v6406_v47 = vld [vmem:[#allocation8 + $0x294] sm:$0xf0] }
 0x1a4   :  { %4527 = vmatpush.bf16.msra.mxu0 %v6157_v54  ;;  %v6421_v54 = vor.u32 %v7605_v8, %v6418_v28  ;;  %v2293_v63 = vpop.f32.mrf.mxu0  ;;  %v6634_v8 = vld [vmem:[#allocation8 + $0x45c] sm:$0xf0]  ;;  %v2319_v29 = vpop.f32.mrf.mxu2 }
 0x1a5   :  { %4541 = vmatpush.bf16.msra.mxu1 %v6253_v17  ;;  %v2306_v17 = vadd.f32 %v2305_v59, %v2292_v58  ;;  %v2294_v42 = vadd.f32 %v2293_v63, %v2280_v15  ;;  %v2307_v22 = vpop.f32.mrf.mxu1  ;;  %v6289_v59 = vor.u32 %v7572_v41, %v6286_v0  ;;  %v7596_v58 = vld [vmem:[#allocation8 + $0x25c] sm:$0xf]  ;;  %v6277_v15 = vor.u32 %v7569_v36, %v6274_v62  ;;  %v6526_v63 = vld [vmem:[#allocation8 + $0x384] sm:$0xf0]  ;;  %v6502_v41 = vld [vmem:[#allocation8 + $0x354] sm:$0xf0] }
 0x1a6   :  { %4555 = vmatpush.bf16.msra.mxu2 %v6349_v11  ;;  %v7548_v11 = vld [vmem:[#allocation8 + $0xdc] sm:$0xf]  ;;  %v6385_v52 = vor.u32 %v7596_v58, %v6382_v4  ;;  %v2333_v28 = vpop.f32.mrf.mxu3  ;;  %v7650_v0 = vld [vmem:[#allocation8 + $0x40c] sm:$0xf] }
 0x1a7   :  { %4569 = vmatpush.bf16.msra.mxu3 %v6445_v55  ;;  %v2403_v30 = vmax.f32 %v2306_v17, 0.0  ;;  %v2308_v31 = vadd.f32 %v2307_v22, %v2294_v42  ;;  %v6193_v55 = vor.u32 %v7548_v11, %v6190_v48  ;;  %v7629_v42 = vld [vmem:[#allocation8 + $0x364] sm:$0xf]  ;;  %v6514_v22 = vld [vmem:[#allocation8 + $0x36c] sm:$0xf0] }
 0x1a8   :  { %4528 = vmatpush.bf16.msra.mxu0 %v6145_v53  ;;  %v6301_v53 = vor.u32 %v7575_v18, %v6298_v3  ;;  %v6637_v18 = vor.u32 %v7659_v7, %v6634_v8  ;;  %v7632_v3 = vld [vmem:[#allocation8 + $0x37c] sm:$0xf]  ;;  %v7653_v48 = vld [vmem:[#allocation8 + $0x424] sm:$0xf]  ;;  %v6574_v7 = vld [vmem:[#allocation8 + $0x3e4] sm:$0xf0] }
 0x1a9   :  { %4542 = vmatpush.bf16.msra.mxu1 %v6241_v26  ;;  %v6409_v26 = vor.u32 %v7602_v23, %v6406_v47  ;;  %v2415_v45 = vmax.f32 %v2308_v31, 0.0  ;;  %v6610_v23 = vld [vmem:[#allocation8 + $0x42c] sm:$0xf0]  ;;  %v420_v47 = vperm.slane %v8287_v1, 2  ;;  %v7626_v31 = vld [vmem:[#allocation8 + $0x34c] sm:$0xf] }
 0x1aa   :  { %4556 = vmatpush.bf16.msra.mxu2 %v6337_v35  ;;  %v6097_v35 = vor.u32 %v7524_v24, %v6094_v39  ;;  %v6529_v39 = vor.u32 %v7632_v3, %v6526_v63  ;;  %v6505_v46 = vor.u32 %v7626_v31, %v6502_v41  ;;  %v7620_v58 = vld [vmem:[#allocation8 + $0x31c] sm:$0xf]  ;;  %v7686_v8 = vld [vmem:[#allocation8 + $0x52c] sm:$0xf]  ;;  %v7641_v63 = vld [vmem:[#allocation8 + $0x3c4] sm:$0xf] }
 0x1ab   :  { %4570 = vmatpush.bf16.msra.mxu3 %v6433_v13  ;;  %v8295_v61 = vpack.c.bf16 %v2415_v45, %v2403_v30  ;;  %v6181_v13 = vor.u32 %v7545_v44, %v6178_v12  ;;  %v6613_v30 = vor.u32 %v7653_v48, %v6610_v23  ;;  %v7683_v23 = vld [vmem:[#allocation8 + $0x514] sm:$0xf] }
 0x1ac   :  { %4529 = vmatpush.bf16.msra.mxu0 %v6133_v50  ;;  %v7599_v50 = vld [vmem:[#allocation8 + $0x274] sm:$0xf] }
 0x1ad   :  { %4543 = vmatpush.bf16.msra.mxu1 %v6229_v43  ;;  %v6394_v43 = vld [vmem:[#allocation8 + $0x27c] sm:$0xf0] }
 0x1ae   :  { %4557 = vmatpush.bf16.msra.mxu2 %v6325_v19  ;;  %v6397_v56 = vor.u32 %v7599_v50, %v6394_v43  ;;  %v6085_v19 = vor.u32 %v7521_v34, %v6082_v37  ;;  %4492 = vmatmul.bf16.vlgmr.msrb.gmra.mxu1 %v8295_v61  ;;  %v2335_v34 = vpop.f32.mrf.mxu3  ;;  %v7623_v50 = vld [vmem:[#allocation8 + $0x334] sm:$0xf]  ;;  %v6490_v43 = vld [vmem:[#allocation8 + $0x33c] sm:$0xf0] }
 0x1af   :  { %4571 = vmatpush.bf16.msra.mxu3 %v6421_v54  ;;  %v6370_v54 = vld [vmem:[#allocation8 + $0x24c] sm:$0xf0] }
 0x1b0   :  { %4530 = vmatpush.bf16.msra.mxu0 %v6121_v10  ;;  %v6649_v10 = vor.u32 %v7662_v49, %v6646_v57  ;;  %v7647_v49 = vld [vmem:[#allocation8 + $0x3f4] sm:$0xf]  ;;  %v6586_v57 = vld [vmem:[#allocation8 + $0x3fc] sm:$0xf0] }
 0x1b1   :  { %4544 = vmatpush.bf16.msra.mxu1 %v6217_v60  ;;  %v7635_v60 = vld [vmem:[#allocation8 + $0x394] sm:$0xf] }
 0x1b2   :  { %4558 = vmatpush.bf16.msra.mxu2 %v6313_v25  ;;  %v7593_v25 = vld [vmem:[#allocation8 + $0x244] sm:$0xf]  ;;  %v6541_v17 = vor.u32 %v7635_v60, %v6538_v2  ;;  %v6478_v60 = vld [vmem:[#allocation8 + $0x324] sm:$0xf0]  ;;  %v7644_v2 = vld [vmem:[#allocation8 + $0x3dc] sm:$0xf] }
 0x1b3   :  { %4572 = vmatpush.bf16.msra.mxu3 %v6409_v26  ;;  %v6373_v24 = vor.u32 %v7593_v25, %v6370_v54  ;;  %v6517_v26 = vor.u32 %v7629_v42, %v6514_v22  ;;  %v6481_v25 = vor.u32 %v7620_v58, %v6478_v60  ;;  %v6577_v54 = vor.u32 %v7644_v2, %v6574_v7  ;;  %v7758_v42 = vld [vmem:[#allocation8 + $0x76c] sm:$0xf]  ;;  %v7030_v22 = vld [vmem:[#allocation8 + $0x774] sm:$0xf0]  ;;  %v7752_v58 = vld [vmem:[#allocation8 + $0x73c] sm:$0xf] }
 0x1b4   :  { %4531 = vmatpush.bf16.msra.mxu0 %v6109_v38  ;;  %v7656_v38 = vld [vmem:[#allocation8 + $0x43c] sm:$0xf]  ;;  %v7033_v41 = vor.u32 %v7758_v42, %v7030_v22  ;;  %v7677_v60 = vld [vmem:[#allocation8 + $0x4e4] sm:$0xf]  ;;  %v6706_v2 = vld [vmem:[#allocation8 + $0x4ec] sm:$0xf0] }
 0x1b5   :  { %4545 = vmatpush.bf16.msra.mxu1 %v6205_v5  ;;  %v6622_v5 = vld [vmem:[#allocation8 + $0x444] sm:$0xf0]  ;;  %v7707_v7 = vld [vmem:[#allocation8 + $0x5d4] sm:$0xf]  ;;  %v6886_v42 = vld [vmem:[#allocation8 + $0x654] sm:$0xf0] }
 0x1b6   :  { %4559 = vmatpush.bf16.msra.mxu2 %v6301_v53  ;;  %v6625_v11 = vor.u32 %v7656_v38, %v6622_v5  ;;  %v2321_v53 = vpop.f32.mrf.mxu2  ;;  %v6562_v38 = vld [vmem:[#allocation8 + $0x3cc] sm:$0xf0]  ;;  %v7734_v5 = vld [vmem:[#allocation8 + $0x6ac] sm:$0xf] }
 0x1b7   :  { %4573 = vmatpush.bf16.msra.mxu3 %v6397_v56  ;;  %v2322_v12 = vadd.f32 %v2321_v53, %v420_v47  ;;  %v6493_v56 = vor.u32 %v7623_v50, %v6490_v43  ;;  %v7680_v50 = vld [vmem:[#allocation8 + $0x4fc] sm:$0xf]  ;;  %v6718_v43 = vld [vmem:[#allocation8 + $0x504] sm:$0xf0]  ;;  %v7746_v22 = vld [vmem:[#allocation8 + $0x70c] sm:$0xf] }
 0x1b8   :  { %4532 = vmatpush.bf16.msra.mxu0 %v6097_v35  ;;  %v6598_v35 = vld [vmem:[#allocation8 + $0x414] sm:$0xf0] }
 0x1b9   :  { %4546 = vmatpush.bf16.msra.mxu1 %v6193_v55  ;;  %v2320_v55 = vadd.f32 %v2319_v29, %v420_v47  ;;  %v6601_v45 = vor.u32 %v7650_v0, %v6598_v35  ;;  %v2336_v36 = vadd.f32 %v2335_v34, %v2322_v12  ;;  %v6730_v47 = vld [vmem:[#allocation8 + $0x51c] sm:$0xf0]  ;;  %v7731_v0 = vld [vmem:[#allocation8 + $0x694] sm:$0xf] }
 0x1ba   :  { %4560 = vmatpush.bf16.msra.mxu2 %v6289_v59  ;;  %v7755_v12 = vld [vmem:[#allocation8 + $0x754] sm:$0xf] }
 0x1bb   :  { %4574 = vmatpush.bf16.msra.mxu3 %v6385_v52  ;;  %v2334_v59 = vadd.f32 %v2333_v28, %v2320_v55  ;;  %v6733_v55 = vor.u32 %v7683_v23, %v6730_v47 }
 0x1bc   :  { %4533 = vmatpush.bf16.msra.mxu0 %v6085_v19  ;;  %v2347_v37 = vpop.f32.mrf.mxu0 }
 0x1bd   :  { %4547 = vmatpush.bf16.msra.mxu1 %v6181_v13  ;;  %v2361_v44 = vpop.f32.mrf.mxu1  ;;  %v2348_v62 = vadd.f32 %v2347_v37, %v2334_v59  ;;  %v6589_v13 = vor.u32 %v7647_v49, %v6586_v57  ;;  %v6838_v49 = vld [vmem:[#allocation8 + $0x5f4] sm:$0xf0] }
 0x1be   :  { %4561 = vmatpush.bf16.msra.mxu2 %v6277_v15  ;;  %v2362_v4 = vadd.f32 %v2361_v44, %v421_v51  ;;  %v6742_v15 = vld [vmem:[#allocation8 + $0x534] sm:$0xf0]  ;;  %v6922_v44 = vld [vmem:[#allocation8 + $0x69c] sm:$0xf0] }
 0x1bf   :  { %4534 = vmatmul.bf16.vlgmr.msra.gmra.mxu0 %v8225_v14  ;;  %4575 = vmatpush.bf16.msra.mxu3 %v6373_v24  ;;  %v2404_v52 = vmax.f32 %v2348_v62, 0.0  ;;  %v7728_v62 = vld [vmem:[#allocation8 + $0x67c] sm:$0xf] }
 0x1c0   :  { %4582 = vmatpush.bf16.msrb.mxu0 %v6553_v6  ;;  %4548 = vmatmul.bf16.vlgmr.msra.gmra.mxu1 %v8227_v32 }
 0x1c1   :  { %4596 = vmatpush.bf16.msrb.mxu1 %v6649_v10 }
 0x1c4   :  { %4583 = vmatpush.bf16.msrb.mxu0 %v6541_v17  ;;  %v2375_v19 = vpop.f32.mrf.mxu2  ;;  %v2349_v10 = vpop.f32.mrf.mxu0  ;;  %v7617_v17 = vld [vmem:[#allocation8 + $0x304] sm:$0xf] }
 0x1c5   :  { %4597 = vmatpush.bf16.msrb.mxu1 %v6637_v18  ;;  %v2350_v1 = vadd.f32 %v2349_v10, %v2336_v36  ;;  %v2363_v28 = vpop.f32.mrf.mxu1  ;;  %v6466_v18 = vld [vmem:[#allocation8 + $0x30c] sm:$0xf0]  ;;  %v2376_v3 = vadd.f32 %v2375_v19, %v2362_v4  ;;  %v6721_v19 = vor.u32 %v7680_v50, %v6718_v43  ;;  %v7006_v4 = vld [vmem:[#allocation8 + $0x744] sm:$0xf0]  ;;  %v7698_v50 = vld [vmem:[#allocation8 + $0x58c] sm:$0xf] }
 0x1c6   :  { %v2389_v6 = vpop.f32.mrf.mxu3  ;;  %v2364_v48 = vadd.f32 %v2363_v28, %v421_v51  ;;  %v7710_v51 = vld [vmem:[#allocation8 + $0x5ec] sm:$0xf]  ;;  %v6898_v28 = vld [vmem:[#allocation8 + $0x66c] sm:$0xf0]  ;;  %v6790_v43 = vld [vmem:[#allocation8 + $0x594] sm:$0xf0] }
 0x1c7   :  { %v2416_v29 = vmax.f32 %v2350_v1, 0.0  ;;  %v2390_v31 = vadd.f32 %v2389_v6, %v2376_v3  ;;  %v6841_v10 = vor.u32 %v7710_v51, %v6838_v49  ;;  %v6826_v1 = vld [vmem:[#allocation8 + $0x5dc] sm:$0xf0]  ;;  %v6694_v3 = vld [vmem:[#allocation8 + $0x4d4] sm:$0xf0] }
 0x1c8   :  { %4584 = vmatpush.bf16.msrb.mxu0 %v6529_v39  ;;  %v6745_v39 = vor.u32 %v7686_v8, %v6742_v15  ;;  %v7009_v15 = vor.u32 %v7752_v58, %v7006_v4  ;;  %v6658_v58 = vld [vmem:[#allocation8 + $0x48c] sm:$0xf0]  ;;  %v7695_v4 = vld [vmem:[#allocation8 + $0x574] sm:$0xf] }
 0x1c9   :  { %4598 = vmatpush.bf16.msrb.mxu1 %v6625_v11  ;;  %v8302_v24 = vpack.c.bf16 %v2416_v29, %v2404_v52  ;;  %v6934_v11 = vld [vmem:[#allocation8 + $0x6b4] sm:$0xf0]  ;;  %v2405_v57 = vmax.f32 %v2390_v31, 0.0  ;;  %v7725_v52 = vld [vmem:[#allocation8 + $0x664] sm:$0xf]  ;;  %v6709_v29 = vor.u32 %v7677_v60, %v6706_v2 }
 0x1ca   :  { %v6937_v37 = vor.u32 %v7734_v5, %v6934_v11  ;;  %v6901_v5 = vor.u32 %v7725_v52, %v6898_v28  ;;  %v7722_v11 = vld [vmem:[#allocation8 + $0x64c] sm:$0xf]  ;;  %v6802_v31 = vld [vmem:[#allocation8 + $0x5ac] sm:$0xf0]  ;;  %v7737_v52 = vld [vmem:[#allocation8 + $0x6c4] sm:$0xf] }
 0x1cb   :  { %4506 = vmatmul.bf16.vlgmr.msrb.gmra.mxu2 %v8302_v24 }
 0x1cc   :  { %4585 = vmatpush.bf16.msrb.mxu0 %v6517_v26  ;;  %v2377_v53 = vpop.f32.mrf.mxu2  ;;  %v6469_v26 = vor.u32 %v7617_v17, %v6466_v18  ;;  %4610 = vmatpush.bf16.msrb.mxu2 %v6745_v39  ;;  %v6829_v17 = vor.u32 %v7707_v7, %v6826_v1  ;;  %v7674_v18 = vld [vmem:[#allocation8 + $0x4cc] sm:$0xf]  ;;  %v7126_v1 = vld [vmem:[#allocation8 + $0x834] sm:$0xf0] }
 0x1cd   :  { %4599 = vmatpush.bf16.msrb.mxu1 %v6613_v30  ;;  %v6565_v30 = vor.u32 %v7641_v63, %v6562_v38  ;;  %v2378_v34 = vadd.f32 %v2377_v53, %v2364_v48  ;;  %v7704_v63 = vld [vmem:[#allocation8 + $0x5bc] sm:$0xf]  ;;  %v6814_v38 = vld [vmem:[#allocation8 + $0x5c4] sm:$0xf0]  ;;  %v6982_v48 = vld [vmem:[#allocation8 + $0x714] sm:$0xf0]  ;;  %v6697_v23 = vor.u32 %v7674_v18, %v6694_v3 }
 0x1ce   :  { %v2391_v35 = vpop.f32.mrf.mxu3  ;;  %v6817_v47 = vor.u32 %v7704_v63, %v6814_v38  ;;  %v7671_v53 = vld [vmem:[#allocation8 + $0x4b4] sm:$0xf]  ;;  %v7782_v7 = vld [vmem:[#allocation8 + $0x82c] sm:$0xf]  ;;  %v7544_v18 = vld [vmem:[#allocation8 + $0xb8] sm:$0xf0] }
 0x1cf   :  { %v7129_v3 = vor.u32 %v7782_v7, %v7126_v1  ;;  %v6766_v63 = vld [vmem:[#allocation8 + $0x564] sm:$0xf0]  ;;  %v6268_v38 = vld [vmem:[#allocation8 + $0x170] sm:$0xf]  ;;  %v7559_v1 = vld [vmem:[#allocation8 + $0x130] sm:$0xf0] }
 0x1d0   :  { %4586 = vmatpush.bf16.msrb.mxu0 %v6505_v46  ;;  %v7018_v46 = vld [vmem:[#allocation8 + $0x75c] sm:$0xf0]  ;;  %4611 = vmatpush.bf16.msrb.mxu2 %v6733_v55  ;;  %v6232_v7 = vld [vmem:[#allocation8 + $0x128] sm:$0xf] }
 0x1d1   :  { %4600 = vmatpush.bf16.msrb.mxu1 %v6601_v45  ;;  %v2392_v45 = vadd.f32 %v2391_v35, %v2378_v34  ;;  %v7021_v36 = vor.u32 %v7755_v12, %v7018_v46  ;;  %v6889_v34 = vor.u32 %v7722_v11, %v6886_v42  ;;  %v7743_v35 = vld [vmem:[#allocation8 + $0x6f4] sm:$0xf]  ;;  %v6970_v55 = vld [vmem:[#allocation8 + $0x6fc] sm:$0xf0]  ;;  %v7668_v46 = vld [vmem:[#allocation8 + $0x49c] sm:$0xf] }
 0x1d2   :  { %v6973_v49 = vor.u32 %v7743_v35, %v6970_v55  ;;  %v7779_v42 = vld [vmem:[#allocation8 + $0x814] sm:$0xf]  ;;  %v7102_v35 = vld [vmem:[#allocation8 + $0x804] sm:$0xf0]  ;;  %v7806_v55 = vld [vmem:[#allocation8 + $0x8ec] sm:$0xf] }
 0x1d3   :  { %v2417_v59 = vmax.f32 %v2392_v45, 0.0  ;;  %v6670_v45 = vld [vmem:[#allocation8 + $0x4a4] sm:$0xf0] }
 0x1d4   :  { %4587 = vmatpush.bf16.msrb.mxu0 %v6493_v56  ;;  %v6925_v56 = vor.u32 %v7731_v0, %v6922_v44  ;;  %4612 = vmatpush.bf16.msrb.mxu2 %v6721_v19  ;;  %v6874_v0 = vld [vmem:[#allocation8 + $0x63c] sm:$0xf0]  ;;  %v6793_v19 = vor.u32 %v7698_v50, %v6790_v43  ;;  %v7538_v43 = vld [vmem:[#allocation8 + $0x88] sm:$0xf0] }
 0x1d5   :  { %4601 = vmatpush.bf16.msrb.mxu1 %v6589_v13  ;;  %v6910_v13 = vld [vmem:[#allocation8 + $0x684] sm:$0xf0]  ;;  %v8305_v6 = vpack.c.bf16 %v2417_v59, %v2405_v57  ;;  %v7716_v57 = vld [vmem:[#allocation8 + $0x61c] sm:$0xf]  ;;  %v6148_v50 = vld [vmem:[#allocation8 + $0x80] sm:$0xf] }
 0x1d6   :  { %v6913_v8 = vor.u32 %v7728_v62, %v6910_v13  ;;  %v6862_v59 = vld [vmem:[#allocation8 + $0x624] sm:$0xf0]  ;;  %v6673_v62 = vor.u32 %v7668_v46, %v6670_v45  ;;  %v7665_v13 = vld [vmem:[#allocation8 + $0x484] sm:$0xf] }
 0x1d7   :  { %4520 = vmatmul.bf16.vlgmr.msrb.gmra.mxu3 %v8305_v6  ;;  %v6865_v60 = vor.u32 %v7716_v57, %v6862_v59  ;;  %v6661_v28 = vor.u32 %v7665_v13, %v6658_v58  ;;  %v6244_v57 = vld [vmem:[#allocation8 + $0x140] sm:$0xf]  ;;  %v7562_v59 = vld [vmem:[#allocation8 + $0x148] sm:$0xf0]  ;;  %v6149_v13 = vor.u32 %v7538_v43, %v6148_v50 }
 0x1d8   :  { %4588 = vmatpush.bf16.msrb.mxu0 %v6481_v25  ;;  %v7749_v25 = vld [vmem:[#allocation8 + $0x724] sm:$0xf]  ;;  %4624 = vmatpush.bf16.msrb.mxu3 %v6841_v10  ;;  %v6778_v10 = vld [vmem:[#allocation8 + $0x57c] sm:$0xf0]  ;;  %v6245_v58 = vor.u32 %v7562_v59, %v6244_v57  ;;  %v7550_v43 = vld [vmem:[#allocation8 + $0xe8] sm:$0xf0] }
 0x1d9   :  { %4602 = vmatpush.bf16.msrb.mxu1 %v6577_v54  ;;  %v6994_v54 = vld [vmem:[#allocation8 + $0x72c] sm:$0xf0]  ;;  %4613 = vmatpush.bf16.msrb.mxu2 %v6709_v29  ;;  %v6196_v50 = vld [vmem:[#allocation8 + $0xe0] sm:$0xf]  ;;  %v7791_v57 = vld [vmem:[#allocation8 + $0x874] sm:$0xf] }
 0x1da   :  { %v6997_v39 = vor.u32 %v7749_v25, %v6994_v54  ;;  %v6946_v29 = vld [vmem:[#allocation8 + $0x6cc] sm:$0xf0]  ;;  %v6781_v25 = vor.u32 %v7695_v4, %v6778_v10  ;;  %v7692_v54 = vld [vmem:[#allocation8 + $0x55c] sm:$0xf]  ;;  %v6136_v4 = vld [vmem:[#allocation8 + $0x68] sm:$0xf] }
 0x1db   :  { %4562 = vmatmul.bf16.vlgmr.msra.gmra.mxu2 %v8229_v33  ;;  %v6949_v11 = vor.u32 %v7737_v52, %v6946_v29  ;;  %v7535_v10 = vld [vmem:[#allocation8 + $0x70] sm:$0xf0]  ;;  %v7800_v52 = vld [vmem:[#allocation8 + $0x8bc] sm:$0xf]  ;;  %v7198_v29 = vld [vmem:[#allocation8 + $0x8c4] sm:$0xf0] }
 0x1dc   :  { %4589 = vmatpush.bf16.msrb.mxu0 %v6469_v26  ;;  %4625 = vmatpush.bf16.msrb.mxu3 %v6829_v17  ;;  %v6682_v26 = vld [vmem:[#allocation8 + $0x4bc] sm:$0xf0]  ;;  %v6172_v17 = vld [vmem:[#allocation8 + $0xb0] sm:$0xf] }
 0x1dd   :  { %4603 = vmatpush.bf16.msrb.mxu1 %v6565_v30  ;;  %v7701_v30 = vld [vmem:[#allocation8 + $0x5a4] sm:$0xf]  ;;  %4614 = vmatpush.bf16.msrb.mxu2 %v6697_v23  ;;  %v6685_v44 = vor.u32 %v7671_v53, %v6682_v26  ;;  %v6754_v26 = vld [vmem:[#allocation8 + $0x54c] sm:$0xf0]  ;;  %v7162_v59 = vld [vmem:[#allocation8 + $0x87c] sm:$0xf0] }
 0x1de   :  { %v6805_v12 = vor.u32 %v7701_v30, %v6802_v31  ;;  %v7689_v23 = vld [vmem:[#allocation8 + $0x544] sm:$0xf]  ;;  %v6160_v30 = vld [vmem:[#allocation8 + $0x98] sm:$0xf] }
 0x1df   :  { %4590 = vmatmul.bf16.vlgmr.msrb.gmra.mxu0 %v8276_v40  ;;  %v7541_v31 = vld [vmem:[#allocation8 + $0xa0] sm:$0xf0]  ;;  %v6757_v46 = vor.u32 %v7689_v23, %v6754_v26  ;;  %v6112_v23 = vld [vmem:[#allocation8 + $0x38] sm:$0xf] }
 0x1e0   :  { %4638 = vmatpush.bf16.msra.mxu0 %v6937_v37  ;;  %4604 = vmatmul.bf16.vlgmr.msrb.gmra.mxu1 %v8278_v20  ;;  %v6985_v37 = vor.u32 %v7746_v22, %v6982_v48  ;;  %v7114_v22 = vld [vmem:[#allocation8 + $0x81c] sm:$0xf0]  ;;  %v6173_v48 = vor.u32 %v7544_v18, %v6172_v17  ;;  %v7532_v17 = vld [vmem:[#allocation8 + $0x58] sm:$0xf0] }
 0x1e1   :  { %4652 = vmatpush.bf16.msra.mxu1 %v7033_v41  ;;  %v7719_v41 = vld [vmem:[#allocation8 + $0x634] sm:$0xf]  ;;  %4626 = vmatpush.bf16.msrb.mxu3 %v6817_v47  ;;  %v6769_v47 = vor.u32 %v7692_v54, %v6766_v63  ;;  %v6124_v54 = vld [vmem:[#allocation8 + $0x50] sm:$0xf] }
 0x1e2   :  { %v6877_v51 = vor.u32 %v7719_v41, %v6874_v0  ;;  %4615 = vmatpush.bf16.msrb.mxu2 %v6685_v44  ;;  %v7565_v41 = vld [vmem:[#allocation8 + $0x160] sm:$0xf0]  ;;  %v7776_v0 = vld [vmem:[#allocation8 + $0x7fc] sm:$0xf]  ;;  %v7222_v44 = vld [vmem:[#allocation8 + $0x8f4] sm:$0xf0] }
 0x1e3   :  { %v6220_v63 = vld [vmem:[#allocation8 + $0x110] sm:$0xf] }
 0x1e4   :  { %4639 = vmatpush.bf16.msra.mxu0 %v6925_v56  ;;  %v7740_v56 = vld [vmem:[#allocation8 + $0x6dc] sm:$0xf] }
 0x1e5   :  { %4653 = vmatpush.bf16.msra.mxu1 %v7021_v36  ;;  %v6958_v36 = vld [vmem:[#allocation8 + $0x6e4] sm:$0xf0]  ;;  %4627 = vmatpush.bf16.msrb.mxu3 %v6805_v12  ;;  %v6161_v12 = vor.u32 %v7541_v31, %v6160_v30  ;;  %v6208_v30 = vld [vmem:[#allocation8 + $0xf8] sm:$0xf]  ;;  %v7553_v31 = vld [vmem:[#allocation8 + $0x100] sm:$0xf0] }
 0x1e6   :  { %v6961_v2 = vor.u32 %v7740_v56, %v6958_v36  ;;  %4616 = vmatpush.bf16.msrb.mxu2 %v6673_v62  ;;  %v7773_v56 = vld [vmem:[#allocation8 + $0x7e4] sm:$0xf]  ;;  %v7090_v36 = vld [vmem:[#allocation8 + $0x7ec] sm:$0xf0]  ;;  %v7803_v62 = vld [vmem:[#allocation8 + $0x8d4] sm:$0xf] }
 0x1e7   :  { %4576 = vmatmul.bf16.vlgmr.msra.gmra.mxu3 %v8231_v27 }
 0x1e8   :  { %4640 = vmatpush.bf16.msra.mxu0 %v6913_v8  ;;  %v7713_v8 = vld [vmem:[#allocation8 + $0x604] sm:$0xf] }
 0x1e9   :  { %4654 = vmatpush.bf16.msra.mxu1 %v7009_v15  ;;  %v6850_v15 = vld [vmem:[#allocation8 + $0x60c] sm:$0xf0]  ;;  %4628 = vmatpush.bf16.msrb.mxu3 %v6793_v19  ;;  %v7210_v19 = vld [vmem:[#allocation8 + $0x8dc] sm:$0xf0] }
 0x1ea   :  { %4617 = vmatpush.bf16.msrb.mxu2 %v6661_v28  ;;  %v6137_v28 = vor.u32 %v7535_v10, %v6136_v4  ;;  %v6184_v4 = vld [vmem:[#allocation8 + $0xc8] sm:$0xf] }
 0x1ec   :  { %4641 = vmatpush.bf16.msra.mxu0 %v6901_v5  ;;  %v7568_v5 = vld [vmem:[#allocation8 + $0x178] sm:$0xf0] }
 0x1ed   :  { %4655 = vmatpush.bf16.msra.mxu1 %v6997_v39  ;;  %v6853_v39 = vor.u32 %v7713_v8, %v6850_v15  ;;  %4629 = vmatpush.bf16.msrb.mxu3 %v6781_v25  ;;  %v6269_v53 = vor.u32 %v7568_v5, %v6268_v38  ;;  %v7770_v8 = vld [vmem:[#allocation8 + $0x7cc] sm:$0xf]  ;;  %v7078_v15 = vld [vmem:[#allocation8 + $0x7d4] sm:$0xf0]  ;;  %v6233_v25 = vor.u32 %v7559_v1, %v6232_v7  ;;  %v7556_v38 = vld [vmem:[#allocation8 + $0x118] sm:$0xf0] }
 0x1ee   :  { %4666 = vmatpush.bf16.msra.mxu2 %v7129_v3  ;;  %v7081_v18 = vor.u32 %v7770_v8, %v7078_v15  ;;  %v7201_v3 = vor.u32 %v7800_v52, %v7198_v29  ;;  %v7767_v5 = vld [vmem:[#allocation8 + $0x7b4] sm:$0xf]  ;;  %v7788_v7 = vld [vmem:[#allocation8 + $0x85c] sm:$0xf]  ;;  %v7150_v1 = vld [vmem:[#allocation8 + $0x864] sm:$0xf0] }
 0x1ef   :  { %4618 = vmatmul.bf16.vlgmr.msrb.gmra.mxu2 %v8280_v16  ;;  %v6556_v15 = vld [vmem:[#allocation8 + $0x3b0] sm:$0xf]  ;;  %v7640_v52 = vld [vmem:[#allocation8 + $0x3b8] sm:$0xf0] }
 0x1f0   :  { %4642 = vmatpush.bf16.msra.mxu0 %v6889_v34  ;;  %v7117_v34 = vor.u32 %v7779_v42, %v7114_v22  ;;  %v7186_v42 = vld [vmem:[#allocation8 + $0x8ac] sm:$0xf0]  ;;  %v6125_v22 = vor.u32 %v7532_v17, %v6124_v54  ;;  %v6352_v54 = vld [vmem:[#allocation8 + $0x218] sm:$0xf]  ;;  %v7589_v17 = vld [vmem:[#allocation8 + $0x220] sm:$0xf0] }
 0x1f1   :  { %4656 = vmatpush.bf16.msra.mxu1 %v6985_v37  ;;  %v6256_v37 = vld [vmem:[#allocation8 + $0x158] sm:$0xf]  ;;  %4630 = vmatpush.bf16.msrb.mxu3 %v6769_v47  ;;  %v7529_v47 = vld [vmem:[#allocation8 + $0x40] sm:$0xf0]  ;;  %v6652_v29 = vld [vmem:[#allocation8 + $0x470] sm:$0xf] }
 0x1f2   :  { %v6257_v45 = vor.u32 %v7565_v41, %v6256_v37  ;;  %4667 = vmatpush.bf16.msra.mxu2 %v7117_v34  ;;  %v7764_v34 = vld [vmem:[#allocation8 + $0x79c] sm:$0xf]  ;;  %v7054_v37 = vld [vmem:[#allocation8 + $0x7a4] sm:$0xf0]  ;;  %v7794_v41 = vld [vmem:[#allocation8 + $0x88c] sm:$0xf] }
 0x1f4   :  { %4643 = vmatpush.bf16.msra.mxu0 %v6877_v51  ;;  %v7105_v51 = vor.u32 %v7776_v0, %v7102_v35  ;;  %v7174_v0 = vld [vmem:[#allocation8 + $0x894] sm:$0xf0]  ;;  %v6113_v35 = vor.u32 %v7529_v47, %v6112_v23  ;;  %v7661_v23 = vld [vmem:[#allocation8 + $0x460] sm:$0xf0]  ;;  %v6340_v47 = vld [vmem:[#allocation8 + $0x200] sm:$0xf] }
 0x1f5   :  { %4657 = vmatpush.bf16.msra.mxu1 %v6973_v49  ;;  %v7225_v49 = vor.u32 %v7806_v55, %v7222_v44  ;;  %4631 = vmatpush.bf16.msrb.mxu3 %v6757_v46  ;;  %v6209_v55 = vor.u32 %v7553_v31, %v6208_v30  ;;  %v6100_v44 = vld [vmem:[#allocation8 + $0x20] sm:$0xf]  ;;  %v7057_v46 = vor.u32 %v7764_v34, %v7054_v37  ;;  %v7616_v30 = vld [vmem:[#allocation8 + $0x2f8] sm:$0xf0] }
 0x1f6   :  { %4668 = vmatpush.bf16.msra.mxu2 %v7105_v51  ;;  %v7761_v51 = vld [vmem:[#allocation8 + $0x784] sm:$0xf] }
 0x1f8   :  { %4644 = vmatpush.bf16.msra.mxu0 %v6865_v60  ;;  %v7093_v60 = vor.u32 %v7773_v56, %v7090_v36  ;;  %4632 = vmatmul.bf16.vlgmr.msrb.gmra.mxu3 %v8283_v21  ;;  %v6364_v36 = vld [vmem:[#allocation8 + $0x230] sm:$0xf] }
 0x1f9   :  { %4658 = vmatpush.bf16.msra.mxu1 %v6961_v2  ;;  %4680 = vmatpush.bf16.msra.mxu3 %v7225_v49  ;;  %v7213_v2 = vor.u32 %v7803_v62, %v7210_v19  ;;  %v7042_v49 = vld [vmem:[#allocation8 + $0x78c] sm:$0xf0]  ;;  %v7592_v62 = vld [vmem:[#allocation8 + $0x238] sm:$0xf0]  ;;  %v6197_v19 = vor.u32 %v7550_v43, %v6196_v50  ;;  %v6448_v50 = vld [vmem:[#allocation8 + $0x2d8] sm:$0xf] }
 0x1fa   :  { %4669 = vmatpush.bf16.msra.mxu2 %v7093_v60  ;;  %v7045_v10 = vor.u32 %v7761_v51, %v7042_v49  ;;  %v7165_v60 = vor.u32 %v7791_v57, %v7162_v59  ;;  %v6365_v8 = vor.u32 %v7592_v62, %v6364_v36  ;;  %v7613_v43 = vld [vmem:[#allocation8 + $0x2e0] sm:$0xf0]  ;;  %v6520_v59 = vld [vmem:[#allocation8 + $0x368] sm:$0xf]  ;;  %v7655_v62 = vld [vmem:[#allocation8 + $0x430] sm:$0xf0] }
 0x1fb   :  { %v6616_v36 = vld [vmem:[#allocation8 + $0x428] sm:$0xf] }
 0x1fc   :  { %4645 = vmatpush.bf16.msra.mxu0 %v6853_v39  ;;  %v7066_v39 = vld [vmem:[#allocation8 + $0x7bc] sm:$0xf0] }
 0x1fd   :  { %4659 = vmatpush.bf16.msra.mxu1 %v6949_v11  ;;  %4681 = vmatpush.bf16.msra.mxu3 %v7213_v2  ;;  %v7797_v11 = vld [vmem:[#allocation8 + $0x8a4] sm:$0xf]  ;;  %v7547_v2 = vld [vmem:[#allocation8 + $0xd0] sm:$0xf0] }
 0x1fe   :  { %4670 = vmatpush.bf16.msra.mxu2 %v7081_v18  ;;  %v7189_v26 = vor.u32 %v7797_v11, %v7186_v42  ;;  %v6185_v18 = vor.u32 %v7547_v2, %v6184_v4  ;;  %v6353_v11 = vor.u32 %v7589_v17, %v6352_v54  ;;  %v6544_v42 = vld [vmem:[#allocation8 + $0x398] sm:$0xf]  ;;  %v6508_v2 = vld [vmem:[#allocation8 + $0x350] sm:$0xf] }
 0x1ff   :  { %4646 = vmatmul.bf16.vlgmr.msra.gmra.mxu0 %v8291_v9 }
 0x200   :  { %4694 = vmatpush.bf16.msrb.mxu0 %v6173_v48  ;;  %4660 = vmatmul.bf16.vlgmr.msra.gmra.mxu1 %v8295_v61  ;;  %v6221_v48 = vor.u32 %v7556_v38, %v6220_v63  ;;  %v6557_v63 = vor.u32 %v7640_v52, %v6556_v15  ;;  %v7785_v38 = vld [vmem:[#allocation8 + $0x844] sm:$0xf]  ;;  %v7652_v15 = vld [vmem:[#allocation8 + $0x418] sm:$0xf0]  ;;  %v6304_v52 = vld [vmem:[#allocation8 + $0x1b8] sm:$0xf] }
 0x201   :  { %4708 = vmatpush.bf16.msrb.mxu1 %v6269_v53  ;;  %4682 = vmatpush.bf16.msra.mxu3 %v7201_v3  ;;  %v7069_v53 = vor.u32 %v7767_v5, %v7066_v39  ;;  %v7153_v3 = vor.u32 %v7788_v7, %v7150_v1  ;;  %v7138_v5 = vld [vmem:[#allocation8 + $0x84c] sm:$0xf0]  ;;  %v7628_v7 = vld [vmem:[#allocation8 + $0x358] sm:$0xf0] }
 0x202   :  { %v7141_v31 = vor.u32 %v7785_v38, %v7138_v5  ;;  %v6604_v1 = vld [vmem:[#allocation8 + $0x410] sm:$0xf]  ;;  %v6509_v54 = vor.u32 %v7628_v7, %v6508_v2  ;;  %v6592_v38 = vld [vmem:[#allocation8 + $0x3f8] sm:$0xf]  ;;  %v6376_v7 = vld [vmem:[#allocation8 + $0x248] sm:$0xf] }
 0x203   :  { %4671 = vmatpush.bf16.msra.mxu2 %v7069_v53  ;;  %v7586_v53 = vld [vmem:[#allocation8 + $0x208] sm:$0xf0]  ;;  %v6605_v17 = vor.u32 %v7652_v15, %v6604_v1  ;;  %v7595_v15 = vld [vmem:[#allocation8 + $0x250] sm:$0xf0] }
 0x204   :  { %4695 = vmatpush.bf16.msrb.mxu0 %v6161_v12  ;;  %v7526_v12 = vld [vmem:[#allocation8 + $0x28] sm:$0xf0] }
 0x205   :  { %4709 = vmatpush.bf16.msrb.mxu1 %v6257_v45  ;;  %4683 = vmatpush.bf16.msra.mxu3 %v7189_v26  ;;  %v7177_v45 = vor.u32 %v7794_v41, %v7174_v0  ;;  %v6101_v56 = vor.u32 %v7526_v12, %v6100_v44  ;;  %v6460_v26 = vld [vmem:[#allocation8 + $0x2f0] sm:$0xf]  ;;  %v6341_v41 = vor.u32 %v7586_v53, %v6340_v47  ;;  %v6532_v0 = vld [vmem:[#allocation8 + $0x380] sm:$0xf]  ;;  %v7658_v12 = vld [vmem:[#allocation8 + $0x448] sm:$0xf0] }
 0x206   :  { %v6461_v44 = vor.u32 %v7616_v30, %v6460_v26  ;;  %v6484_v47 = vld [vmem:[#allocation8 + $0x320] sm:$0xf]  ;;  %v7622_v30 = vld [vmem:[#allocation8 + $0x328] sm:$0xf0] }
 0x207   :  { %4672 = vmatpush.bf16.msra.mxu2 %v7057_v46  ;;  %v6328_v46 = vld [vmem:[#allocation8 + $0x1e8] sm:$0xf] }
 0x208   :  { %4696 = vmatpush.bf16.msrb.mxu0 %v6149_v13  ;;  %v6088_v13 = vld [vmem:[#allocation8 + $0x8] sm:$0xf] }
 0x209   :  { %4710 = vmatpush.bf16.msrb.mxu1 %v6245_v58  ;;  %v7523_v58 = vld [vmem:[#allocation8 + $0x10] sm:$0xf0]  ;;  %4684 = vmatpush.bf16.msra.mxu3 %v7177_v45 }
 0x20a   :  { %v7583_v45 = vld [vmem:[#allocation8 + $0x1f0] sm:$0xf0] }
 0x20b   :  { %4673 = vmatpush.bf16.msra.mxu2 %v7045_v10  ;;  %v6329_v57 = vor.u32 %v7583_v45, %v6328_v46  ;;  %v6617_v10 = vor.u32 %v7655_v62, %v6616_v36  ;;  %v6485_v46 = vor.u32 %v7622_v30, %v6484_v47  ;;  %v6472_v45 = vld [vmem:[#allocation8 + $0x308] sm:$0xf]  ;;  %v6388_v36 = vld [vmem:[#allocation8 + $0x260] sm:$0xf]  ;;  %v7736_v62 = vld [vmem:[#allocation8 + $0x6b8] sm:$0xf0] }
 0x20c   :  { %4697 = vmatpush.bf16.msrb.mxu0 %v6137_v28  ;;  %v6089_v28 = vor.u32 %v7523_v58, %v6088_v13  ;;  %v6436_v13 = vld [vmem:[#allocation8 + $0x2c0] sm:$0xf]  ;;  %v7610_v58 = vld [vmem:[#allocation8 + $0x2c8] sm:$0xf0]  ;;  %v6832_v30 = vld [vmem:[#allocation8 + $0x5d8] sm:$0xf] }
 0x20d   :  { %4711 = vmatpush.bf16.msrb.mxu1 %v6233_v25  ;;  %v7664_v25 = vld [vmem:[#allocation8 + $0x478] sm:$0xf0]  ;;  %4685 = vmatpush.bf16.msra.mxu3 %v7165_v60  ;;  %v7754_v47 = vld [vmem:[#allocation8 + $0x748] sm:$0xf0] }
 0x20e   :  { %v6653_v39 = vor.u32 %v7664_v25, %v6652_v29  ;;  %4674 = vmatmul.bf16.vlgmr.msra.gmra.mxu2 %v8302_v24  ;;  %v7577_v29 = vld [vmem:[#allocation8 + $0x1c0] sm:$0xf0]  ;;  %v7607_v25 = vld [vmem:[#allocation8 + $0x2b0] sm:$0xf0] }
 0x20f   :  { %4722 = vmatpush.bf16.msrb.mxu2 %v6365_v8  ;;  %v6437_v8 = vor.u32 %v7610_v58, %v6436_v13  ;;  %v7760_v13 = vld [vmem:[#allocation8 + $0x778] sm:$0xf0] }
 0x210   :  { %4698 = vmatpush.bf16.msrb.mxu0 %v6125_v22  ;;  %v7637_v22 = vld [vmem:[#allocation8 + $0x3a0] sm:$0xf0] }
 0x211   :  { %4712 = vmatpush.bf16.msrb.mxu1 %v6221_v48  ;;  %v6640_v48 = vld [vmem:[#allocation8 + $0x458] sm:$0xf]  ;;  %4686 = vmatpush.bf16.msra.mxu3 %v7153_v3  ;;  %v6545_v34 = vor.u32 %v7637_v22, %v6544_v42  ;;  %v7574_v42 = vld [vmem:[#allocation8 + $0x1a8] sm:$0xf0]  ;;  %v6412_v22 = vld [vmem:[#allocation8 + $0x290] sm:$0xf] }
 0x212   :  { %v6641_v37 = vor.u32 %v7661_v23, %v6640_v48  ;;  %v6496_v3 = vld [vmem:[#allocation8 + $0x338] sm:$0xf]  ;;  %v7604_v48 = vld [vmem:[#allocation8 + $0x298] sm:$0xf0] }
 0x213   :  { %4723 = vmatpush.bf16.msrb.mxu2 %v6353_v11  ;;  %v6292_v11 = vld [vmem:[#allocation8 + $0x1a0] sm:$0xf] }
 0x214   :  { %4699 = vmatpush.bf16.msrb.mxu0 %v6113_v35  ;;  %v7634_v35 = vld [vmem:[#allocation8 + $0x388] sm:$0xf0]  ;;  %v6293_v26 = vor.u32 %v7574_v42, %v6292_v11  ;;  %v6916_v11 = vld [vmem:[#allocation8 + $0x680] sm:$0xf] }
 0x215   :  { %4713 = vmatpush.bf16.msrb.mxu1 %v6209_v55  ;;  %v6628_v55 = vld [vmem:[#allocation8 + $0x440] sm:$0xf]  ;;  %4687 = vmatpush.bf16.msra.mxu3 %v7141_v31  ;;  %v6533_v51 = vor.u32 %v7634_v35, %v6532_v0  ;;  %v7571_v0 = vld [vmem:[#allocation8 + $0x190] sm:$0xf0]  ;;  %v6400_v35 = vld [vmem:[#allocation8 + $0x278] sm:$0xf] }
 0x216   :  { %v6629_v49 = vor.u32 %v7658_v12, %v6628_v55  ;;  %v6580_v31 = vld [vmem:[#allocation8 + $0x3e0] sm:$0xf]  ;;  %v7601_v55 = vld [vmem:[#allocation8 + $0x280] sm:$0xf0]  ;;  %v7688_v12 = vld [vmem:[#allocation8 + $0x538] sm:$0xf0] }
 0x217   :  { %4724 = vmatpush.bf16.msrb.mxu2 %v6341_v41  ;;  %v6280_v41 = vld [vmem:[#allocation8 + $0x188] sm:$0xf]  ;;  %v7730_v42 = vld [vmem:[#allocation8 + $0x688] sm:$0xf0] }
 0x218   :  { %4700 = vmatpush.bf16.msrb.mxu0 %v6101_v56  ;;  %v7631_v56 = vld [vmem:[#allocation8 + $0x370] sm:$0xf0]  ;;  %4688 = vmatmul.bf16.vlgmr.msra.gmra.mxu3 %v8305_v6 }
 0x219   :  { %4714 = vmatpush.bf16.msrb.mxu1 %v6197_v19  ;;  %4736 = vmatpush.bf16.msrb.mxu3 %v6461_v44  ;;  %v7580_v19 = vld [vmem:[#allocation8 + $0x1d8] sm:$0xf0]  ;;  %v6521_v4 = vor.u32 %v7631_v56, %v6520_v59  ;;  %v6748_v44 = vld [vmem:[#allocation8 + $0x530] sm:$0xf]  ;;  %v6401_v59 = vor.u32 %v7601_v55, %v6400_v35  ;;  %v7727_v35 = vld [vmem:[#allocation8 + $0x670] sm:$0xf0] }
 0x21a   :  { %v6749_v56 = vor.u32 %v7688_v12, %v6748_v44  ;;  %v7000_v12 = vld [vmem:[#allocation8 + $0x728] sm:$0xf] }
 0x21b   :  { %4725 = vmatpush.bf16.msrb.mxu2 %v6329_v57  ;;  %v7643_v57 = vld [vmem:[#allocation8 + $0x3d0] sm:$0xf0] }
 0x21c   :  { %4701 = vmatpush.bf16.msrb.mxu0 %v6089_v28  ;;  %v6424_v28 = vld [vmem:[#allocation8 + $0x2a8] sm:$0xf] }
 0x21d   :  { %4715 = vmatpush.bf16.msrb.mxu1 %v6185_v18  ;;  %v6305_v18 = vor.u32 %v7577_v29, %v6304_v52  ;;  %v6425_v5 = vor.u32 %v7607_v25, %v6424_v28  ;;  %v6928_v52 = vld [vmem:[#allocation8 + $0x698] sm:$0xf]  ;;  %v7733_v29 = vld [vmem:[#allocation8 + $0x6a0] sm:$0xf0] }
 0x21e   :  { %v7024_v25 = vld [vmem:[#allocation8 + $0x758] sm:$0xf] }
 0x21f   :  { %4702 = vmatmul.bf16.vlgmr.msrb.gmra.mxu0 %v8225_v14  ;;  %v6449_v14 = vor.u32 %v7613_v43, %v6448_v50  ;;  %v6281_v43 = vor.u32 %v7571_v0, %v6280_v41  ;;  %v6904_v0 = vld [vmem:[#allocation8 + $0x668] sm:$0xf] }
 0x220   :  { %4750 = vmatpush.bf16.msra.mxu0 %v6557_v63  ;;  %4716 = vmatmul.bf16.vlgmr.msrb.gmra.mxu1 %v8227_v32  ;;  %v6316_v32 = vld [vmem:[#allocation8 + $0x1d0] sm:$0xf]  ;;  %v7625_v63 = vld [vmem:[#allocation8 + $0x340] sm:$0xf0] }
 0x221   :  { %4764 = vmatpush.bf16.msra.mxu1 %v6653_v39  ;;  %v6317_v60 = vor.u32 %v7580_v19, %v6316_v32  ;;  %4737 = vmatpush.bf16.msrb.mxu3 %v6449_v14  ;;  %v7649_v39 = vld [vmem:[#allocation8 + $0x400] sm:$0xf0]  ;;  %v6497_v23 = vor.u32 %v7625_v63, %v6496_v3  ;;  %v6940_v14 = vld [vmem:[#allocation8 + $0x6b0] sm:$0xf]  ;;  %v7598_v32 = vld [vmem:[#allocation8 + $0x268] sm:$0xf0] }
 0x222   :  { %v6593_v53 = vor.u32 %v7649_v39, %v6592_v38  ;;  %v7036_v19 = vld [vmem:[#allocation8 + $0x770] sm:$0xf]  ;;  %v6941_v2 = vor.u32 %v7736_v62, %v6940_v14  ;;  %v6389_v1 = vor.u32 %v7598_v32, %v6388_v36  ;;  %v7712_v63 = vld [vmem:[#allocation8 + $0x5f8] sm:$0xf0]  ;;  %v6929_v38 = vor.u32 %v7733_v29, %v6928_v52 }
 0x223   :  { %4726 = vmatpush.bf16.msrb.mxu2 %v6317_v60  ;;  %v6844_v3 = vld [vmem:[#allocation8 + $0x5f0] sm:$0xf]  ;;  %v7748_v32 = vld [vmem:[#allocation8 + $0x718] sm:$0xf0] }
 0x224   :  { %4751 = vmatpush.bf16.msra.mxu0 %v6545_v34  ;;  %v7646_v34 = vld [vmem:[#allocation8 + $0x3e8] sm:$0xf0]  ;;  %v6988_v62 = vld [vmem:[#allocation8 + $0x710] sm:$0xf] }
 0x225   :  { %4765 = vmatpush.bf16.msra.mxu1 %v6641_v37  ;;  %4738 = vmatpush.bf16.msrb.mxu3 %v6437_v8  ;;  %v6413_v37 = vor.u32 %v7604_v48, %v6412_v22  ;;  %v6581_v50 = vor.u32 %v7646_v34, %v6580_v31  ;;  %v7037_v8 = vor.u32 %v7760_v13, %v7036_v19  ;;  %v8321_v22 = vpop.f32.mrf.mxu0  ;;  %v7709_v31 = vld [vmem:[#allocation8 + $0x5e0] sm:$0xf0]  ;;  %v8325_v34 = vpop.f32.mrf.mxu1  ;;  %v6688_v19 = vld [vmem:[#allocation8 + $0x4b8] sm:$0xf] }
 0x226   :  { %v6833_v44 = vor.u32 %v7709_v31, %v6832_v30  ;;  %v7673_v13 = vld [vmem:[#allocation8 + $0x4c0] sm:$0xf0]  ;;  %v6784_v30 = vld [vmem:[#allocation8 + $0x578] sm:$0xf] }
 0x227   :  { %4727 = vmatpush.bf16.msrb.mxu2 %v6305_v18  ;;  %v7682_v18 = vld [vmem:[#allocation8 + $0x508] sm:$0xf0]  ;;  %v6689_v52 = vor.u32 %v7673_v13, %v6688_v19  ;;  %v7697_v31 = vld [vmem:[#allocation8 + $0x580] sm:$0xf0] }
 0x228   :  { %4752 = vmatpush.bf16.msra.mxu0 %v6533_v51  ;;  %v7619_v51 = vld [vmem:[#allocation8 + $0x310] sm:$0xf0] }
 0x229   :  { %4766 = vmatpush.bf16.msra.mxu1 %v6629_v49  ;;  %4739 = vmatpush.bf16.msrb.mxu3 %v6425_v5  ;;  %v6568_v49 = vld [vmem:[#allocation8 + $0x3c8] sm:$0xf]  ;;  %v6473_v58 = vor.u32 %v7619_v51, %v6472_v45  ;;  %v6377_v5 = vor.u32 %v7595_v15, %v6376_v7  ;;  %v7676_v45 = vld [vmem:[#allocation8 + $0x4d8] sm:$0xf0]  ;;  %v6905_v51 = vor.u32 %v7727_v35, %v6904_v0  ;;  %v7132_v0 = vld [vmem:[#allocation8 + $0x830] sm:$0xf] }
 0x22a   :  { %v6569_v60 = vor.u32 %v7643_v57, %v6568_v49  ;;  %v8330_v49 = vld [vmem:[#allocation10] sm:$0x7]  ;;  %v6989_v7 = vor.u32 %v7748_v32, %v6988_v62  ;;  %v7784_v35 = vld [vmem:[#allocation8 + $0x838] sm:$0xf0]  ;;  %v7120_v62 = vld [vmem:[#allocation8 + $0x818] sm:$0xf] }
 0x22b   :  { %4728 = vmatpush.bf16.msrb.mxu2 %v6293_v26  ;;  %v7679_v26 = vld [vmem:[#allocation8 + $0x4f0] sm:$0xf0]  ;;  %v7781_v32 = vld [vmem:[#allocation8 + $0x820] sm:$0xf0] }
 0x22c   :  { %4753 = vmatpush.bf16.msra.mxu0 %v6521_v4  ;;  %v6736_v4 = vld [vmem:[#allocation8 + $0x518] sm:$0xf] }
 0x22d   :  { %4767 = vmatpush.bf16.msra.mxu1 %v6617_v10  ;;  %4740 = vmatpush.bf16.msrb.mxu3 %v6413_v37  ;;  %v7685_v10 = vld [vmem:[#allocation8 + $0x520] sm:$0xf0]  ;;  %v6917_v37 = vor.u32 %v7730_v42, %v6916_v11  ;;  %v8337_v15 = vpop.f32.mrf.mxu1  ;;  %v7718_v11 = vld [vmem:[#allocation8 + $0x628] sm:$0xf0] }
 0x22e   :  { %v6737_v28 = vor.u32 %v7685_v10, %v6736_v4  ;;  %v7703_v4 = vld [vmem:[#allocation8 + $0x5b0] sm:$0xf0]  ;;  %v8332_v10 = vpop.f32.mrf.mxu3 }
 0x22f   :  { %4729 = vmatpush.bf16.msrb.mxu2 %v6281_v43  ;;  %v7706_v43 = vld [vmem:[#allocation8 + $0x5c8] sm:$0xf0] }
 0x230   :  { %4754 = vmatpush.bf16.msra.mxu0 %v6509_v54  ;;  %v7757_v54 = vld [vmem:[#allocation8 + $0x760] sm:$0xf0] }
 0x231   :  { %4768 = vmatpush.bf16.msra.mxu1 %v6605_v17  ;;  %4741 = vmatpush.bf16.msrb.mxu3 %v6401_v59  ;;  %v6724_v17 = vld [vmem:[#allocation8 + $0x500] sm:$0xf]  ;;  %v7025_v39 = vor.u32 %v7757_v54, %v7024_v25  ;;  %v6892_v59 = vld [vmem:[#allocation8 + $0x650] sm:$0xf]  ;;  %v7745_v25 = vld [vmem:[#allocation8 + $0x700] sm:$0xf0] }
 0x232   :  { %4730 = vmatmul.bf16.vlgmr.msrb.gmra.mxu2 %v8229_v33  ;;  %v6725_v48 = vor.u32 %v7682_v18, %v6724_v17  ;;  %v6845_v33 = vor.u32 %v7712_v63, %v6844_v3  ;;  %v6676_v54 = vld [vmem:[#allocation8 + $0x4a0] sm:$0xf]  ;;  %v7670_v17 = vld [vmem:[#allocation8 + $0x4a8] sm:$0xf0]  ;;  %v6796_v18 = vld [vmem:[#allocation8 + $0x590] sm:$0xf] }
 0x233   :  { %4778 = vmatpush.bf16.msra.mxu2 %v6749_v56  ;;  %v7724_v56 = vld [vmem:[#allocation8 + $0x658] sm:$0xf0]  ;;  %v6677_v42 = vor.u32 %v7670_v17, %v6676_v54 }
 0x234   :  { %4755 = vmatpush.bf16.msra.mxu0 %v6497_v23  ;;  %v7012_v23 = vld [vmem:[#allocation8 + $0x740] sm:$0xf]  ;;  %v7700_v3 = vld [vmem:[#allocation8 + $0x598] sm:$0xf0] }
 0x235   :  { %4769 = vmatpush.bf16.msra.mxu1 %v6593_v53  ;;  %4742 = vmatpush.bf16.msrb.mxu3 %v6389_v1  ;;  %v6712_v53 = vld [vmem:[#allocation8 + $0x4e8] sm:$0xf]  ;;  %v7013_v41 = vor.u32 %v7754_v47, %v7012_v23  ;;  %v6880_v1 = vld [vmem:[#allocation8 + $0x638] sm:$0xf]  ;;  %v7742_v23 = vld [vmem:[#allocation8 + $0x6e8] sm:$0xf0] }
 0x236   :  { %v6713_v55 = vor.u32 %v7679_v26, %v6712_v53  ;;  %v6664_v47 = vld [vmem:[#allocation8 + $0x488] sm:$0xf]  ;;  %v7667_v26 = vld [vmem:[#allocation8 + $0x490] sm:$0xf0] }
 0x237   :  { %4779 = vmatpush.bf16.msra.mxu2 %v6737_v28  ;;  %v6976_v28 = vld [vmem:[#allocation8 + $0x6f8] sm:$0xf] }
 0x238   :  { %4756 = vmatpush.bf16.msra.mxu0 %v6485_v46  ;;  %v6700_v46 = vld [vmem:[#allocation8 + $0x4d0] sm:$0xf] }
 0x239   :  { %4770 = vmatpush.bf16.msra.mxu1 %v6581_v50  ;;  %4743 = vmatpush.bf16.msrb.mxu3 %v6377_v5  ;;  %v6820_v50 = vld [vmem:[#allocation8 + $0x5c0] sm:$0xf]  ;;  %v6701_v36 = vor.u32 %v7676_v45, %v6700_v46  ;;  %v6977_v5 = vor.u32 %v7745_v25, %v6976_v28  ;;  %v4437_v46 = vpop.f32.mrf.mxu1  ;;  %v6665_v45 = vor.u32 %v7667_v26, %v6664_v47 }
 0x23a   :  { %v6821_v14 = vor.u32 %v7706_v43, %v6820_v50  ;;  %v6785_v50 = vor.u32 %v7697_v31, %v6784_v30  ;;  %v6952_v43 = vld [vmem:[#allocation8 + $0x6c8] sm:$0xf]  ;;  %v7204_v47 = vld [vmem:[#allocation8 + $0x8c0] sm:$0xf] }
 0x23b   :  { %4780 = vmatpush.bf16.msra.mxu2 %v6725_v48  ;;  %v6797_v48 = vor.u32 %v7700_v3, %v6796_v18  ;;  %v7096_v3 = vld [vmem:[#allocation8 + $0x7e8] sm:$0xf] }
 0x23c   :  { %4757 = vmatpush.bf16.msra.mxu0 %v6473_v58  ;;  %4744 = vmatmul.bf16.vlgmr.msrb.gmra.mxu3 %v8231_v27  ;;  %v6808_v58 = vld [vmem:[#allocation8 + $0x5a8] sm:$0xf]  ;;  %v8334_v27 = vpop.f32.mrf.mxu0 }
 0x23d   :  { %4771 = vmatpush.bf16.msra.mxu1 %v6569_v60  ;;  %4792 = vmatpush.bf16.msra.mxu3 %v6845_v33  ;;  %v6893_v60 = vor.u32 %v7724_v56, %v6892_v59  ;;  %v6809_v29 = vor.u32 %v7703_v4, %v6808_v58  ;;  %v6964_v33 = vld [vmem:[#allocation8 + $0x6e0] sm:$0xf]  ;;  %v7694_v56 = vld [vmem:[#allocation8 + $0x568] sm:$0xf0] }
 0x23e   :  { %v6772_v59 = vld [vmem:[#allocation8 + $0x560] sm:$0xf] }
 0x23f   :  { %4758 = vmatmul.bf16.vlgmr.msra.gmra.mxu0 %v8276_v40  ;;  %v8327_v40 = vpop.f32.mrf.mxu2  ;;  %4781 = vmatpush.bf16.msra.mxu2 %v6713_v55  ;;  %v6965_v55 = vor.u32 %v7742_v23, %v6964_v33  ;;  %v6773_v4 = vor.u32 %v7694_v56, %v6772_v59  ;;  %v7084_v33 = vld [vmem:[#allocation8 + $0x7d0] sm:$0xf]  ;;  %v7772_v23 = vld [vmem:[#allocation8 + $0x7d8] sm:$0xf0] }
 0x240   :  { %4806 = vmatpush.bf16.msrb.mxu0 %v6941_v2  ;;  %4772 = vmatmul.bf16.vlgmr.msra.gmra.mxu1 %v8278_v20  ;;  %v7751_v20 = vld [vmem:[#allocation8 + $0x730] sm:$0xf0]  ;;  %v2816_v2 = vperm.slane %v8330_v49, 0  ;;  %v7085_v30 = vor.u32 %v7772_v23, %v7084_v33 }
 0x241   :  { %4820 = vmatpush.bf16.msrb.mxu1 %v7037_v8  ;;  %v7001_v57 = vor.u32 %v7751_v20, %v7000_v12  ;;  %4793 = vmatpush.bf16.msra.mxu3 %v6833_v44  ;;  %v7721_v8 = vld [vmem:[#allocation8 + $0x640] sm:$0xf0]  ;;  %v6856_v44 = vld [vmem:[#allocation8 + $0x608] sm:$0xf]  ;;  %v7715_v12 = vld [vmem:[#allocation8 + $0x610] sm:$0xf0]  ;;  %v4411_v20 = vpop.f32.mrf.mxu3 }
 0x242   :  { %v4368_v53 = vadd.f32 %v8321_v22, %v2816_v2  ;;  %v7739_v22 = vld [vmem:[#allocation8 + $0x6d0] sm:$0xf0]  ;;  %v4370_v58 = vadd.f32 %v8334_v27, %v2816_v2 }
 0x243   :  { %4782 = vmatpush.bf16.msra.mxu2 %v6701_v36  ;;  %v6953_v13 = vor.u32 %v7739_v22, %v6952_v43  ;;  %v7060_v43 = vld [vmem:[#allocation8 + $0x7a0] sm:$0xf]  ;;  %v7766_v22 = vld [vmem:[#allocation8 + $0x7a8] sm:$0xf0] }
 0x244   :  { %4807 = vmatpush.bf16.msrb.mxu0 %v6929_v38  ;;  %v6881_v38 = vor.u32 %v7721_v8, %v6880_v1  ;;  %v7108_v1 = vld [vmem:[#allocation8 + $0x800] sm:$0xf]  ;;  %v7778_v8 = vld [vmem:[#allocation8 + $0x808] sm:$0xf0]  ;;  %v4384_v28 = vadd.f32 %v8337_v15, %v4370_v58 }
 0x245   :  { %4821 = vmatpush.bf16.msrb.mxu1 %v7025_v39  ;;  %4794 = vmatpush.bf16.msra.mxu3 %v6821_v14  ;;  %v6868_v39 = vld [vmem:[#allocation8 + $0x620] sm:$0xf]  ;;  %v6857_v14 = vor.u32 %v7715_v12, %v6856_v44  ;;  %v7109_v17 = vor.u32 %v7778_v8, %v7108_v1  ;;  %v7799_v44 = vld [vmem:[#allocation8 + $0x8b0] sm:$0xf0] }
 0x247   :  { %v8339_v63 = vpop.f32.mrf.mxu2  ;;  %4783 = vmatpush.bf16.msra.mxu2 %v6689_v52  ;;  %v7228_v52 = vld [vmem:[#allocation8 + $0x8f0] sm:$0xf] }
 0x248   :  { %4808 = vmatpush.bf16.msrb.mxu0 %v6917_v37  ;;  %v4423_v37 = vpop.f32.mrf.mxu0 }
 0x249   :  { %4822 = vmatpush.bf16.msrb.mxu1 %v7013_v41  ;;  %4795 = vmatpush.bf16.msra.mxu3 %v6809_v29  ;;  %v6869_v41 = vor.u32 %v7718_v11, %v6868_v39  ;;  %v7808_v29 = vld [vmem:[#allocation8 + $0x8f8] sm:$0xf0]  ;;  %v4465_v2 = vpop.f32.mrf.mxu3  ;;  %v7805_v39 = vld [vmem:[#allocation8 + $0x8e0] sm:$0xf0] }
 0x24a   :  { %v7229_v18 = vor.u32 %v7808_v29, %v7228_v52 }
 0x24b   :  { %4784 = vmatpush.bf16.msra.mxu2 %v6677_v42 }
 0x24c   :  { %4809 = vmatpush.bf16.msrb.mxu0 %v6905_v51  ;;  %v4382_v51 = vadd.f32 %v8325_v34, %v4368_v53  ;;  %v7121_v34 = vor.u32 %v7781_v32, %v7120_v62  ;;  %v7802_v53 = vld [vmem:[#allocation8 + $0x8c8] sm:$0xf0]  ;;  %v7061_v62 = vor.u32 %v7766_v22, %v7060_v43 }
 0x24d   :  { %4823 = vmatpush.bf16.msrb.mxu1 %v7001_v57  ;;  %4796 = vmatpush.bf16.msra.mxu3 %v6797_v48  ;;  %v7133_v57 = vor.u32 %v7784_v35, %v7132_v0  ;;  %v7205_v31 = vor.u32 %v7802_v53, %v7204_v47  ;;  %v7769_v35 = vld [vmem:[#allocation8 + $0x7c0] sm:$0xf0] }
 0x24e   :  { %v4396_v19 = vadd.f32 %v8327_v40, %v4382_v51  ;;  %v7180_v51 = vld [vmem:[#allocation8 + $0x890] sm:$0xf] }
 0x24f   :  { %v4451_v36 = vpop.f32.mrf.mxu2  ;;  %4785 = vmatpush.bf16.msra.mxu2 %v6665_v45 }
 0x250   :  { %4810 = vmatpush.bf16.msrb.mxu0 %v6893_v60  ;;  %v6760_v60 = vld [vmem:[#allocation8 + $0x548] sm:$0xf]  ;;  %v4410_v40 = vadd.f32 %v8332_v10, %v4396_v19  ;;  %v4425_v27 = vpop.f32.mrf.mxu0  ;;  %v7216_v10 = vld [vmem:[#allocation8 + $0x8d8] sm:$0xf] }
 0x251   :  { %4824 = vmatpush.bf16.msrb.mxu1 %v6989_v7  ;;  %4797 = vmatpush.bf16.msra.mxu3 %v6785_v50  ;;  %v7691_v7 = vld [vmem:[#allocation8 + $0x550] sm:$0xf0]  ;;  %v7217_v48 = vor.u32 %v7805_v39, %v7216_v10  ;;  %v7048_v19 = vld [vmem:[#allocation8 + $0x788] sm:$0xf] }
 0x252   :  { %4786 = vmatmul.bf16.vlgmr.msra.gmra.mxu2 %v8280_v16  ;;  %v6761_v25 = vor.u32 %v7691_v7, %v6760_v60  ;;  %v4424_v54 = vadd.f32 %v4423_v37, %v4410_v40  ;;  %v7775_v16 = vld [vmem:[#allocation8 + $0x7f0] sm:$0xf0]  ;;  %v7072_v37 = vld [vmem:[#allocation8 + $0x7b8] sm:$0xf]  ;;  %v7793_v60 = vld [vmem:[#allocation8 + $0x880] sm:$0xf0] }
 0x253   :  { %4834 = vmatpush.bf16.msrb.mxu2 %v7133_v57  ;;  %v7097_v42 = vor.u32 %v7775_v16, %v7096_v3  ;;  %v7073_v50 = vor.u32 %v7769_v35, %v7072_v37  ;;  %v7796_v57 = vld [vmem:[#allocation8 + $0x898] sm:$0xf0]  ;;  %v7144_v16 = vld [vmem:[#allocation8 + $0x848] sm:$0xf]  ;;  %v7787_v10 = vld [vmem:[#allocation8 + $0x850] sm:$0xf0] }
 0x254   :  { %4811 = vmatpush.bf16.msrb.mxu0 %v6881_v38  ;;  %v4398_v38 = vadd.f32 %v8339_v63, %v4384_v28  ;;  %v4438_v11 = vadd.f32 %v4437_v46, %v4424_v54  ;;  %v7181_v32 = vor.u32 %v7796_v57, %v7180_v51  ;;  %v4865_v3 = vld [vmem:[#allocation11 + $0x18] sm:$0xff] }
 0x255   :  { %4825 = vmatpush.bf16.msrb.mxu1 %v6977_v5  ;;  %4798 = vmatpush.bf16.msra.mxu3 %v6773_v4  ;;  %v4439_v5 = vpop.f32.mrf.mxu1  ;;  %v7763_v4 = vld [vmem:[#allocation8 + $0x790] sm:$0xf0]  ;;  %vm4871_vm1 = vcmp.ge.s32.totalorder %v4865_v3, 3006477107 }
 0x256   :  { %v4452_v26 = vadd.f32 %v4451_v36, %v4438_v11  ;;  %v7049_v40 = vor.u32 %v7763_v4, %v7048_v19  ;;  %v7145_v11 = vor.u32 %v7787_v10, %v7144_v16 }
 0x257   :  { %4835 = vmatpush.bf16.msrb.mxu2 %v7121_v34  ;;  %v4453_v15 = vpop.f32.mrf.mxu2  ;;  %v7168_v34 = vld [vmem:[#allocation8 + $0x878] sm:$0xf] }
 0x258   :  { %4812 = vmatpush.bf16.msrb.mxu0 %v6869_v41  ;;  %v4467_v41 = vpop.f32.mrf.mxu3  ;;  %v4466_v12 = vadd.f32 %v4465_v2, %v4452_v26  ;;  %v7169_v28 = vor.u32 %v7793_v60, %v7168_v34  ;;  %v7156_v2 = vld [vmem:[#allocation8 + $0x860] sm:$0xf]  ;;  %v4863_v34 = vld [vmem:[#allocation11 + $0x8] sm:$0xff] }
 0x259   :  { %4826 = vmatpush.bf16.msrb.mxu1 %v6965_v55  ;;  %4799 = vmatpush.bf16.msra.mxu3 %v6761_v25  ;;  %v7192_v55 = vld [vmem:[#allocation8 + $0x8a8] sm:$0xf]  ;;  %v7790_v25 = vld [vmem:[#allocation8 + $0x868] sm:$0xf0]  ;;  %vm4869_vm2 = vcmp.ge.s32.totalorder %v4863_v34, 3006477107 }
 0x25b   :  { %4836 = vmatpush.bf16.msrb.mxu2 %v7109_v17 }
 0x25c   :  { %4813 = vmatpush.bf16.msrb.mxu0 %v6857_v14  ;;  %4800 = vmatmul.bf16.vlgmr.msra.gmra.mxu3 %v8283_v21  ;;  %v7193_v21 = vor.u32 %v7799_v44, %v7192_v55  ;;  %v4862_v14 = vld [vmem:[#allocation11] sm:$0xff] }
 0x25d   :  { %4827 = vmatpush.bf16.msrb.mxu1 %v6953_v13  ;;  %4848 = vmatpush.bf16.msrb.mxu3 %v7229_v18  ;;  %v4493_v0 = vpop.f32.mrf.mxu1  ;;  %vm4868_vm0 = vcmp.ge.s32.totalorder %v4862_v14, 3006477107 }
 0x25f   :  { %4814 = vmatmul.bf16.vlgmr.msrb.gmra.mxu0 %v8291_v9  ;;  %v4412_v9 = vadd.f32 %v4411_v20, %v4398_v38  ;;  %4837 = vmatpush.bf16.msrb.mxu2 %v7097_v42  ;;  %v4507_v46 = vpop.f32.mrf.mxu2  ;;  %v7157_v38 = vor.u32 %v7790_v25, %v7156_v2  ;;  %v4866_v25 = vld [vmem:[#allocation11 + $0x20] sm:$0xff] }
 0x260   :  { %4828 = vmatmul.bf16.vlgmr.msrb.gmra.mxu1 %v8295_v61  ;;  %v4479_v61 = vpop.f32.mrf.mxu0  ;;  %v4521_v58 = vpop.f32.mrf.mxu3  ;;  %vm4872_vm3 = vcmp.ge.s32.totalorder %v4866_v25, 3006477107 }
 0x261   :  { %v4426_v63 = vadd.f32 %v4425_v27, %v4412_v9  ;;  %4849 = vmatpush.bf16.msrb.mxu3 %v7217_v48  ;;  %v4480_v45 = vadd.f32 %v4479_v61, %v4466_v12 }
 0x263   :  { %v4440_v20 = vadd.f32 %v4439_v5, %v4426_v63  ;;  %4838 = vmatpush.bf16.msrb.mxu2 %v7085_v30  ;;  %v4494_v56 = vadd.f32 %v4493_v0, %v4480_v45  ;;  %v2817_v63 = vperm.slane %v8330_v49, 1 }
 0x265   :  { %4850 = vmatpush.bf16.msrb.mxu3 %v7205_v31  ;;  %v4454_v59 = vadd.f32 %v4453_v15, %v4440_v20  ;;  %v4508_v36 = vadd.f32 %v4507_v46, %v4494_v56  ;;  %v4495_v8 = vpop.f32.mrf.mxu1 }
 0x267   :  { %4839 = vmatpush.bf16.msrb.mxu2 %v7073_v50  ;;  %v4468_v7 = vadd.f32 %v4467_v41, %v4454_v59  ;;  %v4522_v1 = vadd.f32 %v4521_v58, %v4508_v36  ;;  %v4509_v27 = vpop.f32.mrf.mxu2 }
 0x268   :  { %v4481_v13 = vpop.f32.mrf.mxu0  ;;  %v4523_v5 = vpop.f32.mrf.mxu3 }
 0x269   :  { %4851 = vmatpush.bf16.msrb.mxu3 %v7193_v21  ;;  %v4482_v52 = vadd.f32 %v4481_v13, %v4468_v7  ;;  %v4874_v29 = vmul.f32 1.25, %v4522_v1 }
 0x26b   :  { %4840 = vmatpush.bf16.msrb.mxu2 %v7061_v62  ;;  %v4496_v54 = vadd.f32 %v4495_v8, %v4482_v52  ;;  %v4880_v17 = vsel %vm4868_vm0, %v4874_v29, 0.0 }
 0x26c   :  { %4886 = vst [vmem:[#allocation13] sm:$0xff] %v4880_v17 }
 0x26d   :  { %4852 = vmatpush.bf16.msrb.mxu3 %v7181_v32  ;;  %v4510_v18 = vadd.f32 %v4509_v27, %v4496_v54  ;;  %v4549_v33 = vpop.f32.mrf.mxu1 }
 0x26f   :  { %4841 = vmatpush.bf16.msrb.mxu2 %v7049_v40  ;;  %v4524_v39 = vadd.f32 %v4523_v5, %v4510_v18  ;;  %v4563_v9 = vpop.f32.mrf.mxu2 }
 0x270   :  { %v4535_v48 = vpop.f32.mrf.mxu0  ;;  %v4577_v23 = vpop.f32.mrf.mxu3 }
 0x271   :  { %4853 = vmatpush.bf16.msrb.mxu3 %v7169_v28  ;;  %v4877_v15 = vmul.f32 1.25, %v4524_v39  ;;  %v4536_v61 = vadd.f32 %v4535_v48, %v2817_v63 }
 0x272   :  { %4842 = vmatmul.bf16.vlgmr.msrb.gmra.mxu2 %v8302_v24 }
 0x273   :  { %v4883_v42 = vsel %vm4871_vm1, %v4877_v15, 0.0  ;;  %v4550_v31 = vadd.f32 %v4549_v33, %v4536_v61  ;;  %v2818_v15 = vperm.slane %v8330_v49, 2 }
 0x274   :  { %4889 = vst [vmem:[#allocation13 + $0x18] sm:$0xff] %v4883_v42 }
 0x275   :  { %4854 = vmatpush.bf16.msrb.mxu3 %v7157_v38  ;;  %v4551_v53 = vpop.f32.mrf.mxu1  ;;  %v4564_v37 = vadd.f32 %v4563_v9, %v4550_v31 }
 0x277   :  { %v4565_v26 = vpop.f32.mrf.mxu2  ;;  %v4578_v35 = vadd.f32 %v4577_v23, %v4564_v37 }
 0x278   :  { %v4537_v47 = vpop.f32.mrf.mxu0  ;;  %v4579_v24 = vpop.f32.mrf.mxu3 }
 0x279   :  { %4855 = vmatpush.bf16.msrb.mxu3 %v7145_v11  ;;  %v4538_v55 = vadd.f32 %v4537_v47, %v2817_v63 }
 0x27b   :  { %v4552_v44 = vadd.f32 %v4551_v53, %v4538_v55 }
 0x27c   :  { %4856 = vmatmul.bf16.vlgmr.msrb.gmra.mxu3 %v8305_v6 }
 0x27d   :  { %v4605_v41 = vpop.f32.mrf.mxu1  ;;  %v4566_v6 = vadd.f32 %v4565_v26, %v4552_v44 }
 0x27f   :  { %v4619_v0 = vpop.f32.mrf.mxu2  ;;  %v4580_v45 = vadd.f32 %v4579_v24, %v4566_v6 }
 0x280   :  { %v4591_v30 = vpop.f32.mrf.mxu0  ;;  %v4633_v46 = vpop.f32.mrf.mxu3 }
 0x281   :  { %v4592_v12 = vadd.f32 %v4591_v30, %v4578_v35 }
 0x283   :  { %v4606_v50 = vadd.f32 %v4605_v41, %v4592_v12 }
 0x285   :  { %v4607_v21 = vpop.f32.mrf.mxu1  ;;  %v4620_v22 = vadd.f32 %v4619_v0, %v4606_v50 }
 0x287   :  { %v4621_v43 = vpop.f32.mrf.mxu2  ;;  %v4634_v57 = vadd.f32 %v4633_v46, %v4620_v22 }
 0x288   :  { %v4593_v20 = vpop.f32.mrf.mxu0  ;;  %v4635_v56 = vpop.f32.mrf.mxu3 }
 0x289   :  { %v4594_v51 = vadd.f32 %v4593_v20, %v4580_v45 }
 0x28b   :  { %v4608_v36 = vadd.f32 %v4607_v21, %v4594_v51 }
 0x28d   :  { %v4661_v62 = vpop.f32.mrf.mxu1  ;;  %v4622_v19 = vadd.f32 %v4621_v43, %v4608_v36 }
 0x28f   :  { %v4636_v13 = vadd.f32 %v4635_v56, %v4622_v19  ;;  %v4864_v56 = vld [vmem:[#allocation11 + $0x10] sm:$0xff] }
 0x290   :  { %v4647_v59 = vpop.f32.mrf.mxu0  ;;  %vm4870_vm4 = vcmp.ge.s32.totalorder %v4864_v56, 3006477107 }
 0x291   :  { %v4648_v14 = vadd.f32 %v4647_v59, %v4634_v57  ;;  %v4675_v32 = vpop.f32.mrf.mxu2 }
 0x293   :  { %v4662_v58 = vadd.f32 %v4661_v62, %v4648_v14 }
 0x295   :  { %v4676_v4 = vadd.f32 %v4675_v32, %v4662_v58  ;;  %v4663_v29 = vpop.f32.mrf.mxu1 }
 0x298   :  { %v4649_v60 = vpop.f32.mrf.mxu0 }
 0x299   :  { %v4650_v1 = vadd.f32 %v4649_v60, %v4636_v13  ;;  %v4677_v40 = vpop.f32.mrf.mxu2 }
 0x29b   :  { %v4689_v7 = vpop.f32.mrf.mxu3  ;;  %v4664_v28 = vadd.f32 %v4663_v29, %v4650_v1 }
 0x29c   :  { %v4690_v8 = vadd.f32 %v4689_v7, %v4676_v4  ;;  %v4867_v7 = vld [vmem:[#allocation11 + $0x28] sm:$0xff] }
 0x29d   :  { %v4678_v2 = vadd.f32 %v4677_v40, %v4664_v28  ;;  %v4717_v5 = vpop.f32.mrf.mxu1  ;;  %vm4873_vm5 = vcmp.ge.s32.totalorder %v4867_v7, 3006477107 }
 0x29e   :  { %v4875_v52 = vmul.f32 1.25, %v4690_v8 }
 0x2a0   :  { %v4881_v27 = vsel %vm4869_vm2, %v4875_v52, 0.0  ;;  %v4703_v38 = vpop.f32.mrf.mxu0 }
 0x2a1   :  { %4887 = vst [vmem:[#allocation13 + $0x8] sm:$0xff] %v4881_v27  ;;  %v4704_v48 = vadd.f32 %v4703_v38, %v2818_v15 }
 0x2a3   :  { %v4691_v54 = vpop.f32.mrf.mxu3  ;;  %v4718_v9 = vadd.f32 %v4717_v5, %v4704_v48 }
 0x2a4   :  { %v4692_v17 = vadd.f32 %v4691_v54, %v4678_v2 }
 0x2a5   :  { %v4719_v11 = vpop.f32.mrf.mxu1 }
 0x2a6   :  { %v4878_v18 = vmul.f32 1.25, %v4692_v17 }
 0x2a8   :  { %v4884_v3 = vsel %vm4872_vm3, %v4878_v18, 0.0  ;;  %v4705_v10 = vpop.f32.mrf.mxu0 }
 0x2a9   :  { %4890 = vst [vmem:[#allocation13 + $0x20] sm:$0xff] %v4884_v3  ;;  %v4706_v63 = vadd.f32 %v4705_v10, %v2818_v15 }
 0x2ab   :  { %v4720_v30 = vadd.f32 %v4719_v11, %v4706_v63 }
 0x2b5   :  { %v4731_v16 = vpop.f32.mrf.mxu2 }
 0x2b6   :  { %v4732_v47 = vadd.f32 %v4731_v16, %v4718_v9 }
 0x2bc   :  { %v4759_v33 = vpop.f32.mrf.mxu0 }
 0x2bd   :  { %v4733_v42 = vpop.f32.mrf.mxu2  ;;  %v4773_v53 = vpop.f32.mrf.mxu1 }
 0x2be   :  { %v4734_v41 = vadd.f32 %v4733_v42, %v4720_v30 }
 0x2bf   :  { %v4745_v39 = vpop.f32.mrf.mxu3 }
 0x2c0   :  { %v4746_v61 = vadd.f32 %v4745_v39, %v4732_v47 }
 0x2c2   :  { %v4760_v24 = vadd.f32 %v4759_v33, %v4746_v61 }
 0x2c4   :  { %v4761_v31 = vpop.f32.mrf.mxu0  ;;  %v4774_v35 = vadd.f32 %v4773_v53, %v4760_v24 }
 0x2c5   :  { %v4775_v55 = vpop.f32.mrf.mxu1 }
 0x2c7   :  { %v4747_v23 = vpop.f32.mrf.mxu3 }
 0x2c8   :  { %v4748_v0 = vadd.f32 %v4747_v23, %v4734_v41 }
 0x2ca   :  { %v4762_v12 = vadd.f32 %v4761_v31, %v4748_v0 }
 0x2cc   :  { %v4776_v45 = vadd.f32 %v4775_v55, %v4762_v12 }
 0x2d5   :  { %v4787_v26 = vpop.f32.mrf.mxu2 }
 0x2d6   :  { %v4788_v44 = vadd.f32 %v4787_v26, %v4774_v35 }
 0x2dc   :  { %v4815_v46 = vpop.f32.mrf.mxu0 }
 0x2dd   :  { %v4789_v49 = vpop.f32.mrf.mxu2  ;;  %v4829_v21 = vpop.f32.mrf.mxu1 }
 0x2de   :  { %v4790_v22 = vadd.f32 %v4789_v49, %v4776_v45 }
 0x2df   :  { %v4801_v37 = vpop.f32.mrf.mxu3 }
 0x2e0   :  { %v4802_v20 = vadd.f32 %v4801_v37, %v4788_v44 }
 0x2e2   :  { %v4816_v50 = vadd.f32 %v4815_v46, %v4802_v20 }
 0x2e4   :  { %v4830_v57 = vadd.f32 %v4829_v21, %v4816_v50  ;;  %v4817_v36 = vpop.f32.mrf.mxu0 }
 0x2e5   :  { %v4831_v13 = vpop.f32.mrf.mxu1 }
 0x2e7   :  { %v4803_v6 = vpop.f32.mrf.mxu3 }
 0x2e8   :  { %v4804_v51 = vadd.f32 %v4803_v6, %v4790_v22 }
 0x2ea   :  { %v4818_v62 = vadd.f32 %v4817_v36, %v4804_v51 }
 0x2ec   :  { %v4832_v4 = vadd.f32 %v4831_v13, %v4818_v62 }
 0x2f5   :  { %v4843_v43 = vpop.f32.mrf.mxu2 }
 0x2f6   :  { %v4844_v59 = vadd.f32 %v4843_v43, %v4830_v57 }
 0x2fd   :  { %v4845_v58 = vpop.f32.mrf.mxu2 }
 0x2fe   :  { %v4846_v60 = vadd.f32 %v4845_v58, %v4832_v4 }
 0x2ff   :  { %v4857_v14 = vpop.f32.mrf.mxu3 }
 0x300   :  { %v4858_v32 = vadd.f32 %v4857_v14, %v4844_v59 }
 0x302   :  { %v4876_v19 = vmul.f32 1.25, %v4858_v32 }
 0x304   :  { %v4882_v34 = vsel %vm4870_vm4, %v4876_v19, 0.0 }
 0x305   :  { %4888 = vst [vmem:[#allocation13 + $0x10] sm:$0xff] %v4882_v34 }
 0x307   :  { %v4859_v1 = vpop.f32.mrf.mxu3 }
 0x308   :  { %v4860_v8 = vadd.f32 %v4859_v1, %v4846_v60 }
 0x30a   :  { %v4879_v52 = vmul.f32 1.25, %v4860_v8 }
 0x30c   :  { %v4885_v29 = vsel %vm4873_vm5, %v4879_v52, 0.0 }
 0x30d   :  { %4891 = vst [vmem:[#allocation13 + $0x28] sm:$0xff] %v4885_v29 }
 0x30e   :  { %4904 = dma.vmem_to_hbm [thread:$0]  %s4897_s5, 768, %s4899_s7, [#allocation4], %s8010_s27, %s8010_s27, %s8011_s28  }
 0x30f   :  { %7998 = dma.done.wait [#allocation4], 768  }
 0x310   :  { %7999 = vsyncadd [#allocation4], 4294966528 }
 0x311   :  { %4909 = vsyncpa [#allocation3], 1 }
 0x312   :  { %4910 = vsyncpa [#allocation6], 1 }
 0x313   :  { %4911 = vsyncpa [#allocation9], 1 }
 0x314   :  { %4912 = vsyncpa [#allocation12], 1 }
 0x315   :  { %4913 = vsyncpa [#allocation4], 1 }

</bundles_post_ra>
